<compile_context>
chip_gen: v7x
topology: tpu7x:2x2x1
jax: 0.10.0
libtpu: 0.0.40
codegen_flags: <defaults>
</compile_context>

<pallas_src>
import functools

import jax
import jax.numpy as jnp
import numpy as np
from jax import lax
from jax.experimental import pallas as pl
from jax.experimental.pallas import tpu as pltpu

BOARD = 5                      # minichess board 5x5
K = 3                          # conv kernel size
P = (BOARD - K + 1) ** 2       # 9 conv1 output positions == conv2 receptive field
C1 = 64
C2 = 256
FC1 = 128
BN_EPS = 1e-5
LANE = 128
NEG_INF = -1e30


def _round_up(x, m):
    return (x + m - 1) // m * m


# --------------------------------------------------------------------------
# Pallas kernel: whole forward pass in one fused kernel, batch-tiled grid.
# --------------------------------------------------------------------------
def minichess_kernel(action_size,
                     x_ref,              # (TN, XCOLS)  bf16 im2col rows (zero padded)
                     w1_ref,             # (XCOLS, P*C1) bf16 block-diagonal conv1 weight
                     s1_ref, b1_ref,     # (1, P*C1) f32  bn1 scale/shift (conv bias folded)
                     w2_ref,             # (P*C1, C2) bf16 conv2 weight (single K=576 matmul)
                     s2_ref, b2_ref,     # (1, C2)   f32
                     wfc1_ref,           # (C2, FC1) bf16
                     sfc_ref, bfc_ref,   # (1, FC1)  f32
                     w34_ref, b34_ref,   # (FC1, OUTW) bf16 / (1, OUTW) f32; cols [0,A)=fc3, col A=fc4
                     out_ref):           # (TN, OUTW) f32; cols [0,A)=log_softmax, col A=tanh(v)
    f32 = jnp.float32
    bf16 = jnp.bfloat16

    # conv1 + bn1 + relu: one matmul against the block-diagonal per-position weight.
    h1 = jnp.dot(x_ref[...], w1_ref[...], preferred_element_type=f32)        # (TN, 576)
    h1 = jnp.maximum(h1 * s1_ref[...] + b1_ref[...], 0.0)

    # conv2 (1x1 spatial output) + bn2 + relu: one K = P*C1 = 576 matmul.
    h2 = jnp.dot(h1.astype(bf16), w2_ref[...], preferred_element_type=f32)   # (TN, 256)
    h2 = jnp.maximum(h2 * s2_ref[...] + b2_ref[...], 0.0)

    # fc1 + fc_bn1 + relu.
    h3 = jnp.dot(h2.astype(bf16), wfc1_ref[...], preferred_element_type=f32)  # (TN, 128)
    h3 = jnp.maximum(h3 * sfc_ref[...] + bfc_ref[...], 0.0)
    # TODO(synk): dropout is identity in eval mode; training-mode RNG dropout mask not implemented.

    # Fused policy + value heads into one lane-dense output slab.
    z = jnp.dot(h3.astype(bf16), w34_ref[...], preferred_element_type=f32) + b34_ref[...]
    col = lax.broadcasted_iota(jnp.int32, z.shape, 1)
    is_logit = col < action_size
    logits = jnp.where(is_logit, z, NEG_INF)          # mask value + pad cols out of softmax
    m = jnp.max(logits, axis=-1, keepdims=True)
    lse = jnp.log(jnp.sum(jnp.exp(logits - m), axis=-1, keepdims=True)) + m
    logp = logits - lse
    out = jnp.where(is_logit, logp,
                    jnp.where(col == action_size, jnp.tanh(z), 0.0))
    out_ref[...] = out


def _rep_spec(shape):
    nd = len(shape)
    return pl.BlockSpec(shape, lambda i, nd=nd: (0,) * nd)


def _im2col(x_nchw):
    """(N, Cin, 5, 5) -> (N, P*Cin*K*K); patches ordered p=(oh,ow) row-major, then (c,kh,kw)."""
    n, cin, h, w = x_nchw.shape
    patches = []
    for oh in range(h - K + 1):
        for ow in range(w - K + 1):
            patches.append(x_nchw[:, :, oh:oh + K, ow:ow + K].reshape(n, cin * K * K))
    return jnp.concatenate(patches, axis=1)
    # TODO(synk): for very large self-play batches, stream raw (N, Cin*25) tiles and build
    # the patches in-kernel to cut HBM read traffic ~3x (im2col inflates bytes per row).


def minichess_forward(x_nchw, kernel_params, action_size, *, tile_n=256):
    """Run the fused Pallas kernel. x_nchw: (N, Cin, 5, 5) float32."""
    n, cin, h, w = x_nchw.shape
    assert h == BOARD and w == BOARD

    w1big = kernel_params[0]
    xcols = w1big.shape[0]                 # round_up(P*Cin*K*K, 128)
    outw = kernel_params[-1].shape[1]      # round_up(action_size + 1, 128)

    x_col = _im2col(x_nchw).astype(jnp.bfloat16)
    x_col = jnp.pad(x_col, ((0, 0), (0, xcols - x_col.shape[1])))

    n_pad = _round_up(n, tile_n)
    if n_pad != n:                         # pad batch so every tile is full; sliced off below
        x_col = jnp.pad(x_col, ((0, n_pad - n), (0, 0)))

    grid = (n_pad // tile_n,)
    in_specs = [pl.BlockSpec((tile_n, xcols), lambda i: (i, 0))] + \
               [_rep_spec(p.shape) for p in kernel_params]
    out_spec = pl.BlockSpec((tile_n, outw), lambda i: (i, 0))

    fn = pl.pallas_call(
        functools.partial(minichess_kernel, action_size),
        out_shape=jax.ShapeDtypeStruct((n_pad, outw), jnp.float32),
        grid=grid,
        in_specs=in_specs,
        out_specs=out_spec,
        compiler_params=pltpu.CompilerParams(
            dimension_semantics=("parallel",)),   # batch tiles are independent (v7x 2-TC shard)
    )
    out = fn(x_col, *kernel_params)
    return out[:n, :action_size], out[:n, action_size:action_size + 1]


# --------------------------------------------------------------------------
# Deterministic parameter construction (matches nn.Module __init__ shapes).
# All params/inputs are rounded to bf16-representable values so the
# bf16-operand kernel and the f32 reference share identical numbers; remaining
# differences come only from bf16 rounding of intermediate activations.
# --------------------------------------------------------------------------
def _bf16r(x):
    return x.astype(jnp.bfloat16).astype(jnp.float32)


def make_raw_params(key, in_channels, action_size):
    ks = jax.random.split(key, 12)

    def rnd(k, shape, scale=0.1):
        return _bf16r(scale * jax.random.normal(k, shape, dtype=jnp.float32))

    W1 = rnd(ks[0], (C1, in_channels, K, K))
    b1c = rnd(ks[1], (C1,))
    W2 = rnd(ks[2], (C2, C1, K, K))
    b2c = rnd(ks[3], (C2,))
    Wfc1 = rnd(ks[4], (FC1, C2))
    bfc1 = rnd(ks[5], (FC1,))
    W3 = rnd(ks[6], (action_size, FC1))
    b3 = rnd(ks[7], (action_size,))
    W4 = rnd(ks[8], (1, FC1))
    b4 = rnd(ks[9], (1,))

    def bn_params(k, c):
        k1, k2, k3, k4 = jax.random.split(k, 4)
        gamma = _bf16r(1.0 + 0.1 * jax.random.normal(k1, (c,), jnp.float32))
        beta = _bf16r(0.1 * jax.random.normal(k2, (c,), jnp.float32))
        mean = _bf16r(0.1 * jax.random.normal(k3, (c,), jnp.float32))
        var = _bf16r(0.5 + jnp.abs(jax.random.normal(k4, (c,), jnp.float32)))
        return gamma, beta, mean, var

    bn1 = bn_params(ks[10], C1)
    bn2 = bn_params(ks[11], C2)
    bnf = bn_params(jax.random.fold_in(key, 99), FC1)

    return dict(W1=W1, b1c=b1c, W2=W2, b2c=b2c, Wfc1=Wfc1, bfc1=bfc1,
                W3=W3, b3=b3, W4=W4, b4=b4, bn1=bn1, bn2=bn2, bnf=bnf)


def fold_bn(gamma, beta, mean, var, pre_bias):
    scale = gamma / jnp.sqrt(var + BN_EPS)
    shift = beta + scale * (pre_bias - mean)
    return scale[None, :], shift[None, :]


def make_kernel_params(raw, in_channels, action_size):
    patch = in_channels * K * K
    xcols = _round_up(P * patch, LANE)
    outw = _round_up(action_size + 1, LANE)
    bf16 = jnp.bfloat16

    # conv1 -> block-diagonal weight so the 9 per-position matmuls fuse into one.
    w1flat = raw["W1"].reshape(C1, patch).T                          # (patch, 64)
    w1big = jnp.zeros((xcols, P * C1), jnp.float32)
    for p in range(P):
        w1big = w1big.at[p * patch:(p + 1) * patch, p * C1:(p + 1) * C1].set(w1flat)
    s1, b1 = fold_bn(*raw["bn1"], raw["b1c"])                        # (1, 64)
    s1big = jnp.tile(s1, (1, P))                                     # (1, 576)
    b1big = jnp.tile(b1, (1, P))

    # conv2 -> single (P*C1, C2) matmul; row index = p*C1 + c1 with p = kh*3 + kw.
    w2big = jnp.transpose(raw["W2"].reshape(C2, C1, P), (2, 1, 0)).reshape(P * C1, C2)
    s2, b2 = fold_bn(*raw["bn2"], raw["b2c"])

    wfc1 = raw["Wfc1"].T                                             # (256, 128)
    sfc, bfc = fold_bn(*raw["bnf"], raw["bfc1"])

    # fc3 + fc4 fused into one lane-dense head: cols [0,A)=policy, col A=value, rest zero pad.
    w34 = jnp.zeros((FC1, outw), jnp.float32)
    w34 = w34.at[:, :action_size].set(raw["W3"].T)
    w34 = w34.at[:, action_size].set(raw["W4"][0])
    b34 = jnp.zeros((1, outw), jnp.float32)
    b34 = b34.at[0, :action_size].set(raw["b3"])
    b34 = b34.at[0, action_size].set(raw["b4"][0])

    return (w1big.astype(bf16), s1big, b1big,
            w2big.astype(bf16), s2, b2,
            wfc1.astype(bf16), sfc, bfc,
            w34.astype(bf16), b34)


# --------------------------------------------------------------------------
# Pure-JAX reference (mirrors the PyTorch forward in eval mode), f32 math.
# --------------------------------------------------------------------------
def reference_forward(x, raw):
    def bn(x, params, axis):
        gamma, beta, mean, var = params
        shape = [1] * x.ndim
        shape[axis] = -1
        return (x - mean.reshape(shape)) / jnp.sqrt(var.reshape(shape) + BN_EPS) \
            * gamma.reshape(shape) + beta.reshape(shape)

    s = lax.conv_general_dilated(x, raw["W1"], (1, 1), "VALID",
                                 dimension_numbers=("NCHW", "OIHW", "NCHW"))
    s = s + raw["b1c"][None, :, None, None]
    s = jax.nn.relu(bn(s, raw["bn1"], 1))
    s = lax.conv_general_dilated(s, raw["W2"], (1, 1), "VALID",
                                 dimension_numbers=("NCHW", "OIHW", "NCHW"))
    s = s + raw["b2c"][None, :, None, None]
    s = jax.nn.relu(bn(s, raw["bn2"], 1))
    s = s.reshape(-1, C2)
    s = s @ raw["Wfc1"].T + raw["bfc1"]
    s = jax.nn.relu(bn(s, raw["bnf"], 1))       # dropout identity (eval)
    pi = s @ raw["W3"].T + raw["b3"]
    v = s @ raw["W4"].T + raw["b4"]
    return jax.nn.log_softmax(pi, axis=1), jnp.tanh(v)


if __name__ == "__main__":
    N = 2
    IN_CHANNELS = 4
    ACTION_SIZE = 8

    key = jax.random.PRNGKey(0)
    kx, kp = jax.random.split(key)
    x = _bf16r(jax.random.normal(kx, (N, IN_CHANNELS, BOARD, BOARD), dtype=jnp.float32))

    raw = make_raw_params(kp, IN_CHANNELS, ACTION_SIZE)
    kparams = make_kernel_params(raw, IN_CHANNELS, ACTION_SIZE)

    log_pi, v = minichess_forward(x, kparams, ACTION_SIZE)
    jax.block_until_ready((log_pi, v))

    ref_log_pi, ref_v = reference_forward(x, raw)
    np.testing.assert_allclose(np.asarray(log_pi), np.asarray(ref_log_pi),
                               rtol=2e-2, atol=2e-2)
    np.testing.assert_allclose(np.asarray(v), np.asarray(ref_v),
                               rtol=2e-2, atol=2e-2)

    print("KERNEL_OK")
</pallas_src>

<mosaic_0001>
module attributes {stable_mosaic.version = 11 : i64} {
  func.func @minichess_kernel(%arg0: i32, %arg1: memref<256x384xbf16, #tpu.memory_space<vmem>>, %arg2: memref<384x576xbf16, #tpu.memory_space<vmem>>, %arg3: memref<1x576xf32, #tpu.memory_space<vmem>>, %arg4: memref<1x576xf32, #tpu.memory_space<vmem>>, %arg5: memref<576x256xbf16, #tpu.memory_space<vmem>>, %arg6: memref<1x256xf32, #tpu.memory_space<vmem>>, %arg7: memref<1x256xf32, #tpu.memory_space<vmem>>, %arg8: memref<256x128xbf16, #tpu.memory_space<vmem>>, %arg9: memref<1x128xf32, #tpu.memory_space<vmem>>, %arg10: memref<1x128xf32, #tpu.memory_space<vmem>>, %arg11: memref<128x128xbf16, #tpu.memory_space<vmem>>, %arg12: memref<1x128xf32, #tpu.memory_space<vmem>>, %arg13: memref<256x128xf32, #tpu.memory_space<vmem>>) attributes {dimension_semantics = [#tpu.dimension_semantics<parallel>], iteration_bounds = array<i64: 1>, scalar_prefetch = 0 : i64, scratch_operands = 0 : i64, tpu.core_type = #tpu.core_type<tc>, window_params = [{transform_indices = @transform_0, window_bounds = array<i64: 256, 384>}, {pipeline_mode = #tpu.pipeline_mode<synchronous>, transform_indices = @transform_1, window_bounds = array<i64: 384, 576>}, {pipeline_mode = #tpu.pipeline_mode<synchronous>, transform_indices = @transform_2, window_bounds = array<i64: 1, 576>}, {pipeline_mode = #tpu.pipeline_mode<synchronous>, transform_indices = @transform_3, window_bounds = array<i64: 1, 576>}, {pipeline_mode = #tpu.pipeline_mode<synchronous>, transform_indices = @transform_4, window_bounds = array<i64: 576, 256>}, {pipeline_mode = #tpu.pipeline_mode<synchronous>, transform_indices = @transform_5, window_bounds = array<i64: 1, 256>}, {pipeline_mode = #tpu.pipeline_mode<synchronous>, transform_indices = @transform_6, window_bounds = array<i64: 1, 256>}, {pipeline_mode = #tpu.pipeline_mode<synchronous>, transform_indices = @transform_7, window_bounds = array<i64: 256, 128>}, {pipeline_mode = #tpu.pipeline_mode<synchronous>, transform_indices = @transform_8, window_bounds = array<i64: 1, 128>}, {pipeline_mode = #tpu.pipeline_mode<synchronous>, transform_indices = @transform_9, window_bounds = array<i64: 1, 128>}, {pipeline_mode = #tpu.pipeline_mode<synchronous>, transform_indices = @transform_10, window_bounds = array<i64: 128, 128>}, {pipeline_mode = #tpu.pipeline_mode<synchronous>, transform_indices = @transform_11, window_bounds = array<i64: 1, 128>}, {transform_indices = @transform_12, window_bounds = array<i64: 256, 128>}]} {
    %c0 = arith.constant 0 : index
    %c0_0 = arith.constant 0 : index
    %0 = vector.load %arg1[%c0, %c0_0] : memref<256x384xbf16, #tpu.memory_space<vmem>>, vector<256x384xbf16>
    %c0_1 = arith.constant 0 : index
    %c0_2 = arith.constant 0 : index
    %1 = vector.load %arg2[%c0_1, %c0_2] : memref<384x576xbf16, #tpu.memory_space<vmem>>, vector<384x576xbf16>
    %cst = arith.constant dense<0.000000e+00> : vector<256x576xf32>
    %2 = tpu.matmul %0, %1, %cst {dimension_numbers = #tpu.dot_dimension_numbers<[1], [0], [0], [1], [0, 0, 1, 1], [], []>} : vector<256x384xbf16>, vector<384x576xbf16>, vector<256x576xf32> -> vector<256x576xf32>
    %c0_3 = arith.constant 0 : index
    %c0_4 = arith.constant 0 : index
    %3 = vector.load %arg3[%c0_3, %c0_4] : memref<1x576xf32, #tpu.memory_space<vmem>>, vector<1x576xf32>
    %4 = vector.broadcast %3 : vector<1x576xf32> to vector<256x576xf32>
    %5 = arith.mulf %2, %4 : vector<256x576xf32>
    %c0_5 = arith.constant 0 : index
    %c0_6 = arith.constant 0 : index
    %6 = vector.load %arg4[%c0_5, %c0_6] : memref<1x576xf32, #tpu.memory_space<vmem>>, vector<1x576xf32>
    %7 = vector.broadcast %6 : vector<1x576xf32> to vector<256x576xf32>
    %8 = arith.addf %5, %7 : vector<256x576xf32>
    %cst_7 = arith.constant 0.000000e+00 : f32
    %9 = vector.broadcast %cst_7 : f32 to vector<256x576xf32>
    %10 = arith.maximumf %8, %9 : vector<256x576xf32>
    %11 = arith.truncf %10 : vector<256x576xf32> to vector<256x576xbf16>
    %c0_8 = arith.constant 0 : index
    %c0_9 = arith.constant 0 : index
    %12 = vector.load %arg5[%c0_8, %c0_9] : memref<576x256xbf16, #tpu.memory_space<vmem>>, vector<576x256xbf16>
    %cst_10 = arith.constant dense<0.000000e+00> : vector<256x256xf32>
    %13 = tpu.matmul %11, %12, %cst_10 {dimension_numbers = #tpu.dot_dimension_numbers<[1], [0], [0], [1], [0, 0, 1, 1], [], []>} : vector<256x576xbf16>, vector<576x256xbf16>, vector<256x256xf32> -> vector<256x256xf32>
    %c0_11 = arith.constant 0 : index
    %c0_12 = arith.constant 0 : index
    %14 = vector.load %arg6[%c0_11, %c0_12] : memref<1x256xf32, #tpu.memory_space<vmem>>, vector<1x256xf32>
    %15 = vector.broadcast %14 : vector<1x256xf32> to vector<256x256xf32>
    %16 = arith.mulf %13, %15 : vector<256x256xf32>
    %c0_13 = arith.constant 0 : index
    %c0_14 = arith.constant 0 : index
    %17 = vector.load %arg7[%c0_13, %c0_14] : memref<1x256xf32, #tpu.memory_space<vmem>>, vector<1x256xf32>
    %18 = vector.broadcast %17 : vector<1x256xf32> to vector<256x256xf32>
    %19 = arith.addf %16, %18 : vector<256x256xf32>
    %cst_15 = arith.constant 0.000000e+00 : f32
    %20 = vector.broadcast %cst_15 : f32 to vector<256x256xf32>
    %21 = arith.maximumf %19, %20 : vector<256x256xf32>
    %22 = arith.truncf %21 : vector<256x256xf32> to vector<256x256xbf16>
    %c0_16 = arith.constant 0 : index
    %c0_17 = arith.constant 0 : index
    %23 = vector.load %arg8[%c0_16, %c0_17] : memref<256x128xbf16, #tpu.memory_space<vmem>>, vector<256x128xbf16>
    %cst_18 = arith.constant dense<0.000000e+00> : vector<256x128xf32>
    %24 = tpu.matmul %22, %23, %cst_18 {dimension_numbers = #tpu.dot_dimension_numbers<[1], [0], [0], [1], [0, 0, 1, 1], [], []>} : vector<256x256xbf16>, vector<256x128xbf16>, vector<256x128xf32> -> vector<256x128xf32>
    %c0_19 = arith.constant 0 : index
    %c0_20 = arith.constant 0 : index
    %25 = vector.load %arg9[%c0_19, %c0_20] : memref<1x128xf32, #tpu.memory_space<vmem>>, vector<1x128xf32>
    %26 = vector.broadcast %25 : vector<1x128xf32> to vector<256x128xf32>
    %27 = arith.mulf %24, %26 : vector<256x128xf32>
    %c0_21 = arith.constant 0 : index
    %c0_22 = arith.constant 0 : index
    %28 = vector.load %arg10[%c0_21, %c0_22] : memref<1x128xf32, #tpu.memory_space<vmem>>, vector<1x128xf32>
    %29 = vector.broadcast %28 : vector<1x128xf32> to vector<256x128xf32>
    %30 = arith.addf %27, %29 : vector<256x128xf32>
    %cst_23 = arith.constant 0.000000e+00 : f32
    %31 = vector.broadcast %cst_23 : f32 to vector<256x128xf32>
    %32 = arith.maximumf %30, %31 : vector<256x128xf32>
    %33 = arith.truncf %32 : vector<256x128xf32> to vector<256x128xbf16>
    %c0_24 = arith.constant 0 : index
    %c0_25 = arith.constant 0 : index
    %34 = vector.load %arg11[%c0_24, %c0_25] : memref<128x128xbf16, #tpu.memory_space<vmem>>, vector<128x128xbf16>
    %cst_26 = arith.constant dense<0.000000e+00> : vector<256x128xf32>
    %35 = tpu.matmul %33, %34, %cst_26 {dimension_numbers = #tpu.dot_dimension_numbers<[1], [0], [0], [1], [0, 0, 1, 1], [], []>} : vector<256x128xbf16>, vector<128x128xbf16>, vector<256x128xf32> -> vector<256x128xf32>
    %c0_27 = arith.constant 0 : index
    %c0_28 = arith.constant 0 : index
    %36 = vector.load %arg12[%c0_27, %c0_28] : memref<1x128xf32, #tpu.memory_space<vmem>>, vector<1x128xf32>
    %37 = vector.broadcast %36 : vector<1x128xf32> to vector<256x128xf32>
    %38 = arith.addf %35, %37 : vector<256x128xf32>
    %39 = tpu.iota {dimensions = array<i32: 1>} : vector<256x128xi32>
    %c8_i32 = arith.constant 8 : i32
    %40 = vector.broadcast %c8_i32 : i32 to vector<256x128xi32>
    %41 = arith.cmpi slt, %39, %40 : vector<256x128xi32>
    %cst_29 = arith.constant -1.000000e+30 : f32
    %42 = vector.broadcast %cst_29 : f32 to vector<256x128xf32>
    %43 = arith.select %41, %38, %42 : vector<256x128xi1>, vector<256x128xf32>
    %cst_30 = arith.constant dense<0xFF800000> : vector<256xf32>
    %44 = vector.multi_reduction <maximumf>, %43, %cst_30 [1] : vector<256x128xf32> to vector<256xf32>
    %45 = vector.shape_cast %44 : vector<256xf32> to vector<256x1xf32>
    %46 = vector.broadcast %45 : vector<256x1xf32> to vector<256x128xf32>
    %47 = arith.subf %43, %46 : vector<256x128xf32>
    %48 = math.exp %47 : vector<256x128xf32>
    %cst_31 = arith.constant dense<0.000000e+00> : vector<256xf32>
    %49 = vector.multi_reduction <add>, %48, %cst_31 [1] : vector<256x128xf32> to vector<256xf32>
    %50 = vector.shape_cast %49 : vector<256xf32> to vector<256x1xf32>
    %51 = math.log %50 : vector<256x1xf32>
    %52 = arith.addf %51, %45 : vector<256x1xf32>
    %53 = vector.broadcast %52 : vector<256x1xf32> to vector<256x128xf32>
    %54 = arith.subf %43, %53 : vector<256x128xf32>
    %c8_i32_32 = arith.constant 8 : i32
    %55 = vector.broadcast %c8_i32_32 : i32 to vector<256x128xi32>
    %56 = arith.cmpi eq, %39, %55 : vector<256x128xi32>
    %57 = math.tanh %38 : vector<256x128xf32>
    %cst_33 = arith.constant 0.000000e+00 : f32
    %58 = vector.broadcast %cst_33 : f32 to vector<256x128xf32>
    %59 = arith.select %56, %57, %58 : vector<256x128xi1>, vector<256x128xf32>
    %60 = arith.select %41, %54, %59 : vector<256x128xi1>, vector<256x128xf32>
    %c0_34 = arith.constant 0 : index
    %c0_35 = arith.constant 0 : index
    %61 = vector.load %arg13[%c0_34, %c0_35] : memref<256x128xf32, #tpu.memory_space<vmem>>, vector<256x128xf32>
    tpu.vector_store %arg13[%c0_34, %c0_35], %60 {strides = array<i32>} : memref<256x128xf32, #tpu.memory_space<vmem>>, vector<256x128xf32>,
    return
  }
  func.func @transform_0(%arg0: i32) -> (i32, i32) {
    %c0_i32 = arith.constant 0 : i32
    %c0_i32_0 = arith.constant 0 : i32
    return %arg0, %c0_i32 : i32, i32
  }
  func.func @transform_1(%arg0: i32) -> (i32, i32) {
    %c0_i32 = arith.constant 0 : i32
    %c0_i32_0 = arith.constant 0 : i32
    %c0_i32_1 = arith.constant 0 : i32
    return %c0_i32, %c0_i32_0 : i32, i32
  }
  func.func @transform_2(%arg0: i32) -> (i32, i32) {
    %c0_i32 = arith.constant 0 : i32
    %c0_i32_0 = arith.constant 0 : i32
    %c0_i32_1 = arith.constant 0 : i32
    return %c0_i32, %c0_i32_0 : i32, i32
  }
  func.func @transform_3(%arg0: i32) -> (i32, i32) {
    %c0_i32 = arith.constant 0 : i32
    %c0_i32_0 = arith.constant 0 : i32
    %c0_i32_1 = arith.constant 0 : i32
    return %c0_i32, %c0_i32_0 : i32, i32
  }
  func.func @transform_4(%arg0: i32) -> (i32, i32) {
    %c0_i32 = arith.constant 0 : i32
    %c0_i32_0 = arith.constant 0 : i32
    %c0_i32_1 = arith.constant 0 : i32
    return %c0_i32, %c0_i32_0 : i32, i32
  }
  func.func @transform_5(%arg0: i32) -> (i32, i32) {
    %c0_i32 = arith.constant 0 : i32
    %c0_i32_0 = arith.constant 0 : i32
    %c0_i32_1 = arith.constant 0 : i32
    return %c0_i32, %c0_i32_0 : i32, i32
  }
  func.func @transform_6(%arg0: i32) -> (i32, i32) {
    %c0_i32 = arith.constant 0 : i32
    %c0_i32_0 = arith.constant 0 : i32
    %c0_i32_1 = arith.constant 0 : i32
    return %c0_i32, %c0_i32_0 : i32, i32
  }
  func.func @transform_7(%arg0: i32) -> (i32, i32) {
    %c0_i32 = arith.constant 0 : i32
    %c0_i32_0 = arith.constant 0 : i32
    %c0_i32_1 = arith.constant 0 : i32
    return %c0_i32, %c0_i32_0 : i32, i32
  }
  func.func @transform_8(%arg0: i32) -> (i32, i32) {
    %c0_i32 = arith.constant 0 : i32
    %c0_i32_0 = arith.constant 0 : i32
    %c0_i32_1 = arith.constant 0 : i32
    return %c0_i32, %c0_i32_0 : i32, i32
  }
  func.func @transform_9(%arg0: i32) -> (i32, i32) {
    %c0_i32 = arith.constant 0 : i32
    %c0_i32_0 = arith.constant 0 : i32
    %c0_i32_1 = arith.constant 0 : i32
    return %c0_i32, %c0_i32_0 : i32, i32
  }
  func.func @transform_10(%arg0: i32) -> (i32, i32) {
    %c0_i32 = arith.constant 0 : i32
    %c0_i32_0 = arith.constant 0 : i32
    %c0_i32_1 = arith.constant 0 : i32
    return %c0_i32, %c0_i32_0 : i32, i32
  }
  func.func @transform_11(%arg0: i32) -> (i32, i32) {
    %c0_i32 = arith.constant 0 : i32
    %c0_i32_0 = arith.constant 0 : i32
    %c0_i32_1 = arith.constant 0 : i32
    return %c0_i32, %c0_i32_0 : i32, i32
  }
  func.func @transform_12(%arg0: i32) -> (i32, i32) {
    %c0_i32 = arith.constant 0 : i32
    %c0_i32_0 = arith.constant 0 : i32
    return %arg0, %c0_i32 : i32, i32
  }
}

</mosaic_0001>

<bundles_post_ra>
// kernel: tpu_custom_call.1
= control target key start
LH: loop header
LB: loop body
LE: loop exit
PB: predicated region body
PF: predicated region fallthrough
CT: control target
= control target key end

     0   :  { %s9750_s0 = inlined_call_operand.vmem [shape: bf16[256,384], index: 0, kind: input, shape index: {}]   ;;  %s9751_s1 = inlined_call_operand.vmem [shape: bf16[384,576], index: 1, kind: input, shape index: {}]   ;;  %s9752_s2 = inlined_call_operand.vmem [shape: f32[1,576], index: 2, kind: input, shape index: {}]   ;;  %s9753_s3 = inlined_call_operand.vmem [shape: f32[1,576], index: 3, kind: input, shape index: {}]   ;;  %s9754_s4 = inlined_call_operand.vmem [shape: bf16[576,256], index: 4, kind: input, shape index: {}]   ;;  %s9755_s5 = inlined_call_operand.vmem [shape: f32[1,256], index: 5, kind: input, shape index: {}]   ;;  %s9756_s6 = inlined_call_operand.vmem [shape: f32[1,256], index: 6, kind: input, shape index: {}]   ;;  %s9757_s7 = inlined_call_operand.vmem [shape: bf16[256,128], index: 7, kind: input, shape index: {}]   ;;  %s9758_s8 = inlined_call_operand.vmem [shape: f32[1,128], index: 8, kind: input, shape index: {}]   ;;  %s9759_s9 = inlined_call_operand.vmem [shape: f32[1,128], index: 9, kind: input, shape index: {}]   ;;  %s9760_s10 = inlined_call_operand.vmem [shape: bf16[128,128], index: 10, kind: input, shape index: {}]   ;;  %s9761_s11 = inlined_call_operand.vmem [shape: f32[1,128], index: 11, kind: input, shape index: {}]   ;;  %s9762_s12 = inlined_call_operand.hbm [shape: f32[256,128], index: 12, kind: output, shape index: {}]  }
   0x1   :  { %v6269_v0 = vld [vmem:[%s9751_s1 + $0x4] ss:$20 sps:$4 sm:$0xff]   ;;  %v6989_v1 = vld [vmem:[%s9751_s1 + $0xc] ss:$20 sps:$4 sm:$0xff]   ;;  %v6274_v3 = vld [vmem:[%s9751_s1 + $0x8] ss:$20 sps:$4 sm:$0xff]  }
   0x2   :  { %1131 = vmatprep.subr.bf16.mxu0 %v6269_v0  ;;  %v6273_v2 = vld [vmem:[%s9751_s1] ss:$20 sps:$4 sm:$0xff]   ;;  %5977 = vmatprep.subr.bf16.mxu1 %v6989_v1  ;;  %v6279_v6 = vld [vmem:[%s9751_s1 + $0x28] ss:$20 sps:$4 sm:$0xff]   ;;  %v6280_v7 = vld [vmem:[%s9751_s1 + $0x30] ss:$20 sps:$4 sm:$0xff]  }
   0x3   :  { %v6275_v4 = vld [vmem:[%s9751_s1 + $0x2c] ss:$20 sps:$4 sm:$0xff]   ;;  %1132 = vmatpush1.bf16.msra.mxu0 %v6273_v2  ;;  %5993 = vmatpush1.bf16.msra.mxu1 %v6274_v3  ;;  %v6277_v5 = vld [vmem:[%s9751_s1 + $0x34] ss:$20 sps:$4 sm:$0xff]   ;;  %v6283_v9 = vld [vmem:[%s9751_s1 + $0x5c] ss:$20 sps:$4 sm:$0xff]  }
   0x4   :  { %1133 = vmatprep.subr.bf16.mxu0 %v6275_v4  ;;  %5978 = vmatprep.subr.bf16.mxu1 %v6277_v5  ;;  %v6281_v8 = vld [vmem:[%s9751_s1 + $0x54] ss:$20 sps:$4 sm:$0xff]   ;;  %v6285_v10 = vld [vmem:[%s9751_s1 + $0x50] ss:$20 sps:$4 sm:$0xff]   ;;  %v6286_v11 = vld [vmem:[%s9751_s1 + $0x58] ss:$20 sps:$4 sm:$0xff]  }
   0x5   :  { %v6287_v12 = vld [vmem:[%s9751_s1 + $0x7c] ss:$20 sps:$4 sm:$0xff]   ;;  %v6289_v13 = vld [vmem:[%s9751_s1 + $0x84] ss:$20 sps:$4 sm:$0xff]   ;;  %v6292_v15 = vld [vmem:[%s9751_s1 + $0x80] ss:$20 sps:$4 sm:$0xff]  }
   0x6   :  { %v6291_v14 = vld [vmem:[%s9751_s1 + $0x78] ss:$20 sps:$4 sm:$0xff]   ;;  %v6297_v18 = vld [vmem:[%s9751_s1 + $0xa0] ss:$20 sps:$4 sm:$0xff]   ;;  %v6298_v19 = vld [vmem:[%s9751_s1 + $0xa8] ss:$20 sps:$4 sm:$0xff]  }
   0x7   :  { %1134 = vmatpush1.bf16.msra.mxu0 %v6279_v6  ;;  %5994 = vmatpush1.bf16.msra.mxu1 %v6280_v7  ;;  %v6293_v16 = vld [vmem:[%s9751_s1 + $0xa4] ss:$20 sps:$4 sm:$0xff]   ;;  %v6295_v17 = vld [vmem:[%s9751_s1 + $0xac] ss:$20 sps:$4 sm:$0xff]   ;;  %v6301_v21 = vld [vmem:[%s9751_s1 + $0xd4] ss:$20 sps:$4 sm:$0xff]  }
   0x8   :  { %1135 = vmatprep.subr.bf16.mxu0 %v6281_v8  ;;  %5979 = vmatprep.subr.bf16.mxu1 %v6283_v9  ;;  %v6299_v20 = vld [vmem:[%s9751_s1 + $0xcc] ss:$20 sps:$4 sm:$0xff]   ;;  %v6303_v22 = vld [vmem:[%s9751_s1 + $0xc8] ss:$20 sps:$4 sm:$0xff]   ;;  %v6304_v23 = vld [vmem:[%s9751_s1 + $0xd0] ss:$20 sps:$4 sm:$0xff]  }
   0x9   :  { %v6305_v24 = vld [vmem:[%s9751_s1 + $0xf4] ss:$20 sps:$4 sm:$0xff]   ;;  %v6307_v25 = vld [vmem:[%s9751_s1 + $0xfc] ss:$20 sps:$4 sm:$0xff]   ;;  %v6310_v27 = vld [vmem:[%s9751_s1 + $0xf8] ss:$20 sps:$4 sm:$0xff]  }
   0xa   :  { %v6309_v26 = vld [vmem:[%s9751_s1 + $0xf0] ss:$20 sps:$4 sm:$0xff]   ;;  %v6315_v30 = vld [vmem:[%s9751_s1 + $0x118] ss:$20 sps:$4 sm:$0xff]   ;;  %v6316_v31 = vld [vmem:[%s9751_s1 + $0x120] ss:$20 sps:$4 sm:$0xff]  }
   0xb   :  { %1136 = vmatpush1.bf16.msra.mxu0 %v6285_v10  ;;  %5995 = vmatpush1.bf16.msra.mxu1 %v6286_v11  ;;  %v6311_v28 = vld [vmem:[%s9751_s1 + $0x11c] ss:$20 sps:$4 sm:$0xff]   ;;  %v6313_v29 = vld [vmem:[%s9751_s1 + $0x124] ss:$20 sps:$4 sm:$0xff]   ;;  %v6319_v33 = vld [vmem:[%s9751_s1 + $0x14c] ss:$20 sps:$4 sm:$0xff]  }
   0xc   :  { %1137 = vmatprep.subr.bf16.mxu0 %v6287_v12  ;;  %5980 = vmatprep.subr.bf16.mxu1 %v6289_v13  ;;  %v6317_v32 = vld [vmem:[%s9751_s1 + $0x144] ss:$20 sps:$4 sm:$0xff]   ;;  %v6321_v34 = vld [vmem:[%s9751_s1 + $0x140] ss:$20 sps:$4 sm:$0xff]   ;;  %v6322_v35 = vld [vmem:[%s9751_s1 + $0x148] ss:$20 sps:$4 sm:$0xff]  }
   0xd   :  { %v6323_v36 = vld [vmem:[%s9751_s1 + $0x16c] ss:$20 sps:$4 sm:$0xff]   ;;  %v6325_v37 = vld [vmem:[%s9751_s1 + $0x174] ss:$20 sps:$4 sm:$0xff]   ;;  %v6328_v39 = vld [vmem:[%s9751_s1 + $0x170] ss:$20 sps:$4 sm:$0xff]  }
   0xe   :  { %v6327_v38 = vld [vmem:[%s9751_s1 + $0x168] ss:$20 sps:$4 sm:$0xff]   ;;  %v6333_v42 = vld [vmem:[%s9751_s1 + $0x190] ss:$20 sps:$4 sm:$0xff]   ;;  %v6334_v43 = vld [vmem:[%s9751_s1 + $0x198] ss:$20 sps:$4 sm:$0xff]  }
   0xf   :  { %1138 = vmatpush1.bf16.msra.mxu0 %v6291_v14  ;;  %5996 = vmatpush1.bf16.msra.mxu1 %v6292_v15  ;;  %v6329_v40 = vld [vmem:[%s9751_s1 + $0x194] ss:$20 sps:$4 sm:$0xff]   ;;  %v6331_v41 = vld [vmem:[%s9751_s1 + $0x19c] ss:$20 sps:$4 sm:$0xff]   ;;  %v6337_v45 = vld [vmem:[%s9751_s1 + $0x1c4] ss:$20 sps:$4 sm:$0xff]  }
  0x10   :  { %1139 = vmatprep.subr.bf16.mxu0 %v6293_v16  ;;  %5981 = vmatprep.subr.bf16.mxu1 %v6295_v17  ;;  %v6335_v44 = vld [vmem:[%s9751_s1 + $0x1bc] ss:$20 sps:$4 sm:$0xff]   ;;  %v6339_v46 = vld [vmem:[%s9751_s1 + $0x1b8] ss:$20 sps:$4 sm:$0xff]   ;;  %v6340_v47 = vld [vmem:[%s9751_s1 + $0x1c0] ss:$20 sps:$4 sm:$0xff]  }
  0x11   :  { %v6365_v48 = vld [vmem:[%s9750_s0 + $0x4] ss:$12 sps:$4 sm:$0xff]   ;;  %v6343_v51 = vld [vmem:[%s9751_s1 + $0x1ec] ss:$20 sps:$4 sm:$0xff]   ;;  %v6346_v53 = vld [vmem:[%s9751_s1 + $0x1e8] ss:$20 sps:$4 sm:$0xff]  }
  0x12   :  { %v6341_v49 = vld [vmem:[%s9751_s1 + $0x1e4] ss:$20 sps:$4 sm:$0xff]   ;;  %1163 = vmatprep.mubr.bf16.mxu0 %v6365_v48  ;;  %v6345_v52 = vld [vmem:[%s9751_s1 + $0x1e0] ss:$20 sps:$4 sm:$0xff]   ;;  %v6351_v56 = vld [vmem:[%s9751_s1 + $0x208] ss:$20 sps:$4 sm:$0xff]  }
  0x13   :  { %1140 = vmatpush1.bf16.msra.mxu0 %v6297_v18  ;;  %5997 = vmatpush1.bf16.msra.mxu1 %v6298_v19  ;;  %v7139_v50 = vld [vmem:[%s9750_s0 + $0xc4] ss:$12 sps:$4 sm:$0xff]   ;;  %v6347_v54 = vld [vmem:[%s9751_s1 + $0x20c] ss:$20 sps:$4 sm:$0xff]   ;;  %v6349_v55 = vld [vmem:[%s9751_s1 + $0x214] ss:$20 sps:$4 sm:$0xff]  }
  0x14   :  { %1141 = vmatprep.subr.bf16.mxu0 %v6299_v20  ;;  %5982 = vmatprep.subr.bf16.mxu1 %v6301_v21  ;;  %v6352_v57 = vld [vmem:[%s9751_s1 + $0x210] ss:$20 sps:$4 sm:$0xff]   ;;  %v6353_v58 = vld [vmem:[%s9751_s1 + $0x234] ss:$20 sps:$4 sm:$0xff]   ;;  %v6358_v61 = vld [vmem:[%s9751_s1 + $0x238] ss:$20 sps:$4 sm:$0xff]  }
  0x15   :  { %1629 = vmatprep.mubr.bf16.mxu1 %v7139_v50  ;;  %v6355_v59 = vld [vmem:[%s9751_s1 + $0x23c] ss:$20 sps:$4 sm:$0xff]   ;;  %v6361_v63 = vld [vmem:[%s9751_s1 + $0x264] ss:$20 sps:$4 sm:$0xff]   ;;  %v6364_v2 = vld [vmem:[%s9751_s1 + $0x260] ss:$20 sps:$4 sm:$0xff]  }
  0x16   :  { %v6357_v60 = vld [vmem:[%s9751_s1 + $0x230] ss:$20 sps:$4 sm:$0xff]   ;;  %v6363_v0 = vld [vmem:[%s9751_s1 + $0x258] ss:$20 sps:$4 sm:$0xff]   ;;  %v6370_v6 = vld [vmem:[%s9751_s1 + $0x280] ss:$20 sps:$4 sm:$0xff]  }
  0x17   :  { %1142 = vmatpush1.bf16.msra.mxu0 %v6303_v22  ;;  %5998 = vmatpush1.bf16.msra.mxu1 %v6304_v23  ;;  %v6359_v62 = vld [vmem:[%s9751_s1 + $0x25c] ss:$20 sps:$4 sm:$0xff]   ;;  %v6372_v3 = vld [vmem:[%s9751_s1 + $0x284] ss:$20 sps:$4 sm:$0xff]   ;;  %v6406_v4 = vld [vmem:[%s9751_s1 + $0x28c] ss:$20 sps:$4 sm:$0xff]  }
  0x18   :  { %1143 = vmatprep.subr.bf16.mxu0 %v6305_v24  ;;  %5983 = vmatprep.subr.bf16.mxu1 %v6307_v25  ;;  %v6369_v5 = vld [vmem:[%s9750_s0] ss:$12 sps:$4 sm:$0xff]   ;;  %v6374_v8 = vld [vmem:[%s9750_s0 + $0x1c] ss:$12 sps:$4 sm:$0xff]   ;;  %v6378_v14 = vld [vmem:[%s9750_s0 + $0x18] ss:$12 sps:$4 sm:$0xff]  }
  0x19   :  { %v7202_v7 = vld [vmem:[%s9750_s0 + $0xc0] ss:$12 sps:$4 sm:$0xff]   ;;  %v7210_v9 = vld [vmem:[%s9750_s0 + $0xdc] ss:$12 sps:$4 sm:$0xff]   ;;  %v6407_v16 = vld [vmem:[%s9751_s1 + $0x2b0] ss:$20 sps:$4 sm:$0xff]  }
  0x1a   :  { %v6387_v10 = vld [vmem:[%s9751_s1 + $0x2ac] ss:$20 sps:$4 sm:$0xff]   ;;  %v6404_v11 = vld [vmem:[%s9751_s1 + $0x288] ss:$20 sps:$4 sm:$0xff]   ;;  %v7238_v17 = vld [vmem:[%s9750_s0 + $0xd8] ss:$12 sps:$4 sm:$0xff]  }
  0x1b   :  { %1144 = vmatpush1.bf16.msra.mxu0 %v6309_v26  ;;  %5999 = vmatpush1.bf16.msra.mxu1 %v6310_v27  ;;  %v6409_v12 = vld [vmem:[%s9751_s1 + $0x2b4] ss:$20 sps:$4 sm:$0xff]   ;;  %v6400_v20 = vld [vmem:[%s9751_s1 + $0x2d0] ss:$20 sps:$4 sm:$0xff]   ;;  %v6416_v22 = vld [vmem:[%s9751_s1 + $0x2d8] ss:$20 sps:$4 sm:$0xff]  }
  0x1c   :  { %1145 = vmatprep.subr.bf16.mxu0 %v6311_v28  ;;  %5984 = vmatprep.subr.bf16.mxu1 %v6313_v29  ;;  %v6385_v13 = vld [vmem:[%s9751_s1 + $0x2a8] ss:$20 sps:$4 sm:$0xff]   ;;  %v6380_v18 = vld [vmem:[%s9750_s0 + $0x34] ss:$12 sps:$4 sm:$0xff]   ;;  %v6421_v24 = vld [vmem:[%s9751_s1 + $0x304] ss:$20 sps:$4 sm:$0xff]  }
  0x1d   :  { %v6402_v15 = vld [vmem:[%s9751_s1 + $0x2d4] ss:$20 sps:$4 sm:$0xff]   ;;  %v6418_v21 = vld [vmem:[%s9751_s1 + $0x2dc] ss:$20 sps:$4 sm:$0xff]   ;;  %v6427_v26 = vld [vmem:[%s9751_s1 + $0x2f8] ss:$20 sps:$4 sm:$0xff]  }
  0x1e   :  { %v7246_v19 = vld [vmem:[%s9750_s0 + $0xf4] ss:$12 sps:$4 sm:$0xff]   ;;  %v6429_v23 = vld [vmem:[%s9751_s1 + $0x2fc] ss:$20 sps:$4 sm:$0xff]   ;;  %v6389_v29 = vld [vmem:[%s9750_s0 + $0x4c] ss:$12 sps:$4 sm:$0xff]  }
  0x1f   :  { %1146 = vmatpush1.bf16.msra.mxu0 %v6315_v30  ;;  %6000 = vmatpush1.bf16.msra.mxu1 %v6316_v31  ;;  %v6384_v25 = vld [vmem:[%s9750_s0 + $0x30] ss:$12 sps:$4 sm:$0xff]   ;;  %v6419_v28 = vld [vmem:[%s9751_s1 + $0x300] ss:$20 sps:$4 sm:$0xff]   ;;  %v7285_v30 = vld [vmem:[%s9750_s0 + $0x10c] ss:$12 sps:$4 sm:$0xff]  }
  0x20   :  { %1147 = vmatprep.subr.bf16.mxu0 %v6317_v32  ;;  %5985 = vmatprep.subr.bf16.mxu1 %v6319_v33  ;;  %v7274_v27 = vld [vmem:[%s9750_s0 + $0xf0] ss:$12 sps:$4 sm:$0xff]   ;;  %v6433_v32 = vld [vmem:[%s9751_s1 + $0x32c] ss:$20 sps:$4 sm:$0xff]   ;;  %v6451_v33 = vld [vmem:[%s9751_s1 + $0x324] ss:$20 sps:$4 sm:$0xff]  }
  0x21   :  { %v6431_v31 = vld [vmem:[%s9751_s1 + $0x328] ss:$20 sps:$4 sm:$0xff]  }
  0x22   :  { %v6466_v48 = vld [vmem:[%s9751_s1 + $0x39c] ss:$20 sps:$4 sm:$0xff]  }
  0x23   :  { %1148 = vmatpush1.bf16.msra.mxu0 %v6321_v34  ;;  %6001 = vmatpush1.bf16.msra.mxu1 %v6322_v35  ;;  %v6449_v34 = vld [vmem:[%s9751_s1 + $0x320] ss:$20 sps:$4 sm:$0xff]  }
  0x24   :  { %1149 = vmatprep.subr.bf16.mxu0 %v6323_v36  ;;  %5986 = vmatprep.subr.bf16.mxu1 %v6325_v37  ;;  %v6436_v35 = vld [vmem:[%s9751_s1 + $0x354] ss:$20 sps:$4 sm:$0xff]   ;;  %v6456_v36 = vld [vmem:[%s9751_s1 + $0x34c] ss:$20 sps:$4 sm:$0xff]  }
  0x25   :  { %v6393_v37 = vld [vmem:[%s9750_s0 + $0x48] ss:$12 sps:$4 sm:$0xff]  }
  0x27   :  { %1150 = vmatpush1.bf16.msra.mxu0 %v6327_v38  ;;  %6002 = vmatpush1.bf16.msra.mxu1 %v6328_v39  ;;  %v7313_v38 = vld [vmem:[%s9750_s0 + $0x108] ss:$12 sps:$4 sm:$0xff]   ;;  %v6434_v39 = vld [vmem:[%s9751_s1 + $0x350] ss:$20 sps:$4 sm:$0xff]  }
  0x28   :  { %1151 = vmatprep.subr.bf16.mxu0 %v6329_v40  ;;  %5987 = vmatprep.subr.bf16.mxu1 %v6331_v41  ;;  %v6454_v40 = vld [vmem:[%s9751_s1 + $0x348] ss:$20 sps:$4 sm:$0xff]   ;;  %v6395_v41 = vld [vmem:[%s9750_s0 + $0x64] ss:$12 sps:$4 sm:$0xff]  }
  0x2b   :  { %1152 = vmatpush1.bf16.msra.mxu0 %v6333_v42  ;;  %6003 = vmatpush1.bf16.msra.mxu1 %v6334_v43  ;;  %v7327_v42 = vld [vmem:[%s9750_s0 + $0x124] ss:$12 sps:$4 sm:$0xff]   ;;  %v6443_v43 = vld [vmem:[%s9751_s1 + $0x378] ss:$20 sps:$4 sm:$0xff]  }
  0x2c   :  { %1153 = vmatprep.subr.bf16.mxu0 %v6335_v44  ;;  %5988 = vmatprep.subr.bf16.mxu1 %v6337_v45  ;;  %v6445_v44 = vld [vmem:[%s9751_s1 + $0x37c] ss:$20 sps:$4 sm:$0xff]   ;;  %v6448_v45 = vld [vmem:[%s9751_s1 + $0x3a4] ss:$20 sps:$4 sm:$0xff]  }
  0x2f   :  { %1154 = vmatpush1.bf16.msra.mxu0 %v6339_v46  ;;  %6004 = vmatpush1.bf16.msra.mxu1 %v6340_v47  ;;  %v6461_v46 = vld [vmem:[%s9751_s1 + $0x374] ss:$20 sps:$4 sm:$0xff]   ;;  %v6459_v47 = vld [vmem:[%s9751_s1 + $0x370] ss:$20 sps:$4 sm:$0xff]  }
  0x30   :  { %1155 = vmatprep.subr.bf16.mxu0 %v6341_v49  ;;  %5989 = vmatprep.subr.bf16.mxu1 %v6343_v51  ;;  %v7352_v49 = vld [vmem:[%s9750_s0 + $0x60] ss:$12 sps:$4 sm:$0xff]  }
  0x31   :  { %v7357_v51 = vld [vmem:[%s9750_s0 + $0x120] ss:$12 sps:$4 sm:$0xff]  }
  0x33   :  { %1156 = vmatpush1.bf16.msra.mxu0 %v6345_v52  ;;  %6005 = vmatpush1.bf16.msra.mxu1 %v6346_v53  ;;  %v6446_v52 = vld [vmem:[%s9751_s1 + $0x3a0] ss:$20 sps:$4 sm:$0xff]   ;;  %v6464_v53 = vld [vmem:[%s9751_s1 + $0x398] ss:$20 sps:$4 sm:$0xff]  }
  0x34   :  { %1157 = vmatprep.subr.bf16.mxu0 %v6347_v54  ;;  %5990 = vmatprep.subr.bf16.mxu1 %v6349_v55  ;;  %v7368_v54 = vld [vmem:[%s9750_s0 + $0x7c] ss:$12 sps:$4 sm:$0xff]  }
  0x35   :  { %v7373_v55 = vld [vmem:[%s9750_s0 + $0x13c] ss:$12 sps:$4 sm:$0xff]  }
  0x37   :  { %1158 = vmatpush1.bf16.msra.mxu0 %v6351_v56  ;;  %6006 = vmatpush1.bf16.msra.mxu1 %v6352_v57  ;;  %v6474_v56 = vld [vmem:[%s9751_s1 + $0x290] ss:$20 sps:$4 sm:$0xff]  }
  0x38   :  { %1159 = vmatprep.subr.bf16.mxu0 %v6353_v58  ;;  %5991 = vmatprep.subr.bf16.mxu1 %v6355_v59  ;;  %v7385_v57 = vld [vmem:[%s9750_s0 + $0x78] ss:$12 sps:$4 sm:$0xff]   ;;  %v7396_v59 = vld [vmem:[%s9750_s0 + $0x94] ss:$12 sps:$4 sm:$0xff]  }
  0x39   :  { %v7390_v58 = vld [vmem:[%s9750_s0 + $0x138] ss:$12 sps:$4 sm:$0xff]  }
  0x3b   :  { %1160 = vmatpush1.bf16.msra.mxu0 %v6357_v60  ;;  %6007 = vmatpush1.bf16.msra.mxu1 %v6358_v61  ;;  %v6424_v60 = vld [vmem:[%s9750_s0 + $0x154] ss:$12 sps:$4 sm:$0xff]   ;;  %v6430_v61 = vld [vmem:[%s9750_s0 + $0x150] ss:$12 sps:$4 sm:$0xff]  }
  0x3c   :  { %1161 = vmatprep.subr.bf16.mxu0 %v6359_v62  ;;  %5992 = vmatprep.subr.bf16.mxu1 %v6361_v63  ;;  %v7415_v62 = vld [vmem:[%s9750_s0 + $0xac] ss:$12 sps:$4 sm:$0xff]  }
  0x3d   :  { %v6439_v63 = vld [vmem:[%s9750_s0 + $0x16c] ss:$12 sps:$4 sm:$0xff]  }
  0x3f   :  { %1162 = vmatpush1.bf16.msra.mxu0 %v6363_v0  ;;  %6008 = vmatpush1.bf16.msra.mxu1 %v6364_v2  ;;  %v7425_v0 = vld [vmem:[%s9750_s0 + $0xa8] ss:$12 sps:$4 sm:$0xff]  }
  0x40   :  { %1324 = vmatprep.subr.bf16.mxu0 %v6372_v3  ;;  %1710 = vmatprep.subr.bf16.mxu1 %v6406_v4  ;;  %v6442_v2 = vld [vmem:[%s9750_s0 + $0x168] ss:$12 sps:$4 sm:$0xff]   ;;  %v9764_v3 = vmov 0  }
  0x41   :  { %v7436_v4 = vld [vmem:[%s9750_s0 + $0x8] ss:$12 sps:$4 sm:$0xff]  }
  0x42   :  { %1164 = vmatmul.mubr.bf16.vlgmr.msra.gmra.mrb[0].mxu0 %v6369_v5  ;;  %1630 = vmatmul.mubr.bf16.vlgmr.msra.gmra.mrb[0].mxu1 %v7202_v7  ;;  %v6477_v5 = vld [vmem:[%s9751_s1 + $0x2b8] ss:$20 sps:$4 sm:$0xff]  }
  0x43   :  { %1325 = vmatpush1.bf16.msra.mxu0 %v6370_v6  ;;  %1173 = vmatprep.mubr.bf16.mxu0 %v6374_v8  ;;  %v7451_v6 = vld [vmem:[%s9750_s0 + $0x20] ss:$12 sps:$4 sm:$0xff]   ;;  %v6480_v8 = vld [vmem:[%s9751_s1 + $0x308] ss:$20 sps:$4 sm:$0xff]  }
  0x44   :  { %1639 = vmatprep.mubr.bf16.mxu1 %v7210_v9  ;;  %1326 = vmatprep.subr.bf16.mxu0 %v6387_v10 }
  0x45   :  { %1711 = vmatpush1.bf16.msra.mxu1 %v6404_v11 }
  0x46   :  { %1712 = vmatprep.subr.bf16.mxu1 %v6409_v12 }
  0x47   :  { %1327 = vmatpush1.bf16.msra.mxu0 %v6385_v13 }
  0x48   :  { %1328 = vmatprep.subr.bf16.mxu0 %v6402_v15 }
  0x49   :  { %1713 = vmatpush1.bf16.msra.mxu1 %v6407_v16 }
  0x4a   :  { %1174 = vmatmul.mubr.bf16.gmra.mrb[4].mxu0 %v6378_v14  ;;  %1640 = vmatmul.mubr.bf16.gmra.mrb[4].mxu1 %v7238_v17 }
  0x4b   :  { %1183 = vmatprep.mubr.bf16.mxu0 %v6380_v18  ;;  %1649 = vmatprep.mubr.bf16.mxu1 %v7246_v19 }
  0x4c   :  { %1329 = vmatpush1.bf16.msra.mxu0 %v6400_v20  ;;  %1714 = vmatprep.subr.bf16.mxu1 %v6418_v21 }
  0x4d   :  { %1715 = vmatpush1.bf16.msra.mxu1 %v6416_v22  ;;  %1330 = vmatprep.subr.bf16.mxu0 %v6429_v23 }
  0x4e   :  { %1716 = vmatprep.subr.bf16.mxu1 %v6421_v24 }
  0x50   :  { %1331 = vmatpush1.bf16.msra.mxu0 %v6427_v26 }
  0x51   :  { %1717 = vmatpush1.bf16.msra.mxu1 %v6419_v28  ;;  %1332 = vmatprep.subr.bf16.mxu0 %v6451_v33 }
  0x52   :  { %1184 = vmatmul.mubr.bf16.gmra.mrb[8].mxu0 %v6384_v25  ;;  %1650 = vmatmul.mubr.bf16.gmra.mrb[8].mxu1 %v7274_v27 }
  0x53   :  { %1193 = vmatprep.mubr.bf16.mxu0 %v6389_v29  ;;  %1659 = vmatprep.mubr.bf16.mxu1 %v7285_v30 }
  0x54   :  { %1718 = vmatprep.subr.bf16.mxu1 %v6433_v32  ;;  %1333 = vmatpush1.bf16.msra.mxu0 %v6449_v34 }
  0x55   :  { %1719 = vmatpush1.bf16.msra.mxu1 %v6431_v31  ;;  %1334 = vmatprep.subr.bf16.mxu0 %v6456_v36 }
  0x56   :  { %1720 = vmatprep.subr.bf16.mxu1 %v6436_v35 }
  0x58   :  { %1335 = vmatpush1.bf16.msra.mxu0 %v6454_v40 }
  0x59   :  { %1721 = vmatpush1.bf16.msra.mxu1 %v6434_v39  ;;  %1336 = vmatprep.subr.bf16.mxu0 %v6461_v46 }
  0x5a   :  { %1194 = vmatmul.mubr.bf16.gmra.mrb[12].mxu0 %v6393_v37  ;;  %1660 = vmatmul.mubr.bf16.gmra.mrb[12].mxu1 %v7313_v38 }
  0x5b   :  { %1203 = vmatprep.mubr.bf16.mxu0 %v6395_v41  ;;  %1669 = vmatprep.mubr.bf16.mxu1 %v7327_v42 }
  0x5c   :  { %1722 = vmatprep.subr.bf16.mxu1 %v6445_v44  ;;  %1337 = vmatpush1.bf16.msra.mxu0 %v6459_v47 }
  0x5d   :  { %1723 = vmatpush1.bf16.msra.mxu1 %v6443_v43  ;;  %1338 = vmatprep.subr.bf16.mxu0 %v6466_v48 }
  0x5e   :  { %1724 = vmatprep.subr.bf16.mxu1 %v6448_v45 }
  0x60   :  { %1339 = vmatpush1.bf16.msra.mxu0 %v6464_v53 }
  0x61   :  { %1725 = vmatpush1.bf16.msra.mxu1 %v6446_v52  ;;  %1517 = vmatprep.subr.bf16.mxu0 %v6989_v1  ;;  %v7407_v1 = vld [vmem:[%s9750_s0 + $0x90] ss:$12 sps:$4 sm:$0xff]  }
  0x62   :  { %1204 = vmatmul.mubr.bf16.gmra.mrb[16].mxu0 %v7352_v49  ;;  %1670 = vmatmul.mubr.bf16.gmra.mrb[16].mxu1 %v7357_v51 }
  0x63   :  { %1213 = vmatprep.mubr.bf16.mxu0 %v7368_v54  ;;  %1679 = vmatprep.mubr.bf16.mxu1 %v7373_v55 }
  0x64   :  { %5881 = vmatprep.subr.bf16.mxu1 %v6474_v56 }
  0x6a   :  { %1214 = vmatmul.mubr.bf16.gmra.mrb[20].mxu0 %v7385_v57  ;;  %1680 = vmatmul.mubr.bf16.gmra.mrb[20].mxu1 %v7390_v58 }
  0x6b   :  { %1223 = vmatprep.mubr.bf16.mxu0 %v7396_v59  ;;  %1689 = vmatprep.mubr.bf16.mxu1 %v6424_v60 }
  0x72   :  { %1224 = vmatmul.mubr.bf16.gmra.mrb[24].mxu0 %v7407_v1  ;;  %1690 = vmatmul.mubr.bf16.gmra.mrb[24].mxu1 %v6430_v61 }
  0x73   :  { %1233 = vmatprep.mubr.bf16.mxu0 %v7415_v62  ;;  %1699 = vmatprep.mubr.bf16.mxu1 %v6439_v63 }
  0x7a   :  { %1234 = vmatmul.mubr.bf16.gmra.mrb[28].mxu0 %v7425_v0  ;;  %1700 = vmatmul.mubr.bf16.gmra.mrb[28].mxu1 %v6442_v2 }
  0x7b   :  { %1243 = vmatprep.mubr.bf16.mxu0 %v7139_v50  ;;  %1742 = vmatprep.mubr.bf16.mxu1 %v9764_v3  ;;  %v6479_v50 = vld [vmem:[%s9751_s1 + $0x2e0] ss:$20 sps:$4 sm:$0xff]  }
  0x82   :  { %1244 = vmatmul.mubr.bf16.gmra.mrb[32].mxu0 %v7202_v7  ;;  %1743 = vmatmul.mubr.bf16.vlgmr.msra.gmra.mrb[32].mxu1 %v7436_v4  ;;  %v7460_v7 = vld [vmem:[%s9750_s0 + $0x38] ss:$12 sps:$4 sm:$0xff]  }
  0x83   :  { %1253 = vmatprep.mubr.bf16.mxu0 %v7210_v9  ;;  %1752 = vmatprep.mubr.bf16.mxu1 %v9764_v3  ;;  %v7472_v9 = vld [vmem:[%s9750_s0 + $0x50] ss:$12 sps:$4 sm:$0xff]  }
  0x84   :  { %5882 = vmatpush3.bf16.msra.mxu1 %v6474_v56 }
  0x85   :  { %5883 = vmatprep.subr.bf16.mxu1 %v6477_v5 }
  0x88   :  { %5884 = vmatpush3.bf16.msra.mxu1 %v6477_v5 }
  0x89   :  { %5885 = vmatprep.subr.bf16.mxu1 %v6479_v50 }
  0x8a   :  { %1254 = vmatmul.mubr.bf16.gmra.mrb[36].mxu0 %v7238_v17  ;;  %1753 = vmatmul.mubr.bf16.gmra.mrb[36].mxu1 %v7451_v6 }
  0x8b   :  { %1263 = vmatprep.mubr.bf16.mxu0 %v7246_v19  ;;  %1762 = vmatprep.mubr.bf16.mxu1 %v9764_v3 }
  0x8c   :  { %5886 = vmatpush3.bf16.msra.mxu1 %v6479_v50 }
  0x8d   :  { %5887 = vmatprep.subr.bf16.mxu1 %v6480_v8 }
  0x90   :  { %5888 = vmatpush3.bf16.msra.mxu1 %v6480_v8 }
  0x92   :  { %1264 = vmatmul.mubr.bf16.gmra.mrb[40].mxu0 %v7274_v27  ;;  %1763 = vmatmul.mubr.bf16.gmra.mrb[40].mxu1 %v7460_v7 }
  0x93   :  { %1273 = vmatprep.mubr.bf16.mxu0 %v7285_v30  ;;  %1772 = vmatprep.mubr.bf16.mxu1 %v9764_v3 }
  0x9a   :  { %1274 = vmatmul.mubr.bf16.gmra.mrb[44].mxu0 %v7313_v38  ;;  %1773 = vmatmul.mubr.bf16.gmra.mrb[44].mxu1 %v7472_v9 }
  0x9b   :  { %1283 = vmatprep.mubr.bf16.mxu0 %v7327_v42  ;;  %1782 = vmatprep.mubr.bf16.mxu1 %v9764_v3 }
  0x9c   :  { %17 = vsyncpa [#allocation3], 0  ;;  %v7481_v10 = vld [vmem:[%s9750_s0 + $0x68] ss:$12 sps:$4 sm:$0xff]   ;;  %v6481_v11 = vld [vmem:[%s9751_s1 + $0x330] ss:$20 sps:$4 sm:$0xff]  }
  0x9d   :  { %5889 = vmatprep.subr.bf16.mxu1 %v6481_v11  ;;  %v7493_v12 = vld [vmem:[%s9750_s0 + $0x80] ss:$12 sps:$4 sm:$0xff]   ;;  %v7501_v13 = vld [vmem:[%s9750_s0 + $0x98] ss:$12 sps:$4 sm:$0xff]   ;;  %v7511_v15 = vld [vmem:[%s9750_s0 + $0xb0] ss:$12 sps:$4 sm:$0xff]  }
  0x9e   :  { %5890 = vmatpush3.bf16.msra.mxu1 %v6481_v11  ;;  %v6482_v14 = vld [vmem:[%s9751_s1 + $0x358] ss:$20 sps:$4 sm:$0xff]   ;;  %v7519_v16 = vld [vmem:[%s9750_s0 + $0xc8] ss:$12 sps:$4 sm:$0xff]   ;;  %v6827_v21 = vld [vmem:[%s9751_s1 + $0x30] ss:$20 sps:$4 sm:$0xff]  }
  0x9f   :  { %5891 = vmatprep.subr.bf16.mxu1 %v6482_v14  ;;  %v6483_v17 = vld [vmem:[%s9751_s1 + $0x380] ss:$20 sps:$4 sm:$0xff]   ;;  %v6825_v18 = vld [vmem:[%s9751_s1 + $0x8] ss:$20 sps:$4 sm:$0xff]   ;;  %v6829_v23 = vld [vmem:[%s9751_s1 + $0x58] ss:$20 sps:$4 sm:$0xff]  }
  0xa0   :  { %v6826_v19 = vld [vmem:[%s9751_s1 + $0x34] ss:$20 sps:$4 sm:$0xff]   ;;  %v7537_v20 = vld [vmem:[%s9750_s0 + $0xe0] ss:$12 sps:$4 sm:$0xff]   ;;  %v6828_v22 = vld [vmem:[%s9751_s1 + $0x5c] ss:$20 sps:$4 sm:$0xff]  }
  0xa1   :  { %v6830_v24 = vld [vmem:[%s9751_s1 + $0x84] ss:$20 sps:$4 sm:$0xff]   ;;  %v6831_v26 = vld [vmem:[%s9751_s1 + $0x80] ss:$20 sps:$4 sm:$0xff]   ;;  %v6484_v28 = vld [vmem:[%s9751_s1 + $0x3a8] ss:$20 sps:$4 sm:$0xff]  }
  0xa2   :  { %1284 = vmatmul.mubr.bf16.gmra.mrb[48].mxu0 %v7357_v51  ;;  %1783 = vmatmul.mubr.bf16.gmra.mrb[48].mxu1 %v7481_v10  ;;  %v7558_v25 = vld [vmem:[%s9750_s0 + $0xf8] ss:$12 sps:$4 sm:$0xff]   ;;  %v6832_v27 = vld [vmem:[%s9751_s1 + $0xac] ss:$20 sps:$4 sm:$0xff]   ;;  %v6833_v29 = vld [vmem:[%s9751_s1 + $0xa8] ss:$20 sps:$4 sm:$0xff]  }
  0xa3   :  { %1293 = vmatprep.mubr.bf16.mxu0 %v7373_v55  ;;  %1792 = vmatprep.mubr.bf16.mxu1 %v9764_v3  ;;  %v6834_v30 = vld [vmem:[%s9751_s1 + $0xd4] ss:$20 sps:$4 sm:$0xff]   ;;  %v7582_v31 = vld [vmem:[%s9750_s0 + $0x110] ss:$12 sps:$4 sm:$0xff]   ;;  %v6837_v34 = vld [vmem:[%s9751_s1 + $0xf8] ss:$20 sps:$4 sm:$0xff]  }
  0xa4   :  { %5892 = vmatpush3.bf16.msra.mxu1 %v6482_v14  ;;  %v6835_v32 = vld [vmem:[%s9751_s1 + $0xd0] ss:$20 sps:$4 sm:$0xff]   ;;  %v7603_v36 = vld [vmem:[%s9750_s0 + $0x128] ss:$12 sps:$4 sm:$0xff]   ;;  %v6840_v39 = vld [vmem:[%s9751_s1 + $0x14c] ss:$20 sps:$4 sm:$0xff]  }
  0xa5   :  { %5893 = vmatprep.subr.bf16.mxu1 %v6483_v17  ;;  %v6836_v33 = vld [vmem:[%s9751_s1 + $0xfc] ss:$20 sps:$4 sm:$0xff]   ;;  %v6838_v35 = vld [vmem:[%s9751_s1 + $0x124] ss:$20 sps:$4 sm:$0xff]   ;;  %v6839_v37 = vld [vmem:[%s9751_s1 + $0x120] ss:$20 sps:$4 sm:$0xff]  }
  0xa6   :  { %v6488_v38 = vld [vmem:[%s9754_s4 + $0x4] ss:$8 sps:$4 sm:$0xff]   ;;  %v6841_v40 = vld [vmem:[%s9751_s1 + $0x148] ss:$20 sps:$4 sm:$0xff]   ;;  %v6847_v48 = vld [vmem:[%s9751_s1 + $0x1c0] ss:$20 sps:$4 sm:$0xff]  }
  0xa7   :  { %v6842_v41 = vld [vmem:[%s9751_s1 + $0x174] ss:$20 sps:$4 sm:$0xff]   ;;  %v7627_v42 = vld [vmem:[%s9750_s0 + $0x140] ss:$12 sps:$4 sm:$0xff]   ;;  %v6843_v43 = vld [vmem:[%s9751_s1 + $0x170] ss:$20 sps:$4 sm:$0xff]  }
  0xa8   :  { %5894 = vmatpush3.bf16.msra.mxu1 %v6483_v17  ;;  %v6844_v44 = vld [vmem:[%s9751_s1 + $0x19c] ss:$20 sps:$4 sm:$0xff]   ;;  %v6845_v45 = vld [vmem:[%s9751_s1 + $0x198] ss:$20 sps:$4 sm:$0xff]   ;;  %v6850_v53 = vld [vmem:[%s9751_s1 + $0x214] ss:$20 sps:$4 sm:$0xff]  }
  0xa9   :  { %5895 = vmatprep.subr.bf16.mxu1 %v6484_v28  ;;  %v6846_v46 = vld [vmem:[%s9751_s1 + $0x1c4] ss:$20 sps:$4 sm:$0xff]   ;;  %v6848_v51 = vld [vmem:[%s9751_s1 + $0x1ec] ss:$20 sps:$4 sm:$0xff]   ;;  %v6849_v52 = vld [vmem:[%s9751_s1 + $0x1e8] ss:$20 sps:$4 sm:$0xff]  }
  0xaa   :  { %1294 = vmatmul.mubr.bf16.gmra.mrb[52].mxu0 %v7390_v58  ;;  %1793 = vmatmul.mubr.bf16.gmra.mrb[52].mxu1 %v7493_v12  ;;  %v7648_v47 = vld [vmem:[%s9750_s0 + $0x158] ss:$12 sps:$4 sm:$0xff]   ;;  %v7669_v55 = vld [vmem:[%s9750_s0 + $0x170] ss:$12 sps:$4 sm:$0xff]   ;;  %v6496_v11 = vld [vmem:[%s9754_s4 + $0x20] ss:$8 sps:$4 sm:$0xff]  }
  0xab   :  { %1303 = vmatprep.mubr.bf16.mxu0 %v6424_v60  ;;  %1802 = vmatprep.mubr.bf16.mxu1 %v9764_v3  ;;  %v6851_v56 = vld [vmem:[%s9751_s1 + $0x210] ss:$20 sps:$4 sm:$0xff]   ;;  %v6853_v60 = vld [vmem:[%s9751_s1 + $0x238] ss:$20 sps:$4 sm:$0xff]   ;;  %v6493_v5 = vld [vmem:[%s9754_s4 + $0x14] ss:$8 sps:$4 sm:$0xff]  }
  0xac   :  { %5896 = vmatpush3.bf16.msra.mxu1 %v6484_v28  ;;  %v6852_v58 = vld [vmem:[%s9751_s1 + $0x23c] ss:$20 sps:$4 sm:$0xff]   ;;  %v6498_v8 = vld [vmem:[%s9754_s4 + $0x24] ss:$8 sps:$4 sm:$0xff]   ;;  %v6506_v17 = vld [vmem:[%s9754_s4 + $0x40] ss:$8 sps:$4 sm:$0xff]  }
  0xad   :  { %3320 = vmatprep.subr.bf16.mxu1 %v6488_v38  ;;  %v6491_v50 = vld [vmem:[%s9754_s4 + $0x10] ss:$8 sps:$4 sm:$0xff]   ;;  %v6508_v14 = vld [vmem:[%s9754_s4 + $0x44] ss:$8 sps:$4 sm:$0xff]   ;;  %v6542_v28 = vld [vmem:[%s9754_s4 + $0xd4] ss:$8 sps:$4 sm:$0xff]  }
  0xae   :  { %v7834_v38 = vld [vmem:[%s9750_s0] ss:$12 sps:$4 sm:$0xff]   ;;  %vm3271_vm0 = vcmask 523264  }
  0xb2   :  { %1304 = vmatmul.mubr.bf16.gmra.mrb[56].mxu0 %v6430_v61  ;;  %1803 = vmatmul.mubr.bf16.gmra.mrb[56].mxu1 %v7501_v13  ;;  %v6854_v61 = vld [vmem:[%s9751_s1 + $0x264] ss:$20 sps:$4 sm:$0xff]  }
  0xb3   :  { %1313 = vmatprep.mubr.bf16.mxu0 %v6439_v63  ;;  %1812 = vmatprep.mubr.bf16.mxu1 %v9764_v3  ;;  %v6485_v63 = vld [vmem:[%s9751_s1 + $0x150] ss:$20 sps:$4 sm:$0xff]  }
  0xba   :  { %1314 = vmatmul.mubr.bf16.gmra.mrb[60].mxu0 %v6442_v2  ;;  %1813 = vmatmul.mubr.bf16.gmra.mrb[60].mxu1 %v7511_v15  ;;  %v6486_v2 = vld [vmem:[%s9754_s4] ss:$8 sps:$4 sm:$0xff]  }
  0xbb   :  { %1356 = vmatprep.mubr.bf16.mxu0 %v9764_v3  ;;  %1822 = vmatprep.mubr.bf16.mxu1 %v9764_v3 }
  0xc2   :  { %1357 = vmatmul.mubr.bf16.vlgmr.msra.gmra.mrb[0].mxu0 %v7436_v4  ;;  %1823 = vmatmul.mubr.bf16.gmra.mrb[0].mxu1 %v7519_v16 }
  0xc3   :  { %1518 = vmatpush1.bf16.msra.mxu0 %v6825_v18  ;;  %1366 = vmatprep.mubr.bf16.mxu0 %v9764_v3  ;;  %v6518_v18 = vld [vmem:[%s9754_s4 + $0x64] ss:$8 sps:$4 sm:$0xff]  }
  0xc4   :  { %1832 = vmatprep.mubr.bf16.mxu1 %v9764_v3  ;;  %1519 = vmatprep.subr.bf16.mxu0 %v6826_v19  ;;  %v6516_v19 = vld [vmem:[%s9754_s4 + $0x60] ss:$8 sps:$4 sm:$0xff]  }
  0xc7   :  { %1520 = vmatpush1.bf16.msra.mxu0 %v6827_v21  ;;  %v6527_v21 = vld [vmem:[%s9754_s4 + $0x84] ss:$8 sps:$4 sm:$0xff]  }
  0xc8   :  { %1521 = vmatprep.subr.bf16.mxu0 %v6828_v22  ;;  %v6525_v22 = vld [vmem:[%s9754_s4 + $0x80] ss:$8 sps:$4 sm:$0xff]  }
  0xca   :  { %1367 = vmatmul.mubr.bf16.gmra.mrb[4].mxu0 %v7451_v6  ;;  %1833 = vmatmul.mubr.bf16.gmra.mrb[4].mxu1 %v7537_v20 }
  0xcb   :  { %1376 = vmatprep.mubr.bf16.mxu0 %v9764_v3  ;;  %1842 = vmatprep.mubr.bf16.mxu1 %v9764_v3 }
  0xcc   :  { %1522 = vmatpush1.bf16.msra.mxu0 %v6829_v23  ;;  %v6533_v23 = vld [vmem:[%s9754_s4 + $0xa4] ss:$8 sps:$4 sm:$0xff]  }
  0xcd   :  { %1523 = vmatprep.subr.bf16.mxu0 %v6830_v24  ;;  %v6531_v24 = vld [vmem:[%s9754_s4 + $0xa0] ss:$8 sps:$4 sm:$0xff]  }
  0xd0   :  { %1524 = vmatpush1.bf16.msra.mxu0 %v6831_v26  ;;  %v6539_v26 = vld [vmem:[%s9754_s4 + $0xc4] ss:$8 sps:$4 sm:$0xff]  }
  0xd1   :  { %1525 = vmatprep.subr.bf16.mxu0 %v6832_v27  ;;  %v6537_v27 = vld [vmem:[%s9754_s4 + $0xc0] ss:$8 sps:$4 sm:$0xff]  }
  0xd2   :  { %1377 = vmatmul.mubr.bf16.gmra.mrb[8].mxu0 %v7460_v7  ;;  %1843 = vmatmul.mubr.bf16.gmra.mrb[8].mxu1 %v7558_v25 }
  0xd3   :  { %1386 = vmatprep.mubr.bf16.mxu0 %v9764_v3  ;;  %1852 = vmatprep.mubr.bf16.mxu1 %v9764_v3 }
  0xd4   :  { %1526 = vmatpush1.bf16.msra.mxu0 %v6833_v29  ;;  %v6540_v29 = vld [vmem:[%s9754_s4 + $0xd0] ss:$8 sps:$4 sm:$0xff]  }
  0xd5   :  { %1527 = vmatprep.subr.bf16.mxu0 %v6834_v30  ;;  %v6545_v30 = vld [vmem:[%s9754_s4 + $0xe4] ss:$8 sps:$4 sm:$0xff]  }
  0xd8   :  { %1528 = vmatpush1.bf16.msra.mxu0 %v6835_v32  ;;  %v6548_v32 = vld [vmem:[%s9754_s4 + $0xf4] ss:$8 sps:$4 sm:$0xff]  }
  0xd9   :  { %1529 = vmatprep.subr.bf16.mxu0 %v6836_v33  ;;  %v7816_v33 = vld [vmem:[%s9750_s0 + $0x4] ss:$12 sps:$4 sm:$0xff]  }
  0xda   :  { %1387 = vmatmul.mubr.bf16.gmra.mrb[12].mxu0 %v7472_v9  ;;  %1853 = vmatmul.mubr.bf16.gmra.mrb[12].mxu1 %v7582_v31 }
  0xdb   :  { %1396 = vmatprep.mubr.bf16.mxu0 %v9764_v3  ;;  %1862 = vmatprep.mubr.bf16.mxu1 %v9764_v3 }
  0xdc   :  { %1530 = vmatpush1.bf16.msra.mxu0 %v6837_v34  ;;  %v6546_v34 = vld [vmem:[%s9754_s4 + $0xf0] ss:$8 sps:$4 sm:$0xff]  }
  0xdd   :  { %1531 = vmatprep.subr.bf16.mxu0 %v6838_v35  ;;  %v6551_v35 = vld [vmem:[%s9754_s4 + $0x104] ss:$8 sps:$4 sm:$0xff]  }
  0xe0   :  { %1532 = vmatpush1.bf16.msra.mxu0 %v6839_v37  ;;  %v6490_v37 = vld [vmem:[%s9751_s1 + $0x178] ss:$20 sps:$4 sm:$0xff]  }
  0xe1   :  { %1533 = vmatprep.subr.bf16.mxu0 %v6840_v39  ;;  %v7840_v39 = vld [vmem:[%s9750_s0 + $0x1c] ss:$12 sps:$4 sm:$0xff]  }
  0xe2   :  { %1397 = vmatmul.mubr.bf16.gmra.mrb[16].mxu0 %v7481_v10  ;;  %1863 = vmatmul.mubr.bf16.gmra.mrb[16].mxu1 %v7603_v36 }
  0xe3   :  { %1406 = vmatprep.mubr.bf16.mxu0 %v9764_v3  ;;  %1872 = vmatprep.mubr.bf16.mxu1 %v9764_v3 }
  0xe4   :  { %1534 = vmatpush1.bf16.msra.mxu0 %v6841_v40  ;;  %v6494_v40 = vld [vmem:[%s9751_s1 + $0x38] ss:$20 sps:$4 sm:$0xff]  }
  0xe5   :  { %1535 = vmatprep.subr.bf16.mxu0 %v6842_v41  ;;  %v6495_v41 = vld [vmem:[%s9751_s1 + $0x1a0] ss:$20 sps:$4 sm:$0xff]  }
  0xe8   :  { %1536 = vmatpush1.bf16.msra.mxu0 %v6843_v43  ;;  %v6500_v43 = vld [vmem:[%s9751_s1 + $0x1c8] ss:$20 sps:$4 sm:$0xff]  }
  0xe9   :  { %1537 = vmatprep.subr.bf16.mxu0 %v6844_v44  ;;  %v7858_v44 = vld [vmem:[%s9750_s0 + $0x18] ss:$12 sps:$4 sm:$0xff]  }
  0xea   :  { %1407 = vmatmul.mubr.bf16.gmra.mrb[20].mxu0 %v7493_v12  ;;  %1873 = vmatmul.mubr.bf16.gmra.mrb[20].mxu1 %v7627_v42 }
  0xeb   :  { %1416 = vmatprep.mubr.bf16.mxu0 %v9764_v3  ;;  %1882 = vmatprep.mubr.bf16.mxu1 %v9764_v3 }
  0xec   :  { %1538 = vmatpush1.bf16.msra.mxu0 %v6845_v45  ;;  %v7864_v45 = vld [vmem:[%s9750_s0 + $0x34] ss:$12 sps:$4 sm:$0xff]  }
  0xed   :  { %1539 = vmatprep.subr.bf16.mxu0 %v6846_v46  ;;  %v6504_v46 = vld [vmem:[%s9751_s1 + $0x88] ss:$20 sps:$4 sm:$0xff]  }
  0xf0   :  { %1540 = vmatpush1.bf16.msra.mxu0 %v6847_v48  ;;  %v6509_v48 = vld [vmem:[%s9751_s1 + $0xb0] ss:$20 sps:$4 sm:$0xff]  }
  0xf1   :  { %1541 = vmatprep.subr.bf16.mxu0 %v6848_v51  ;;  %v6510_v51 = vld [vmem:[%s9751_s1 + $0x218] ss:$20 sps:$4 sm:$0xff]  }
  0xf2   :  { %1417 = vmatmul.mubr.bf16.gmra.mrb[24].mxu0 %v7501_v13  ;;  %1883 = vmatmul.mubr.bf16.gmra.mrb[24].mxu1 %v7648_v47 }
  0xf3   :  { %1426 = vmatprep.mubr.bf16.mxu0 %v9764_v3  ;;  %1892 = vmatprep.mubr.bf16.mxu1 %v9764_v3 }
  0xf4   :  { %1542 = vmatpush1.bf16.msra.mxu0 %v6849_v52  ;;  %v7882_v52 = vld [vmem:[%s9750_s0 + $0x30] ss:$12 sps:$4 sm:$0xff]  }
  0xf5   :  { %1543 = vmatprep.subr.bf16.mxu0 %v6850_v53  ;;  %v7888_v53 = vld [vmem:[%s9750_s0 + $0x4c] ss:$12 sps:$4 sm:$0xff]  }
  0xf8   :  { %1544 = vmatpush1.bf16.msra.mxu0 %v6851_v56  ;;  %v6515_v56 = vld [vmem:[%s9751_s1 + $0x240] ss:$20 sps:$4 sm:$0xff]  }
  0xf9   :  { %1545 = vmatprep.subr.bf16.mxu0 %v6852_v58 }
  0xfa   :  { %1427 = vmatmul.mubr.bf16.gmra.mrb[28].mxu0 %v7511_v15  ;;  %1893 = vmatmul.mubr.bf16.gmra.mrb[28].mxu1 %v7669_v55 }
  0xfb   :  { %1436 = vmatprep.mubr.bf16.mxu0 %v9764_v3  ;;  %5897 = vmatprep.mubr.bf16.mxu1 %v7436_v4  ;;  %v6855_v4 = vld [vmem:[%s9751_s1 + $0x260] ss:$20 sps:$4 sm:$0xff]  }
  0xfc   :  { %1546 = vmatpush1.bf16.msra.mxu0 %v6853_v60 }
  0xfd   :  { %1547 = vmatprep.subr.bf16.mxu0 %v6854_v61 }
 0x100   :  { %1548 = vmatpush1.bf16.msra.mxu0 %v6855_v4  ;;  %v6520_v4 = vld [vmem:[%s9751_s1 + $0x268] ss:$20 sps:$4 sm:$0xff]  }
 0x101   :  { %5609 = vmatprep.subr.bf16.mxu0 %v6485_v63  ;;  %v6519_v63 = vld [vmem:[%s9751_s1 + $0x100] ss:$20 sps:$4 sm:$0xff]  }
 0x102   :  { %1437 = vmatmul.mubr.bf16.gmra.mrb[32].mxu0 %v7519_v16  ;;  %5898 = vmatmul.mubr.bf16.vlgmr.msra.gmra.mrb[64].mxu1 %v7451_v6  ;;  %v6503_v6 = vld [vmem:[%s9754_s4 + $0x34] ss:$8 sps:$4 sm:$0xff]  }
 0x103   :  { %1446 = vmatprep.mubr.bf16.mxu0 %v9764_v3  ;;  %3321 = vmatpush1.bf16.msra.mxu1 %v6486_v2 }
 0x104   :  { %3322 = vmatprep.subr.bf16.mxu1 %v6493_v5  ;;  %5901 = vmatprep.mubr.bf16.mxu1 %v7460_v7  ;;  %v6501_v7 = vld [vmem:[%s9754_s4 + $0x30] ss:$8 sps:$4 sm:$0xff]   ;;  %v7914_v5 = vld [vmem:[%s9750_s0 + $0x48] ss:$12 sps:$4 sm:$0xff]  }
 0x107   :  { %3323 = vmatpush1.bf16.msra.mxu1 %v6491_v50  ;;  %v7920_v50 = vld [vmem:[%s9750_s0 + $0x64] ss:$12 sps:$4 sm:$0xff]  }
 0x108   :  { %3324 = vmatprep.subr.bf16.mxu1 %v6498_v8  ;;  %v6524_v8 = vld [vmem:[%s9751_s1 + $0x128] ss:$20 sps:$4 sm:$0xff]  }
 0x10a   :  { %1447 = vmatmul.mubr.bf16.gmra.mrb[36].mxu0 %v7537_v20  ;;  %5902 = vmatmul.mubr.bf16.gmra.mrb[68].mxu1 %v7472_v9  ;;  %v6513_v9 = vld [vmem:[%s9754_s4 + $0x54] ss:$8 sps:$4 sm:$0xff]  }
 0x10b   :  { %1456 = vmatprep.mubr.bf16.mxu0 %v9764_v3  ;;  %3325 = vmatpush1.bf16.msra.mxu1 %v6496_v11 }
 0x10c   :  { %3326 = vmatprep.subr.bf16.mxu1 %v6503_v6  ;;  %5905 = vmatprep.mubr.bf16.mxu1 %v7481_v10  ;;  %v6511_v10 = vld [vmem:[%s9754_s4 + $0x50] ss:$8 sps:$4 sm:$0xff]  }
 0x10f   :  { %3327 = vmatpush1.bf16.msra.mxu1 %v6501_v7 }
 0x110   :  { %3328 = vmatprep.subr.bf16.mxu1 %v6508_v14 }
 0x112   :  { %1457 = vmatmul.mubr.bf16.gmra.mrb[40].mxu0 %v7558_v25  ;;  %5906 = vmatmul.mubr.bf16.gmra.mrb[72].mxu1 %v7493_v12  ;;  %v6523_v12 = vld [vmem:[%s9754_s4 + $0x74] ss:$8 sps:$4 sm:$0xff]  }
 0x113   :  { %1466 = vmatprep.mubr.bf16.mxu0 %v9764_v3  ;;  %3329 = vmatpush1.bf16.msra.mxu1 %v6506_v17 }
 0x114   :  { %3330 = vmatprep.subr.bf16.mxu1 %v6513_v9  ;;  %5909 = vmatprep.mubr.bf16.mxu1 %v7501_v13  ;;  %v6521_v13 = vld [vmem:[%s9754_s4 + $0x70] ss:$8 sps:$4 sm:$0xff]  }
 0x117   :  { %3331 = vmatpush1.bf16.msra.mxu1 %v6511_v10 }
 0x118   :  { %3332 = vmatprep.subr.bf16.mxu1 %v6518_v18 }
 0x11a   :  { %1467 = vmatmul.mubr.bf16.gmra.mrb[44].mxu0 %v7582_v31  ;;  %5910 = vmatmul.mubr.bf16.gmra.mrb[76].mxu1 %v7511_v15  ;;  %v6530_v15 = vld [vmem:[%s9754_s4 + $0x94] ss:$8 sps:$4 sm:$0xff]  }
 0x11b   :  { %1476 = vmatprep.mubr.bf16.mxu0 %v9764_v3  ;;  %3333 = vmatpush1.bf16.msra.mxu1 %v6516_v19 }
 0x11c   :  { %3334 = vmatprep.subr.bf16.mxu1 %v6523_v12  ;;  %5913 = vmatprep.mubr.bf16.mxu1 %v7519_v16  ;;  %v6528_v16 = vld [vmem:[%s9754_s4 + $0x90] ss:$8 sps:$4 sm:$0xff]  }
 0x11f   :  { %3335 = vmatpush1.bf16.msra.mxu1 %v6521_v13 }
 0x120   :  { %3336 = vmatprep.subr.bf16.mxu1 %v6527_v21 }
 0x122   :  { %1477 = vmatmul.mubr.bf16.gmra.mrb[48].mxu0 %v7603_v36  ;;  %5914 = vmatmul.mubr.bf16.gmra.mrb[80].mxu1 %v7537_v20  ;;  %v6536_v20 = vld [vmem:[%s9754_s4 + $0xb4] ss:$8 sps:$4 sm:$0xff]  }
 0x123   :  { %1486 = vmatprep.mubr.bf16.mxu0 %v9764_v3  ;;  %3337 = vmatpush1.bf16.msra.mxu1 %v6525_v22 }
 0x124   :  { %3338 = vmatprep.subr.bf16.mxu1 %v6530_v15  ;;  %5917 = vmatprep.mubr.bf16.mxu1 %v7558_v25  ;;  %v6534_v25 = vld [vmem:[%s9754_s4 + $0xb0] ss:$8 sps:$4 sm:$0xff]  }
 0x127   :  { %3339 = vmatpush1.bf16.msra.mxu1 %v6528_v16 }
 0x128   :  { %3340 = vmatprep.subr.bf16.mxu1 %v6533_v23 }
 0x12a   :  { %1487 = vmatmul.mubr.bf16.gmra.mrb[52].mxu0 %v7627_v42  ;;  %5918 = vmatmul.mubr.bf16.gmra.mrb[84].mxu1 %v7582_v31  ;;  %v6543_v31 = vld [vmem:[%s9754_s4 + $0xe0] ss:$8 sps:$4 sm:$0xff]  }
 0x12b   :  { %1496 = vmatprep.mubr.bf16.mxu0 %v9764_v3  ;;  %3341 = vmatpush1.bf16.msra.mxu1 %v6531_v24  ;;  %v9763_v24 = vlaneseq }
 0x12c   :  { %3342 = vmatprep.subr.bf16.mxu1 %v6536_v20  ;;  %5921 = vmatprep.mubr.bf16.mxu1 %v7603_v36  ;;  %v6489_v36 = vld [vmem:[%s9751_s1 + $0x10] ss:$20 sps:$4 sm:$0xff]  }
 0x12f   :  { %3343 = vmatpush1.bf16.msra.mxu1 %v6534_v25  ;;  %v7986_v25 = vshrl.u32 %v9763_v24, 7 }
 0x130   :  { %3344 = vmatprep.subr.bf16.mxu1 %v6539_v26 }
 0x131   :  { %9815 = vst [vmem:[#allocation5_spill] sm:$0xff] %v7986_v25 }
 0x132   :  { %1497 = vmatmul.mubr.bf16.gmra.mrb[56].mxu0 %v7648_v47  ;;  %5922 = vmatmul.mubr.bf16.gmra.mrb[88].mxu1 %v7627_v42  ;;  %v6499_v42 = vld [vmem:[%s9751_s1 + $0x60] ss:$20 sps:$4 sm:$0xff]  }
 0x133   :  { %1506 = vmatprep.mubr.bf16.mxu0 %v9764_v3  ;;  %3345 = vmatpush1.bf16.msra.mxu1 %v6537_v27 }
 0x134   :  { %3346 = vmatprep.subr.bf16.mxu1 %v6542_v28  ;;  %5925 = vmatprep.mubr.bf16.mxu1 %v7648_v47  ;;  %v6505_v47 = vld [vmem:[%s9751_s1 + $0x1f0] ss:$20 sps:$4 sm:$0xff]   ;;  %v7994_v28 = vsub.s32 0, %v7986_v25 }
 0x136   :  { %9816 = vst [vmem:[#allocation6_spill] sm:$0xff] %v7994_v28 }
 0x137   :  { %3347 = vmatpush1.bf16.msra.mxu1 %v6540_v29  ;;  %v2237_v29 = vsub.s32 2, %v7986_v25 }
 0x138   :  { %3348 = vmatprep.subr.bf16.mxu1 %v6545_v30 }
 0x13a   :  { %1507 = vmatmul.mubr.bf16.gmra.mrb[60].mxu0 %v7669_v55  ;;  %5926 = vmatmul.mubr.bf16.gmra.mrb[92].mxu1 %v7669_v55  ;;  %v6514_v55 = vld [vmem:[%s9751_s1 + $0xd8] ss:$20 sps:$4 sm:$0xff]  }
 0x13b   :  { %1549 = vmatprep.mubr.bf16.mxu0 %v7816_v33  ;;  %3349 = vmatpush1.bf16.msra.mxu1 %v6543_v31  ;;  %v2225_v31 = vld [vmem:[%s9752_s2] sm:$0x1f] }
 0x13c   :  { %3350 = vmatprep.subr.bf16.mxu1 %v6548_v32  ;;  %v8003_v32 = vsub.s32 1, %v7986_v25 }
 0x13e   :  { %9817 = vst [vmem:[#allocation7_spill] sm:$0xff] %v8003_v32 }
 0x13f   :  { %3351 = vmatpush1.bf16.msra.mxu1 %v6546_v34 }
 0x140   :  { %3513 = vmatprep.subr.bf16.mxu1 %v6551_v35  ;;  %v2412_v35 = vld [vmem:[%s9753_s3] sm:$0x1f] }
 0x142   :  { %1550 = vmatmul.mubr.bf16.vlgmr.msra.gmra.mrb[64].mxu0 %v7834_v38 }
 0x143   :  { %1559 = vmatprep.mubr.bf16.mxu0 %v7840_v39  ;;  %5610 = vmatpush3.bf16.msra.mxu0 %v6489_v36  ;;  %v8013_v36 = vrot.slane %v2225_v31, %v7994_v28 }
 0x144   :  { %5611 = vmatprep.subr.bf16.mxu0 %v6490_v37  ;;  %v8015_v37 = vrot.slane %v2225_v31, %v2237_v29 }
 0x147   :  { %5612 = vmatpush3.bf16.msra.mxu0 %v6494_v40  ;;  %v8024_v40 = vrot.slane %v2412_v35, %v7994_v28 }
 0x148   :  { %5613 = vmatprep.subr.bf16.mxu0 %v6495_v41  ;;  %v8026_v41 = vrot.slane %v2412_v35, %v2237_v29 }
 0x14a   :  { %1560 = vmatmul.mubr.bf16.gmra.mrb[68].mxu0 %v7858_v44 }
 0x14b   :  { %1569 = vmatprep.mubr.bf16.mxu0 %v7864_v45  ;;  %5614 = vmatpush3.bf16.msra.mxu0 %v6499_v42 }
 0x14c   :  { %5615 = vmatprep.subr.bf16.mxu0 %v6500_v43 }
 0x14f   :  { %5616 = vmatpush3.bf16.msra.mxu0 %v6504_v46 }
 0x150   :  { %5617 = vmatprep.subr.bf16.mxu0 %v6505_v47 }
 0x152   :  { %1570 = vmatmul.mubr.bf16.gmra.mrb[72].mxu0 %v7882_v52 }
 0x153   :  { %1579 = vmatprep.mubr.bf16.mxu0 %v7888_v53  ;;  %5618 = vmatpush3.bf16.msra.mxu0 %v6509_v48 }
 0x154   :  { %5619 = vmatprep.subr.bf16.mxu0 %v6510_v51 }
 0x155   :  { %v7897_v58 = vpop.f32.mrb[32].mxu1 }
 0x156   :  { %v7899_v60 = vpop.f32.mrb[33].mxu1 }
 0x157   :  { %v7901_v61 = vpop.f32.mrb[34].mxu1  ;;  %5620 = vmatpush3.bf16.msra.mxu0 %v6514_v55 }
 0x158   :  { %v7906_v2 = vpop.f32.mrb[35].mxu1  ;;  %5621 = vmatprep.subr.bf16.mxu0 %v6515_v56 }
 0x15a   :  { %1580 = vmatmul.mubr.bf16.gmra.mrb[76].mxu0 %v7914_v5 }
 0x15b   :  { %1589 = vmatprep.mubr.bf16.mxu0 %v7920_v50  ;;  %5622 = vmatpush3.bf16.msra.mxu0 %v6519_v63 }
 0x15c   :  { %5623 = vmatprep.subr.bf16.mxu0 %v6520_v4 }
 0x15d   :  { %v7926_v11 = vpop.f32.mrb[36].mxu1 }
 0x15e   :  { %v7928_v6 = vpop.f32.mrb[37].mxu1 }
 0x15f   :  { %v7930_v7 = vpop.f32.mrb[38].mxu1  ;;  %5624 = vmatpush3.bf16.msra.mxu0 %v6524_v8 }
 0x160   :  { %v7932_v14 = vpop.f32.mrb[39].mxu1 }
 0x162   :  { %1590 = vmatmul.mubr.bf16.gmra.mrb[80].mxu0 %v7352_v49 }
 0x163   :  { %1599 = vmatprep.mubr.bf16.mxu0 %v7368_v54 }
 0x165   :  { %v7936_v17 = vpop.f32.mrb[40].mxu1 }
 0x166   :  { %v7938_v9 = vpop.f32.mrb[41].mxu1 }
 0x167   :  { %v7940_v10 = vpop.f32.mrb[42].mxu1 }
 0x168   :  { %v7942_v18 = vpop.f32.mrb[43].mxu1 }
 0x16a   :  { %1600 = vmatmul.mubr.bf16.gmra.mrb[84].mxu0 %v7385_v57 }
 0x16b   :  { %1609 = vmatprep.mubr.bf16.mxu0 %v7396_v59 }
 0x16d   :  { %v7946_v19 = vpop.f32.mrb[44].mxu1 }
 0x16e   :  { %v7948_v12 = vpop.f32.mrb[45].mxu1 }
 0x16f   :  { %v7950_v13 = vpop.f32.mrb[46].mxu1 }
 0x170   :  { %v7952_v49 = vpop.f32.mrb[47].mxu1 }
 0x172   :  { %1610 = vmatmul.mubr.bf16.gmra.mrb[88].mxu0 %v7407_v1 }
 0x173   :  { %1619 = vmatprep.mubr.bf16.mxu0 %v7415_v62 }
 0x175   :  { %v7956_v54 = vpop.f32.mrb[48].mxu1 }
 0x176   :  { %v7958_v21 = vpop.f32.mrb[49].mxu1 }
 0x177   :  { %v7960_v22 = vpop.f32.mrb[50].mxu1 }
 0x178   :  { %v7962_v57 = vpop.f32.mrb[51].mxu1 }
 0x17a   :  { %1620 = vmatmul.mubr.bf16.gmra.mrb[92].mxu0 %v7425_v0 }
 0x17b   :  { %1935 = vmatprep.mubr.bf16.mxu0 %v7816_v33  ;;  %v2241_v33 = vsub.s32 3, %v7986_v25 }
 0x17d   :  { %v7966_v59 = vpop.f32.mrb[52].mxu1 }
 0x17e   :  { %v7968_v15 = vpop.f32.mrb[53].mxu1 }
 0x17f   :  { %v7970_v16 = vpop.f32.mrb[54].mxu1 }
 0x180   :  { %v7972_v1 = vpop.f32.mrb[55].mxu1 }
 0x182   :  { %1936 = vmatmul.mubr.bf16.vlgmr.msra.gmra.mrb[96].mxu0 %v7834_v38  ;;  %v8018_v38 = vrot.slane %v2225_v31, %v8003_v32 }
 0x183   :  { %1943 = vmatprep.mubr.bf16.mxu0 %v7840_v39  ;;  %v8020_v39 = vrot.slane %v2225_v31, %v2241_v33 }
 0x185   :  { %v7976_v62 = vpop.f32.mrb[56].mxu1 }
 0x186   :  { %v7978_v23 = vpop.f32.mrb[57].mxu1 }
 0x187   :  { %v7980_v0 = vpop.f32.mrb[58].mxu1 }
 0x188   :  { %v7982_v20 = vpop.f32.mrb[59].mxu1 }
 0x18a   :  { %1944 = vmatmul.mubr.bf16.gmra.mrb[100].mxu0 %v7858_v44  ;;  %v8029_v44 = vrot.slane %v2412_v35, %v8003_v32 }
 0x18b   :  { %1951 = vmatprep.mubr.bf16.mxu0 %v7864_v45  ;;  %v8031_v45 = vrot.slane %v2412_v35, %v2241_v33 }
 0x18d   :  { %v7989_v26 = vpop.f32.mrb[60].mxu1 }
 0x18e   :  { %v7991_v27 = vpop.f32.mrb[61].mxu1 }
 0x18f   :  { %v7997_v30 = vpop.f32.mrb[62].mxu1 }
 0x190   :  { %v8006_v34 = vpop.f32.mrb[63].mxu1 }
 0x191   :  { %9818 = vst [vmem:[#allocation8_spill] sm:$0xff] %v8006_v34 }
 0x192   :  { %1952 = vmatmul.mubr.bf16.gmra.mrb[104].mxu0 %v7882_v52 }
 0x193   :  { %1959 = vmatprep.mubr.bf16.mxu0 %v7888_v53 }
 0x195   :  { %v1358_v42 = vpop.f32.mrb[0].mxu0  ;;  %v1824_v43 = vpop.f32.mrb[0].mxu1 }
 0x196   :  { %v2252_v46 = vmul.f32 %v8013_v36, %v1358_v42  ;;  %v2334_v47 = vmul.f32 %v8015_v37, %v1824_v43  ;;  %v1360_v48 = vpop.f32.mrb[1].mxu0  ;;  %v1826_v51 = vpop.f32.mrb[1].mxu1 }
 0x197   :  { %v2253_v52 = vmul.f32 %v8018_v38, %v1360_v48  ;;  %v2335_v53 = vmul.f32 %v8020_v39, %v1826_v51  ;;  %v1362_v55 = vpop.f32.mrb[2].mxu0  ;;  %v1828_v56 = vpop.f32.mrb[2].mxu1 }
 0x198   :  { %v2439_v63 = vadd.f32 %v8024_v40, %v2252_v46  ;;  %v2521_v4 = vadd.f32 %v8026_v41, %v2334_v47  ;;  %v2257_v8 = vmul.f32 %v8013_v36, %v1362_v55  ;;  %v2339_v29 = vmul.f32 %v8015_v37, %v1828_v56  ;;  %v1364_v31 = vpop.f32.mrb[3].mxu0  ;;  %v1830_v33 = vpop.f32.mrb[3].mxu1 }
 0x199   :  { %v2440_v35 = vadd.f32 %v8029_v44, %v2253_v52  ;;  %v2522_v42 = vadd.f32 %v8031_v45, %v2335_v53  ;;  %v2258_v43 = vmul.f32 %v8018_v38, %v1364_v31  ;;  %v2340_v48 = vmul.f32 %v8020_v39, %v1830_v33 }
 0x19a   :  { %v2444_v51 = vadd.f32 %v8024_v40, %v2257_v8  ;;  %v2526_v46 = vadd.f32 %v8026_v41, %v2339_v29  ;;  %1960 = vmatmul.mubr.bf16.gmra.mrb[108].mxu0 %v7914_v5  ;;  %v2599_v56 = vmax.f32 %v2439_v63, 0.0  ;;  %v2681_v52 = vmax.f32 %v2521_v4, 0.0 }
 0x19b   :  { %v2445_v47 = vadd.f32 %v8029_v44, %v2258_v43  ;;  %v2527_v55 = vadd.f32 %v8031_v45, %v2340_v48  ;;  %1967 = vmatprep.mubr.bf16.mxu0 %v7920_v50  ;;  %v2600_v3 = vmax.f32 %v2440_v35, 0.0  ;;  %v2682_v31 = vmax.f32 %v2522_v42, 0.0 }
 0x19c   :  { %v2604_v24 = vmax.f32 %v2444_v51, 0.0  ;;  %v2686_v53 = vmax.f32 %v2526_v46, 0.0  ;;  %v6549_v51 = vld [vmem:[%s9754_s4 + $0x100] ss:$8 sps:$4 sm:$0xff]  }
 0x19d   :  { %v2605_v32 = vmax.f32 %v2445_v47, 0.0  ;;  %v2687_v33 = vmax.f32 %v2527_v55, 0.0  ;;  %v1368_v28 = vpop.f32.mrb[4].mxu0  ;;  %v1834_v8 = vpop.f32.mrb[4].mxu1 }
 0x19e   :  { %v2759_v25 = vpack.c.bf16 %v2604_v24, %v2599_v56  ;;  %v2262_v29 = vmul.f32 %v8013_v36, %v1368_v28  ;;  %v2344_v5 = vmul.f32 %v8015_v37, %v1834_v8  ;;  %v1370_v43 = vpop.f32.mrb[5].mxu0  ;;  %v1836_v34 = vpop.f32.mrb[5].mxu1  ;;  %v8053_v48 = vpack.c.bf16 %v2686_v53, %v2681_v52 }
 0x19f   :  { %v2263_v50 = vmul.f32 %v8018_v38, %v1370_v43  ;;  %v2345_v63 = vmul.f32 %v8020_v39, %v1836_v34  ;;  %v1372_v4 = vpop.f32.mrb[6].mxu0  ;;  %v1838_v35 = vpop.f32.mrb[6].mxu1  ;;  %v2760_v42 = vpack.c.bf16 %v2605_v32, %v2600_v3  ;;  %v8060_v24 = vpack.c.bf16 %v2687_v33, %v2682_v31  ;;  %v6554_v3 = vld [vmem:[%s9754_s4 + $0x114] ss:$8 sps:$4 sm:$0xff]  }
 0x1a0   :  { %9819 = vst [vmem:[#allocation9_spill] sm:$0xff] %v8053_v48  ;;  %v2449_v28 = vadd.f32 %v8024_v40, %v2262_v29  ;;  %v2531_v46 = vadd.f32 %v8026_v41, %v2344_v5  ;;  %v2267_v47 = vmul.f32 %v8013_v36, %v1372_v4  ;;  %v2349_v55 = vmul.f32 %v8015_v37, %v1838_v35  ;;  %v1374_v56 = vpop.f32.mrb[7].mxu0  ;;  %v1840_v52 = vpop.f32.mrb[7].mxu1  ;;  %v6865_v29 = vld [vmem:[%s9750_s0 + $0x60] ss:$12 sps:$4 sm:$0xff]  }
 0x1a1   :  { %9820 = vst [vmem:[#allocation10_spill] sm:$0xff] %v8060_v24  ;;  %v2450_v32 = vadd.f32 %v8029_v44, %v2263_v50  ;;  %v2532_v34 = vadd.f32 %v8031_v45, %v2345_v63  ;;  %v2268_v53 = vmul.f32 %v8018_v38, %v1374_v56  ;;  %v2350_v31 = vmul.f32 %v8020_v39, %v1840_v52  ;;  %v6866_v50 = vld [vmem:[%s9750_s0 + $0x7c] ss:$12 sps:$4 sm:$0xff]   ;;  %v6552_v63 = vld [vmem:[%s9754_s4 + $0x110] ss:$8 sps:$4 sm:$0xff]  }
 0x1a2   :  { %3352 = vmatprep.mubr.bf16.mxu1 %v2760_v42  ;;  %v2454_v33 = vadd.f32 %v8024_v40, %v2267_v47  ;;  %v2536_v8 = vadd.f32 %v8026_v41, %v2349_v55  ;;  %1968 = vmatmul.mubr.bf16.gmra.mrb[112].mxu0 %v6865_v29  ;;  %v2609_v4 = vmax.f32 %v2449_v28, 0.0  ;;  %v2691_v35 = vmax.f32 %v2531_v46, 0.0 }
 0x1a3   :  { %3353 = vmatmul.mubr.bf16.vlgmr.msra.gmra.mrb[96].mxu1 %v2759_v25  ;;  %v2455_v5 = vadd.f32 %v8029_v44, %v2268_v53  ;;  %v2537_v43 = vadd.f32 %v8031_v45, %v2350_v31  ;;  %1975 = vmatprep.mubr.bf16.mxu0 %v6866_v50  ;;  %v6557_v25 = vld [vmem:[%s9754_s4 + $0x124] ss:$8 sps:$4 sm:$0xff]   ;;  %v2610_v55 = vmax.f32 %v2450_v32, 0.0 }
 0x1a4   :  { %3514 = vmatpush1.bf16.msra.mxu1 %v6549_v51  ;;  %v2614_v42 = vmax.f32 %v2454_v33, 0.0  ;;  %v2696_v47 = vmax.f32 %v2536_v8, 0.0  ;;  %v2692_v51 = vmax.f32 %v2532_v34, 0.0 }
 0x1a5   :  { %3515 = vmatprep.subr.bf16.mxu1 %v6554_v3  ;;  %v2615_v56 = vmax.f32 %v2455_v5, 0.0  ;;  %v2697_v52 = vmax.f32 %v2537_v43, 0.0  ;;  %v1378_v53 = vpop.f32.mrb[8].mxu0  ;;  %v1844_v31 = vpop.f32.mrb[8].mxu1  ;;  %v6555_v5 = vld [vmem:[%s9754_s4 + $0x120] ss:$8 sps:$4 sm:$0xff]  }
 0x1a6   :  { %v2272_v29 = vmul.f32 %v8013_v36, %v1378_v53  ;;  %v2354_v50 = vmul.f32 %v8015_v37, %v1844_v31  ;;  %v1380_v48 = vpop.f32.mrb[9].mxu0  ;;  %v1846_v28 = vpop.f32.mrb[9].mxu1  ;;  %v2764_v46 = vpack.c.bf16 %v2614_v42, %v2609_v4  ;;  %v8091_v33 = vpack.c.bf16 %v2696_v47, %v2691_v35 }
 0x1a7   :  { %v2273_v3 = vmul.f32 %v8018_v38, %v1380_v48  ;;  %v2355_v8 = vmul.f32 %v8020_v39, %v1846_v28  ;;  %v1382_v24 = vpop.f32.mrb[10].mxu0  ;;  %v1848_v32 = vpop.f32.mrb[10].mxu1  ;;  %v2765_v34 = vpack.c.bf16 %v2615_v56, %v2610_v55  ;;  %v8098_v43 = vpack.c.bf16 %v2697_v52, %v2692_v51  ;;  %v6868_v28 = vld [vmem:[%s9750_s0 + $0x94] ss:$12 sps:$4 sm:$0xff]  }
 0x1a8   :  { %9821 = vst [vmem:[#allocation11_spill] sm:$0xff] %v8091_v33  ;;  %3516 = vmatpush1.bf16.msra.mxu1 %v6552_v63  ;;  %v2459_v53 = vadd.f32 %v8024_v40, %v2272_v29  ;;  %v2541_v4 = vadd.f32 %v8026_v41, %v2354_v50  ;;  %v2277_v35 = vmul.f32 %v8013_v36, %v1382_v24  ;;  %v1384_v42 = vpop.f32.mrb[11].mxu0  ;;  %v1850_v47 = vpop.f32.mrb[11].mxu1  ;;  %v6560_v63 = vld [vmem:[%s9754_s4 + $0x134] ss:$8 sps:$4 sm:$0xff]  }
 0x1a9   :  { %9822 = vst [vmem:[#allocation12_spill] sm:$0xff] %v8098_v43  ;;  %v2359_v48 = vmul.f32 %v8015_v37, %v1848_v32  ;;  %3517 = vmatprep.subr.bf16.mxu1 %v6557_v25  ;;  %v2460_v55 = vadd.f32 %v8029_v44, %v2273_v3  ;;  %v2542_v51 = vadd.f32 %v8031_v45, %v2355_v8  ;;  %v6867_v25 = vld [vmem:[%s9750_s0 + $0x78] ss:$12 sps:$4 sm:$0xff]  }
 0x1aa   :  { %v2278_v56 = vmul.f32 %v8018_v38, %v1384_v42  ;;  %v2360_v52 = vmul.f32 %v8020_v39, %v1850_v47  ;;  %3362 = vmatprep.mubr.bf16.mxu1 %v2765_v34  ;;  %v2464_v24 = vadd.f32 %v8024_v40, %v2277_v35  ;;  %1976 = vmatmul.mubr.bf16.gmra.mrb[116].mxu0 %v6867_v25  ;;  %v6558_v3 = vld [vmem:[%s9754_s4 + $0x130] ss:$8 sps:$4 sm:$0xff]   ;;  %v2619_v8 = vmax.f32 %v2459_v53, 0.0 }
 0x1ab   :  { %v2546_v31 = vadd.f32 %v8026_v41, %v2359_v48  ;;  %3363 = vmatmul.mubr.bf16.gmra.mrb[100].mxu1 %v2764_v46  ;;  %1983 = vmatprep.mubr.bf16.mxu0 %v6868_v28  ;;  %v2701_v32 = vmax.f32 %v2541_v4, 0.0  ;;  %v6563_v46 = vld [vmem:[%s9754_s4 + $0x144] ss:$8 sps:$4 sm:$0xff]   ;;  %v2620_v48 = vmax.f32 %v2460_v55, 0.0  ;;  %v2702_v42 = vmax.f32 %v2542_v51, 0.0 }
 0x1ac   :  { %v2465_v29 = vadd.f32 %v8029_v44, %v2278_v56  ;;  %v2547_v50 = vadd.f32 %v8031_v45, %v2360_v52  ;;  %3518 = vmatpush1.bf16.msra.mxu1 %v6555_v5  ;;  %v2624_v34 = vmax.f32 %v2464_v24, 0.0 }
 0x1ad   :  { %v2706_v35 = vmax.f32 %v2546_v31, 0.0  ;;  %3519 = vmatprep.subr.bf16.mxu1 %v6560_v63  ;;  %v1388_v52 = vpop.f32.mrb[12].mxu0  ;;  %v1854_v25 = vpop.f32.mrb[12].mxu1 }
 0x1ae   :  { %v2625_v47 = vmax.f32 %v2465_v29, 0.0  ;;  %v2707_v56 = vmax.f32 %v2547_v50, 0.0  ;;  %v2282_v5 = vmul.f32 %v8013_v36, %v1388_v52  ;;  %v2364_v28 = vmul.f32 %v8015_v37, %v1854_v25  ;;  %v1390_v33 = vpop.f32.mrb[13].mxu0  ;;  %v1856_v53 = vpop.f32.mrb[13].mxu1  ;;  %v6561_v29 = vld [vmem:[%s9754_s4 + $0x140] ss:$8 sps:$4 sm:$0xff]  }
 0x1af   :  { %v2769_v4 = vpack.c.bf16 %v2624_v34, %v2619_v8  ;;  %v8129_v24 = vpack.c.bf16 %v2706_v35, %v2701_v32  ;;  %v2283_v63 = vmul.f32 %v8018_v38, %v1390_v33  ;;  %v2365_v31 = vmul.f32 %v8020_v39, %v1856_v53  ;;  %v1392_v43 = vpop.f32.mrb[14].mxu0  ;;  %v1858_v55 = vpop.f32.mrb[14].mxu1  ;;  %v6870_v53 = vld [vmem:[%s9750_s0 + $0xac] ss:$12 sps:$4 sm:$0xff]  }
 0x1b0   :  { %v2770_v51 = vpack.c.bf16 %v2625_v47, %v2620_v48  ;;  %3520 = vmatpush1.bf16.msra.mxu1 %v6558_v3  ;;  %v8136_v50 = vpack.c.bf16 %v2707_v56, %v2702_v42  ;;  %v2469_v52 = vadd.f32 %v8024_v40, %v2282_v5  ;;  %v2551_v8 = vadd.f32 %v8026_v41, %v2364_v28  ;;  %v1394_v34 = vpop.f32.mrb[15].mxu0  ;;  %v1860_v35 = vpop.f32.mrb[15].mxu1  ;;  %v6566_v3 = vld [vmem:[%s9754_s4 + $0x154] ss:$8 sps:$4 sm:$0xff]  }
 0x1b1   :  { %9823 = vst [vmem:[#allocation13_spill] sm:$0xff] %v8129_v24  ;;  %v2287_v32 = vmul.f32 %v8013_v36, %v1392_v43  ;;  %v2369_v33 = vmul.f32 %v8015_v37, %v1858_v55  ;;  %3521 = vmatprep.subr.bf16.mxu1 %v6563_v46  ;;  %v2470_v48 = vadd.f32 %v8029_v44, %v2283_v63  ;;  %v6869_v46 = vld [vmem:[%s9750_s0 + $0x90] ss:$12 sps:$4 sm:$0xff]  }
 0x1b2   :  { %9824 = vst [vmem:[#allocation14_spill] sm:$0xff] %v8136_v50  ;;  %v2552_v42 = vadd.f32 %v8031_v45, %v2365_v31  ;;  %v2288_v47 = vmul.f32 %v8018_v38, %v1394_v34  ;;  %v2370_v56 = vmul.f32 %v8020_v39, %v1860_v35  ;;  %3372 = vmatprep.mubr.bf16.mxu1 %v2770_v51  ;;  %v6564_v63 = vld [vmem:[%s9754_s4 + $0x150] ss:$8 sps:$4 sm:$0xff]   ;;  %v2629_v31 = vmax.f32 %v2469_v52, 0.0 }
 0x1b3   :  { %v2474_v43 = vadd.f32 %v8024_v40, %v2287_v32  ;;  %v2556_v25 = vadd.f32 %v8026_v41, %v2369_v33  ;;  %1984 = vmatmul.mubr.bf16.gmra.mrb[120].mxu0 %v6869_v46  ;;  %3373 = vmatmul.mubr.bf16.gmra.mrb[104].mxu1 %v2769_v4  ;;  %v2711_v55 = vmax.f32 %v2551_v8, 0.0  ;;  %v6569_v4 = vld [vmem:[%s9754_s4 + $0x164] ss:$8 sps:$4 sm:$0xff]   ;;  %v2630_v33 = vmax.f32 %v2470_v48, 0.0 }
 0x1b4   :  { %v2475_v5 = vadd.f32 %v8029_v44, %v2288_v47  ;;  %v2557_v28 = vadd.f32 %v8031_v45, %v2370_v56  ;;  %1991 = vmatprep.mubr.bf16.mxu0 %v6870_v53  ;;  %3522 = vmatpush1.bf16.msra.mxu1 %v6561_v29  ;;  %v2712_v34 = vmax.f32 %v2552_v42, 0.0 }
 0x1b5   :  { %v2634_v51 = vmax.f32 %v2474_v43, 0.0  ;;  %v2716_v32 = vmax.f32 %v2556_v25, 0.0  ;;  %3523 = vmatprep.subr.bf16.mxu1 %v6566_v3  ;;  %v1398_v56 = vpop.f32.mrb[16].mxu0  ;;  %v1864_v46 = vpop.f32.mrb[16].mxu1 }
 0x1b6   :  { %v2635_v35 = vmax.f32 %v2475_v5, 0.0  ;;  %v2717_v47 = vmax.f32 %v2557_v28, 0.0  ;;  %v2292_v29 = vmul.f32 %v8013_v36, %v1398_v56  ;;  %v2374_v53 = vmul.f32 %v8015_v37, %v1864_v46  ;;  %v1400_v24 = vpop.f32.mrb[17].mxu0  ;;  %v1866_v52 = vpop.f32.mrb[17].mxu1  ;;  %v6567_v5 = vld [vmem:[%s9754_s4 + $0x160] ss:$8 sps:$4 sm:$0xff]  }
 0x1b7   :  { %v2774_v8 = vpack.c.bf16 %v2634_v51, %v2629_v31  ;;  %v8167_v43 = vpack.c.bf16 %v2716_v32, %v2711_v55  ;;  %v2293_v3 = vmul.f32 %v8018_v38, %v1400_v24  ;;  %v2375_v25 = vmul.f32 %v8020_v39, %v1866_v52  ;;  %v1402_v50 = vpop.f32.mrb[18].mxu0  ;;  %v1868_v48 = vpop.f32.mrb[18].mxu1  ;;  %v6872_v52 = vld [vmem:[%s9750_s0 + $0xc4] ss:$12 sps:$4 sm:$0xff]  }
 0x1b8   :  { %v2775_v42 = vpack.c.bf16 %v2635_v35, %v2630_v33  ;;  %3524 = vmatpush1.bf16.msra.mxu1 %v6564_v63  ;;  %v8174_v28 = vpack.c.bf16 %v2717_v47, %v2712_v34  ;;  %v2479_v56 = vadd.f32 %v8024_v40, %v2292_v29  ;;  %v2561_v31 = vadd.f32 %v8026_v41, %v2374_v53  ;;  %v1404_v51 = vpop.f32.mrb[19].mxu0  ;;  %v1870_v32 = vpop.f32.mrb[19].mxu1  ;;  %v6572_v63 = vld [vmem:[%s9754_s4 + $0x174] ss:$8 sps:$4 sm:$0xff]  }
 0x1b9   :  { %9825 = vst [vmem:[#allocation15_spill] sm:$0xff] %v8167_v43  ;;  %v2297_v55 = vmul.f32 %v8013_v36, %v1402_v50  ;;  %v2379_v24 = vmul.f32 %v8015_v37, %v1868_v48  ;;  %3525 = vmatprep.subr.bf16.mxu1 %v6569_v4  ;;  %v2480_v33 = vadd.f32 %v8029_v44, %v2293_v3  ;;  %v6871_v4 = vld [vmem:[%s9750_s0 + $0xa8] ss:$12 sps:$4 sm:$0xff]   ;;  %v6570_v3 = vld [vmem:[%s9754_s4 + $0x170] ss:$8 sps:$4 sm:$0xff]  }
 0x1ba   :  { %9826 = vst [vmem:[#allocation16_spill] sm:$0xff] %v8174_v28  ;;  %v2562_v34 = vadd.f32 %v8031_v45, %v2375_v25  ;;  %v2298_v35 = vmul.f32 %v8018_v38, %v1404_v51  ;;  %v2380_v47 = vmul.f32 %v8020_v39, %v1870_v32  ;;  %3382 = vmatprep.mubr.bf16.mxu1 %v2775_v42  ;;  %v2639_v25 = vmax.f32 %v2479_v56, 0.0 }
 0x1bb   :  { %v2484_v50 = vadd.f32 %v8024_v40, %v2297_v55  ;;  %v2566_v46 = vadd.f32 %v8026_v41, %v2379_v24  ;;  %1992 = vmatmul.mubr.bf16.gmra.mrb[124].mxu0 %v6871_v4  ;;  %3383 = vmatmul.mubr.bf16.gmra.mrb[108].mxu1 %v2774_v8  ;;  %v2721_v48 = vmax.f32 %v2561_v31, 0.0  ;;  %v6575_v8 = vld [vmem:[%s9754_s4 + $0x184] ss:$8 sps:$4 sm:$0xff]   ;;  %v2640_v24 = vmax.f32 %v2480_v33, 0.0 }
 0x1bc   :  { %v2485_v29 = vadd.f32 %v8029_v44, %v2298_v35  ;;  %v2567_v53 = vadd.f32 %v8031_v45, %v2380_v47  ;;  %1999 = vmatprep.mubr.bf16.mxu0 %v6872_v52  ;;  %3526 = vmatpush1.bf16.msra.mxu1 %v6567_v5  ;;  %v2722_v51 = vmax.f32 %v2562_v34, 0.0 }
 0x1bd   :  { %v2644_v42 = vmax.f32 %v2484_v50, 0.0  ;;  %v2726_v55 = vmax.f32 %v2566_v46, 0.0  ;;  %3527 = vmatprep.subr.bf16.mxu1 %v6572_v63  ;;  %v1408_v47 = vpop.f32.mrb[20].mxu0  ;;  %v1874_v4 = vpop.f32.mrb[20].mxu1 }
 0x1be   :  { %v2645_v32 = vmax.f32 %v2485_v29, 0.0  ;;  %v2727_v35 = vmax.f32 %v2567_v53, 0.0  ;;  %v2302_v5 = vmul.f32 %v8013_v36, %v1408_v47  ;;  %v2384_v52 = vmul.f32 %v8015_v37, %v1874_v4  ;;  %v1410_v43 = vpop.f32.mrb[21].mxu0  ;;  %v1876_v56 = vpop.f32.mrb[21].mxu1  ;;  %v6573_v29 = vld [vmem:[%s9754_s4 + $0x180] ss:$8 sps:$4 sm:$0xff]  }
 0x1bf   :  { %v2779_v31 = vpack.c.bf16 %v2644_v42, %v2639_v25  ;;  %v8205_v50 = vpack.c.bf16 %v2726_v55, %v2721_v48  ;;  %v2303_v63 = vmul.f32 %v8018_v38, %v1410_v43  ;;  %v2385_v46 = vmul.f32 %v8020_v39, %v1876_v56  ;;  %v1412_v28 = vpop.f32.mrb[22].mxu0  ;;  %v1878_v33 = vpop.f32.mrb[22].mxu1  ;;  %v6874_v56 = vld [vmem:[%s9750_s0 + $0xdc] ss:$12 sps:$4 sm:$0xff]  }
 0x1c0   :  { %v2780_v34 = vpack.c.bf16 %v2645_v32, %v2640_v24  ;;  %3528 = vmatpush1.bf16.msra.mxu1 %v6570_v3  ;;  %v8212_v53 = vpack.c.bf16 %v2727_v35, %v2722_v51  ;;  %v2489_v47 = vadd.f32 %v8024_v40, %v2302_v5  ;;  %v2571_v25 = vadd.f32 %v8026_v41, %v2384_v52  ;;  %v1414_v42 = vpop.f32.mrb[23].mxu0  ;;  %v1880_v55 = vpop.f32.mrb[23].mxu1  ;;  %v6578_v3 = vld [vmem:[%s9754_s4 + $0x194] ss:$8 sps:$4 sm:$0xff]  }
 0x1c1   :  { %9827 = vst [vmem:[#allocation17_spill] sm:$0xff] %v8205_v50  ;;  %v2307_v48 = vmul.f32 %v8013_v36, %v1412_v28  ;;  %v2389_v43 = vmul.f32 %v8015_v37, %v1878_v33  ;;  %3529 = vmatprep.subr.bf16.mxu1 %v6575_v8  ;;  %v2490_v24 = vadd.f32 %v8029_v44, %v2303_v63  ;;  %v6873_v8 = vld [vmem:[%s9750_s0 + $0xc0] ss:$12 sps:$4 sm:$0xff]   ;;  %v6576_v63 = vld [vmem:[%s9754_s4 + $0x190] ss:$8 sps:$4 sm:$0xff]  }
 0x1c2   :  { %9828 = vst [vmem:[#allocation18_spill] sm:$0xff] %v8212_v53  ;;  %v2572_v51 = vadd.f32 %v8031_v45, %v2385_v46  ;;  %v2308_v32 = vmul.f32 %v8018_v38, %v1414_v42  ;;  %v2390_v35 = vmul.f32 %v8020_v39, %v1880_v55  ;;  %3392 = vmatprep.mubr.bf16.mxu1 %v2780_v34  ;;  %v2649_v46 = vmax.f32 %v2489_v47, 0.0 }
 0x1c3   :  { %v2494_v28 = vadd.f32 %v8024_v40, %v2307_v48  ;;  %v2576_v4 = vadd.f32 %v8026_v41, %v2389_v43  ;;  %2000 = vmatmul.mubr.bf16.gmra.mrb[128].mxu0 %v6873_v8  ;;  %3393 = vmatmul.mubr.bf16.gmra.mrb[112].mxu1 %v2779_v31  ;;  %v2731_v33 = vmax.f32 %v2571_v25, 0.0  ;;  %v6581_v31 = vld [vmem:[%s9754_s4 + $0x1a4] ss:$8 sps:$4 sm:$0xff]   ;;  %v2650_v43 = vmax.f32 %v2490_v24, 0.0 }
 0x1c4   :  { %v2495_v5 = vadd.f32 %v8029_v44, %v2308_v32  ;;  %v2577_v52 = vadd.f32 %v8031_v45, %v2390_v35  ;;  %2007 = vmatprep.mubr.bf16.mxu0 %v6874_v56  ;;  %3530 = vmatpush1.bf16.msra.mxu1 %v6573_v29  ;;  %v2732_v42 = vmax.f32 %v2572_v51, 0.0 }
 0x1c5   :  { %v2654_v34 = vmax.f32 %v2494_v28, 0.0  ;;  %v2736_v48 = vmax.f32 %v2576_v4, 0.0  ;;  %3531 = vmatprep.subr.bf16.mxu1 %v6578_v3  ;;  %v1418_v35 = vpop.f32.mrb[24].mxu0  ;;  %v1884_v8 = vpop.f32.mrb[24].mxu1 }
 0x1c6   :  { %v2655_v55 = vmax.f32 %v2495_v5, 0.0  ;;  %v2737_v32 = vmax.f32 %v2577_v52, 0.0  ;;  %v2312_v29 = vmul.f32 %v8013_v36, %v1418_v35  ;;  %v2394_v56 = vmul.f32 %v8015_v37, %v1884_v8  ;;  %v1420_v50 = vpop.f32.mrb[25].mxu0  ;;  %v1886_v47 = vpop.f32.mrb[25].mxu1  ;;  %v6579_v5 = vld [vmem:[%s9754_s4 + $0x1a0] ss:$8 sps:$4 sm:$0xff]  }
 0x1c7   :  { %v2784_v25 = vpack.c.bf16 %v2654_v34, %v2649_v46  ;;  %v8243_v28 = vpack.c.bf16 %v2736_v48, %v2731_v33  ;;  %v2313_v3 = vmul.f32 %v8018_v38, %v1420_v50  ;;  %v2395_v4 = vmul.f32 %v8020_v39, %v1886_v47  ;;  %v1422_v53 = vpop.f32.mrb[26].mxu0  ;;  %v1888_v24 = vpop.f32.mrb[26].mxu1  ;;  %v6876_v47 = vld [vmem:[%s9750_s0 + $0xf4] ss:$12 sps:$4 sm:$0xff]  }
 0x1c8   :  { %v2785_v51 = vpack.c.bf16 %v2655_v55, %v2650_v43  ;;  %3532 = vmatpush1.bf16.msra.mxu1 %v6576_v63  ;;  %v8250_v52 = vpack.c.bf16 %v2737_v32, %v2732_v42  ;;  %v2499_v35 = vadd.f32 %v8024_v40, %v2312_v29  ;;  %v2581_v46 = vadd.f32 %v8026_v41, %v2394_v56  ;;  %v1424_v34 = vpop.f32.mrb[27].mxu0  ;;  %v1890_v48 = vpop.f32.mrb[27].mxu1  ;;  %v6584_v63 = vld [vmem:[%s9754_s4 + $0x1b4] ss:$8 sps:$4 sm:$0xff]  }
 0x1c9   :  { %9829 = vst [vmem:[#allocation19_spill] sm:$0xff] %v8243_v28  ;;  %v2317_v33 = vmul.f32 %v8013_v36, %v1422_v53  ;;  %v2399_v50 = vmul.f32 %v8015_v37, %v1888_v24  ;;  %3533 = vmatprep.subr.bf16.mxu1 %v6581_v31  ;;  %v2500_v43 = vadd.f32 %v8029_v44, %v2313_v3  ;;  %v6875_v31 = vld [vmem:[%s9750_s0 + $0xd8] ss:$12 sps:$4 sm:$0xff]  }
 0x1ca   :  { %9830 = vst [vmem:[#allocation20_spill] sm:$0xff] %v8250_v52  ;;  %v2582_v42 = vadd.f32 %v8031_v45, %v2395_v4  ;;  %v2318_v55 = vmul.f32 %v8018_v38, %v1424_v34  ;;  %v2400_v32 = vmul.f32 %v8020_v39, %v1890_v48  ;;  %3402 = vmatprep.mubr.bf16.mxu1 %v2785_v51  ;;  %v6582_v3 = vld [vmem:[%s9754_s4 + $0x1b0] ss:$8 sps:$4 sm:$0xff]   ;;  %v2659_v4 = vmax.f32 %v2499_v35, 0.0 }
 0x1cb   :  { %v2504_v53 = vadd.f32 %v8024_v40, %v2317_v33  ;;  %v2586_v8 = vadd.f32 %v8026_v41, %v2399_v50  ;;  %2008 = vmatmul.mubr.bf16.gmra.mrb[132].mxu0 %v6875_v31  ;;  %3403 = vmatmul.mubr.bf16.gmra.mrb[116].mxu1 %v2784_v25  ;;  %v2741_v24 = vmax.f32 %v2581_v46, 0.0  ;;  %v6587_v25 = vld [vmem:[%s9754_s4 + $0x1c4] ss:$8 sps:$4 sm:$0xff]   ;;  %v2660_v50 = vmax.f32 %v2500_v43, 0.0 }
 0x1cc   :  { %v2505_v29 = vadd.f32 %v8029_v44, %v2318_v55  ;;  %v2587_v56 = vadd.f32 %v8031_v45, %v2400_v32  ;;  %2015 = vmatprep.mubr.bf16.mxu0 %v6876_v47  ;;  %3534 = vmatpush1.bf16.msra.mxu1 %v6579_v5  ;;  %v2742_v34 = vmax.f32 %v2582_v42, 0.0 }
 0x1cd   :  { %v2664_v51 = vmax.f32 %v2504_v53, 0.0  ;;  %v2746_v33 = vmax.f32 %v2586_v8, 0.0  ;;  %3535 = vmatprep.subr.bf16.mxu1 %v6584_v63  ;;  %v1428_v32 = vpop.f32.mrb[28].mxu0  ;;  %v1894_v31 = vpop.f32.mrb[28].mxu1 }
 0x1ce   :  { %v2665_v48 = vmax.f32 %v2505_v29, 0.0  ;;  %v2747_v55 = vmax.f32 %v2587_v56, 0.0  ;;  %v2322_v5 = vmul.f32 %v8013_v36, %v1428_v32  ;;  %v2404_v47 = vmul.f32 %v8015_v37, %v1894_v31  ;;  %v1430_v28 = vpop.f32.mrb[29].mxu0  ;;  %v1896_v35 = vpop.f32.mrb[29].mxu1  ;;  %v6585_v29 = vld [vmem:[%s9754_s4 + $0x1c0] ss:$8 sps:$4 sm:$0xff]  }
 0x1cf   :  { %v2789_v46 = vpack.c.bf16 %v2664_v51, %v2659_v4  ;;  %v8281_v53 = vpack.c.bf16 %v2746_v33, %v2741_v24  ;;  %v2323_v63 = vmul.f32 %v8018_v38, %v1430_v28  ;;  %v2405_v8 = vmul.f32 %v8020_v39, %v1896_v35  ;;  %v1432_v52 = vpop.f32.mrb[30].mxu0  ;;  %v1898_v43 = vpop.f32.mrb[30].mxu1  ;;  %v6878_v35 = vld [vmem:[%s9750_s0 + $0x10c] ss:$12 sps:$4 sm:$0xff]  }
 0x1d0   :  { %v2790_v42 = vpack.c.bf16 %v2665_v48, %v2660_v50  ;;  %3536 = vmatpush1.bf16.msra.mxu1 %v6582_v3  ;;  %v8288_v56 = vpack.c.bf16 %v2747_v55, %v2742_v34  ;;  %v2509_v32 = vadd.f32 %v8024_v40, %v2322_v5  ;;  %v2591_v4 = vadd.f32 %v8026_v41, %v2404_v47  ;;  %v1434_v51 = vpop.f32.mrb[31].mxu0  ;;  %v1900_v33 = vpop.f32.mrb[31].mxu1  ;;  %v6590_v3 = vld [vmem:[%s9754_s4 + $0x1d4] ss:$8 sps:$4 sm:$0xff]  }
 0x1d1   :  { %9831 = vst [vmem:[#allocation21_spill] sm:$0xff] %v8281_v53  ;;  %v2327_v24 = vmul.f32 %v8013_v36, %v1432_v52  ;;  %v2409_v28 = vmul.f32 %v8015_v37, %v1898_v43  ;;  %3537 = vmatprep.subr.bf16.mxu1 %v6587_v25  ;;  %v2510_v50 = vadd.f32 %v8029_v44, %v2323_v63  ;;  %v6877_v25 = vld [vmem:[%s9750_s0 + $0xf0] ss:$12 sps:$4 sm:$0xff]  }
 0x1d2   :  { %9832 = vst [vmem:[#allocation22_spill] sm:$0xff] %v8288_v56  ;;  %v2592_v34 = vadd.f32 %v8031_v45, %v2405_v8  ;;  %v2328_v48 = vmul.f32 %v8018_v38, %v1434_v51  ;;  %v2410_v55 = vmul.f32 %v8020_v39, %v1900_v33  ;;  %3412 = vmatprep.mubr.bf16.mxu1 %v2790_v42  ;;  %v6588_v63 = vld [vmem:[%s9754_s4 + $0x1d0] ss:$8 sps:$4 sm:$0xff]   ;;  %v2669_v8 = vmax.f32 %v2509_v32, 0.0 }
 0x1d3   :  { %v2514_v52 = vadd.f32 %v8024_v40, %v2327_v24  ;;  %v2596_v31 = vadd.f32 %v8026_v41, %v2409_v28  ;;  %2016 = vmatmul.mubr.bf16.gmra.mrb[136].mxu0 %v6877_v25  ;;  %3413 = vmatmul.mubr.bf16.gmra.mrb[120].mxu1 %v2789_v46  ;;  %v2751_v43 = vmax.f32 %v2591_v4, 0.0  ;;  %v6593_v46 = vld [vmem:[%s9754_s4 + $0x1e4] ss:$8 sps:$4 sm:$0xff]   ;;  %v2670_v28 = vmax.f32 %v2510_v50, 0.0  ;;  %v6591_v50 = vld [vmem:[%s9754_s4 + $0x1e0] ss:$8 sps:$4 sm:$0xff]  }
 0x1d4   :  { %v2515_v5 = vadd.f32 %v8029_v44, %v2328_v48  ;;  %v2597_v47 = vadd.f32 %v8031_v45, %v2410_v55  ;;  %2023 = vmatprep.mubr.bf16.mxu0 %v6878_v35  ;;  %3538 = vmatpush1.bf16.msra.mxu1 %v6585_v29  ;;  %v2752_v51 = vmax.f32 %v2592_v34, 0.0 }
 0x1d5   :  { %v2674_v42 = vmax.f32 %v2514_v52, 0.0  ;;  %v2756_v24 = vmax.f32 %v2596_v31, 0.0  ;;  %3539 = vmatprep.subr.bf16.mxu1 %v6590_v3  ;;  %v1438_v55 = vpop.f32.mrb[32].mxu0  ;;  %v8317_v25 = vpop.f32.mrb[64].mxu1 }
 0x1d6   :  { %v2675_v33 = vmax.f32 %v2515_v5, 0.0  ;;  %v2757_v48 = vmax.f32 %v2597_v47, 0.0  ;;  %v2332_v29 = vmul.f32 %v8013_v36, %v1438_v55  ;;  %v1440_v35 = vpop.f32.mrb[33].mxu0  ;;  %v8320_v32 = vpop.f32.mrb[65].mxu1  ;;  %v6594_v55 = vld [vmem:[%s9754_s4 + $0x1f0] ss:$8 sps:$4 sm:$0xff]  }
 0x1d7   :  { %v2794_v53 = vpack.c.bf16 %v2674_v42, %v2669_v8  ;;  %v8322_v4 = vpack.c.bf16 %v2756_v24, %v2751_v43  ;;  %v2333_v3 = vmul.f32 %v8018_v38, %v1440_v35  ;;  %v1442_v52 = vpop.f32.mrb[34].mxu0  ;;  %v8328_v34 = vpop.f32.mrb[66].mxu1  ;;  %v6596_v43 = vld [vmem:[%s9754_s4 + $0x1f4] ss:$8 sps:$4 sm:$0xff]  }
 0x1d8   :  { %v2795_v31 = vpack.c.bf16 %v2675_v33, %v2670_v28  ;;  %3540 = vmatpush1.bf16.msra.mxu1 %v6588_v63  ;;  %v8330_v5 = vpack.c.bf16 %v2757_v48, %v2752_v51  ;;  %v2519_v47 = vadd.f32 %v8024_v40, %v2332_v29  ;;  %v2337_v8 = vmul.f32 %v8013_v36, %v1442_v52  ;;  %v1444_v42 = vpop.f32.mrb[35].mxu0  ;;  %v8337_v24 = vpop.f32.mrb[67].mxu1  ;;  %v6879_v33 = vld [vmem:[%s9750_s0 + $0x108] ss:$12 sps:$4 sm:$0xff]   ;;  %v6880_v48 = vld [vmem:[%s9750_s0 + $0x124] ss:$12 sps:$4 sm:$0xff]  }
 0x1d9   :  { %9833 = vst [vmem:[#allocation23_spill] sm:$0xff] %v8322_v4  ;;  %3541 = vmatprep.subr.bf16.mxu1 %v6593_v46  ;;  %v2520_v63 = vadd.f32 %v8029_v44, %v2333_v3  ;;  %v2338_v28 = vmul.f32 %v8018_v38, %v1444_v42  ;;  %v6599_v3 = vld [vmem:[%s9754_s4 + $0x204] ss:$8 sps:$4 sm:$0xff]  }
 0x1da   :  { %9834 = vst [vmem:[#allocation24_spill] sm:$0xff] %v8330_v5  ;;  %3422 = vmatprep.mubr.bf16.mxu1 %v2795_v31  ;;  %v2524_v51 = vadd.f32 %v8024_v40, %v2337_v8  ;;  %v2679_v29 = vmax.f32 %v2519_v47, 0.0 }
 0x1db   :  { %2024 = vmatmul.mubr.bf16.gmra.mrb[140].mxu0 %v6879_v33  ;;  %3423 = vmatmul.mubr.bf16.gmra.mrb[124].mxu1 %v2794_v53  ;;  %v2525_v46 = vadd.f32 %v8029_v44, %v2338_v28  ;;  %v2680_v53 = vmax.f32 %v2520_v63, 0.0 }
 0x1dc   :  { %2031 = vmatprep.mubr.bf16.mxu0 %v6880_v48  ;;  %3542 = vmatpush1.bf16.msra.mxu1 %v6591_v50  ;;  %v2684_v35 = vmax.f32 %v2524_v51, 0.0 }
 0x1dd   :  { %3543 = vmatprep.subr.bf16.mxu1 %v6596_v43  ;;  %v2685_v52 = vmax.f32 %v2525_v46, 0.0  ;;  %v1448_v31 = vpop.f32.mrb[36].mxu0  ;;  %v8355_v8 = vpop.f32.mrb[68].mxu1 }
 0x1de   :  { %9835 = vst [vmem:[#allocation25_spill] sm:$0xff] %v8355_v8  ;;  %v2342_v42 = vmul.f32 %v8013_v36, %v1448_v31  ;;  %v1450_v28 = vpop.f32.mrb[37].mxu0  ;;  %v2799_v50 = vpack.c.bf16 %v2684_v35, %v2679_v29  ;;  %v8358_v33 = vpop.f32.mrb[69].mxu1 }
 0x1df   :  { %v2343_v48 = vmul.f32 %v8018_v38, %v1450_v28  ;;  %v1452_v47 = vpop.f32.mrb[38].mxu0  ;;  %v2800_v51 = vpack.c.bf16 %v2685_v52, %v2680_v53  ;;  %v8361_v43 = vpop.f32.mrb[70].mxu1 }
 0x1e0   :  { %3544 = vmatpush1.bf16.msra.mxu1 %v6594_v55  ;;  %9836 = vst [vmem:[#allocation26_spill] sm:$0xff] %v8361_v43  ;;  %v2529_v4 = vadd.f32 %v8024_v40, %v2342_v42  ;;  %v2347_v63 = vmul.f32 %v8013_v36, %v1452_v47  ;;  %v1454_v46 = vpop.f32.mrb[39].mxu0  ;;  %v8365_v5 = vpop.f32.mrb[71].mxu1  ;;  %v6881_v55 = vld [vmem:[%s9750_s0 + $0x120] ss:$12 sps:$4 sm:$0xff]  }
 0x1e1   :  { %3706 = vmatprep.subr.bf16.mxu1 %v6599_v3  ;;  %v2530_v31 = vadd.f32 %v8029_v44, %v2343_v48  ;;  %v2348_v29 = vmul.f32 %v8018_v38, %v1454_v46  ;;  %3432 = vmatprep.mubr.bf16.mxu1 %v2800_v51  ;;  %v6882_v3 = vld [vmem:[%s9750_s0 + $0x13c] ss:$12 sps:$4 sm:$0xff]  }
 0x1e2   :  { %v2534_v35 = vadd.f32 %v8024_v40, %v2347_v63  ;;  %v2689_v52 = vmax.f32 %v2529_v4, 0.0 }
 0x1e3   :  { %2032 = vmatmul.mubr.bf16.gmra.mrb[144].mxu0 %v6881_v55  ;;  %3433 = vmatmul.mubr.bf16.gmra.mrb[128].mxu1 %v2799_v50  ;;  %v2535_v53 = vadd.f32 %v8029_v44, %v2348_v29  ;;  %v2690_v28 = vmax.f32 %v2530_v31, 0.0 }
 0x1e4   :  { %2039 = vmatprep.mubr.bf16.mxu0 %v6882_v3  ;;  %v2694_v42 = vmax.f32 %v2534_v35, 0.0 }
 0x1e5   :  { %v2695_v48 = vmax.f32 %v2535_v53, 0.0  ;;  %v1458_v47 = vpop.f32.mrb[40].mxu0  ;;  %v8377_v51 = vpop.f32.mrb[72].mxu1 }
 0x1e6   :  { %9837 = vst [vmem:[#allocation27_spill] sm:$0xff] %v8377_v51  ;;  %v2352_v63 = vmul.f32 %v8013_v36, %v1458_v47  ;;  %v1460_v46 = vpop.f32.mrb[41].mxu0  ;;  %v2804_v56 = vpack.c.bf16 %v2694_v42, %v2689_v52  ;;  %v8380_v55 = vpop.f32.mrb[73].mxu1  ;;  %v6883_v42 = vld [vmem:[%s9750_s0 + $0x138] ss:$12 sps:$4 sm:$0xff]  }
 0x1e7   :  { %9838 = vst [vmem:[#allocation28_spill] sm:$0xff] %v8380_v55  ;;  %v2353_v50 = vmul.f32 %v8018_v38, %v1460_v46  ;;  %v1462_v29 = vpop.f32.mrb[42].mxu0  ;;  %v2805_v43 = vpack.c.bf16 %v2695_v48, %v2690_v28  ;;  %v8383_v8 = vpop.f32.mrb[74].mxu1  ;;  %v6884_v48 = vld [vmem:[%s9750_s0 + $0x154] ss:$12 sps:$4 sm:$0xff]  }
 0x1e8   :  { %9839 = vst [vmem:[#allocation29_spill] sm:$0xff] %v8383_v8  ;;  %v2539_v4 = vadd.f32 %v8024_v40, %v2352_v63  ;;  %v2357_v31 = vmul.f32 %v8013_v36, %v1462_v29  ;;  %v1464_v35 = vpop.f32.mrb[43].mxu0  ;;  %v8387_v53 = vpop.f32.mrb[75].mxu1 }
 0x1e9   :  { %9840 = vst [vmem:[#allocation30_spill] sm:$0xff] %v8387_v53  ;;  %v2540_v3 = vadd.f32 %v8029_v44, %v2353_v50  ;;  %v2358_v47 = vmul.f32 %v8018_v38, %v1464_v35  ;;  %3442 = vmatprep.mubr.bf16.mxu1 %v2805_v43 }
 0x1ea   :  { %v2544_v52 = vadd.f32 %v8024_v40, %v2357_v31  ;;  %v2699_v63 = vmax.f32 %v2539_v4, 0.0 }
 0x1eb   :  { %2040 = vmatmul.mubr.bf16.gmra.mrb[148].mxu0 %v6883_v42  ;;  %3443 = vmatmul.mubr.bf16.gmra.mrb[132].mxu1 %v2804_v56  ;;  %v2545_v28 = vadd.f32 %v8029_v44, %v2358_v47  ;;  %v2700_v50 = vmax.f32 %v2540_v3, 0.0 }
 0x1ec   :  { %2047 = vmatprep.mubr.bf16.mxu0 %v6884_v48  ;;  %v2704_v46 = vmax.f32 %v2544_v52, 0.0 }
 0x1ed   :  { %v2705_v29 = vmax.f32 %v2545_v28, 0.0  ;;  %v1468_v43 = vpop.f32.mrb[44].mxu0  ;;  %v8399_v35 = vpop.f32.mrb[76].mxu1 }
 0x1ee   :  { %9841 = vst [vmem:[#allocation31_spill] sm:$0xff] %v8399_v35  ;;  %v2362_v31 = vmul.f32 %v8013_v36, %v1468_v43  ;;  %v1470_v8 = vpop.f32.mrb[45].mxu0  ;;  %v2809_v51 = vpack.c.bf16 %v2704_v46, %v2699_v63  ;;  %v8402_v42 = vpop.f32.mrb[77].mxu1 }
 0x1ef   :  { %9842 = vst [vmem:[#allocation32_spill] sm:$0xff] %v8402_v42  ;;  %v2363_v56 = vmul.f32 %v8018_v38, %v1470_v8  ;;  %v1472_v47 = vpop.f32.mrb[46].mxu0  ;;  %v2810_v53 = vpack.c.bf16 %v2705_v29, %v2700_v50  ;;  %v8405_v55 = vpop.f32.mrb[78].mxu1  ;;  %v6885_v8 = vld [vmem:[%s9750_s0 + $0x150] ss:$12 sps:$4 sm:$0xff]  }
 0x1f0   :  { %9843 = vst [vmem:[#allocation33_spill] sm:$0xff] %v8405_v55  ;;  %v2549_v4 = vadd.f32 %v8024_v40, %v2362_v31  ;;  %v2367_v3 = vmul.f32 %v8013_v36, %v1472_v47  ;;  %v1474_v52 = vpop.f32.mrb[47].mxu0  ;;  %v8409_v28 = vpop.f32.mrb[79].mxu1  ;;  %v6886_v50 = vld [vmem:[%s9750_s0 + $0x16c] ss:$12 sps:$4 sm:$0xff]  }
 0x1f1   :  { %9844 = vst [vmem:[#allocation34_spill] sm:$0xff] %v8409_v28  ;;  %v2550_v48 = vadd.f32 %v8029_v44, %v2363_v56  ;;  %v2368_v43 = vmul.f32 %v8018_v38, %v1474_v52  ;;  %3452 = vmatprep.mubr.bf16.mxu1 %v2810_v53 }
 0x1f2   :  { %v2554_v63 = vadd.f32 %v8024_v40, %v2367_v3  ;;  %v2709_v29 = vmax.f32 %v2549_v4, 0.0 }
 0x1f3   :  { %2048 = vmatmul.mubr.bf16.gmra.mrb[152].mxu0 %v6885_v8  ;;  %3453 = vmatmul.mubr.bf16.gmra.mrb[136].mxu1 %v2809_v51  ;;  %v2555_v46 = vadd.f32 %v8029_v44, %v2368_v43  ;;  %v2710_v56 = vmax.f32 %v2550_v48, 0.0 }
 0x1f4   :  { %2055 = vmatprep.mubr.bf16.mxu0 %v6886_v50  ;;  %v2714_v31 = vmax.f32 %v2554_v63, 0.0 }
 0x1f5   :  { %v2715_v47 = vmax.f32 %v2555_v46, 0.0  ;;  %v1478_v53 = vpop.f32.mrb[48].mxu0  ;;  %v8421_v52 = vpop.f32.mrb[80].mxu1 }
 0x1f6   :  { %9845 = vst [vmem:[#allocation35_spill] sm:$0xff] %v8421_v52  ;;  %v2372_v3 = vmul.f32 %v8013_v36, %v1478_v53  ;;  %v1480_v55 = vpop.f32.mrb[49].mxu0  ;;  %v2814_v35 = vpack.c.bf16 %v2714_v31, %v2709_v29  ;;  %v8424_v8 = vpop.f32.mrb[81].mxu1 }
 0x1f7   :  { %9846 = vst [vmem:[#allocation36_spill] sm:$0xff] %v8424_v8  ;;  %v2373_v51 = vmul.f32 %v8018_v38, %v1480_v55  ;;  %v1482_v43 = vpop.f32.mrb[50].mxu0  ;;  %v2815_v28 = vpack.c.bf16 %v2715_v47, %v2710_v56  ;;  %v8427_v42 = vpop.f32.mrb[82].mxu1  ;;  %v6887_v55 = vld [vmem:[%s9750_s0 + $0x168] ss:$12 sps:$4 sm:$0xff]  }
 0x1f8   :  { %9847 = vst [vmem:[#allocation37_spill] sm:$0xff] %v8427_v42  ;;  %v2559_v4 = vadd.f32 %v8024_v40, %v2372_v3  ;;  %v2377_v48 = vmul.f32 %v8013_v36, %v1482_v43  ;;  %v1484_v63 = vpop.f32.mrb[51].mxu0  ;;  %v8431_v46 = vpop.f32.mrb[83].mxu1 }
 0x1f9   :  { %9848 = vst [vmem:[#allocation38_spill] sm:$0xff] %v8431_v46  ;;  %v2560_v50 = vadd.f32 %v8029_v44, %v2373_v51  ;;  %v2378_v53 = vmul.f32 %v8018_v38, %v1484_v63  ;;  %3462 = vmatprep.mubr.bf16.mxu1 %v2815_v28 }
 0x1fa   :  { %v2564_v29 = vadd.f32 %v8024_v40, %v2377_v48  ;;  %v2719_v56 = vmax.f32 %v2559_v4, 0.0 }
 0x1fb   :  { %2056 = vmatmul.mubr.bf16.gmra.mrb[156].mxu0 %v6887_v55  ;;  %3463 = vmatmul.mubr.bf16.gmra.mrb[140].mxu1 %v2814_v35  ;;  %v2565_v31 = vadd.f32 %v8029_v44, %v2378_v53  ;;  %v2720_v3 = vmax.f32 %v2560_v50, 0.0 }
 0x1fc   :  { %v2724_v47 = vmax.f32 %v2564_v29, 0.0 }
 0x1fd   :  { %v2725_v43 = vmax.f32 %v2565_v31, 0.0  ;;  %v1488_v42 = vpop.f32.mrb[52].mxu0  ;;  %v8440_v52 = vpop.f32.mrb[84].mxu1 }
 0x1fe   :  { %9849 = vst [vmem:[#allocation39_spill] sm:$0xff] %v8440_v52  ;;  %v2382_v51 = vmul.f32 %v8013_v36, %v1488_v42  ;;  %v1490_v28 = vpop.f32.mrb[53].mxu0  ;;  %v2819_v63 = vpack.c.bf16 %v2724_v47, %v2719_v56  ;;  %v8443_v48 = vpop.f32.mrb[85].mxu1 }
 0x1ff   :  { %9850 = vst [vmem:[#allocation40_spill] sm:$0xff] %v8443_v48  ;;  %v2383_v46 = vmul.f32 %v8018_v38, %v1490_v28  ;;  %v1492_v8 = vpop.f32.mrb[54].mxu0  ;;  %v2820_v55 = vpack.c.bf16 %v2725_v43, %v2720_v3  ;;  %v8446_v35 = vpop.f32.mrb[86].mxu1 }
 0x200   :  { %9851 = vst [vmem:[#allocation41_spill] sm:$0xff] %v8446_v35  ;;  %v2569_v4 = vadd.f32 %v8024_v40, %v2382_v51  ;;  %v2387_v50 = vmul.f32 %v8013_v36, %v1492_v8  ;;  %v1494_v53 = vpop.f32.mrb[55].mxu0  ;;  %v8450_v29 = vpop.f32.mrb[87].mxu1 }
 0x201   :  { %9852 = vst [vmem:[#allocation42_spill] sm:$0xff] %v8450_v29  ;;  %v2570_v31 = vadd.f32 %v8029_v44, %v2383_v46  ;;  %v2388_v42 = vmul.f32 %v8018_v38, %v1494_v53  ;;  %3472 = vmatprep.mubr.bf16.mxu1 %v2820_v55 }
 0x202   :  { %v2574_v56 = vadd.f32 %v8024_v40, %v2387_v50  ;;  %v2729_v3 = vmax.f32 %v2569_v4, 0.0 }
 0x203   :  { %3473 = vmatmul.mubr.bf16.gmra.mrb[144].mxu1 %v2819_v63  ;;  %v2575_v47 = vadd.f32 %v8029_v44, %v2388_v42  ;;  %v2730_v28 = vmax.f32 %v2570_v31, 0.0 }
 0x204   :  { %v2734_v43 = vmax.f32 %v2574_v56, 0.0 }
 0x205   :  { %v2735_v35 = vmax.f32 %v2575_v47, 0.0  ;;  %v1498_v51 = vpop.f32.mrb[56].mxu0  ;;  %v8456_v52 = vpop.f32.mrb[88].mxu1 }
 0x206   :  { %9853 = vst [vmem:[#allocation43_spill] sm:$0xff] %v8456_v52  ;;  %v2392_v8 = vmul.f32 %v8013_v36, %v1498_v51  ;;  %v1500_v29 = vpop.f32.mrb[57].mxu0  ;;  %v2824_v48 = vpack.c.bf16 %v2734_v43, %v2729_v3  ;;  %v8459_v46 = vpop.f32.mrb[89].mxu1 }
 0x207   :  { %9854 = vst [vmem:[#allocation44_spill] sm:$0xff] %v8459_v46  ;;  %v2393_v55 = vmul.f32 %v8018_v38, %v1500_v29  ;;  %v1502_v53 = vpop.f32.mrb[58].mxu0  ;;  %v2825_v50 = vpack.c.bf16 %v2735_v35, %v2730_v28  ;;  %v8462_v63 = vpop.f32.mrb[90].mxu1 }
 0x208   :  { %9855 = vst [vmem:[#allocation45_spill] sm:$0xff] %v8462_v63  ;;  %v2579_v4 = vadd.f32 %v8024_v40, %v2392_v8  ;;  %v2397_v31 = vmul.f32 %v8013_v36, %v1502_v53  ;;  %v1504_v42 = vpop.f32.mrb[59].mxu0  ;;  %v8466_v56 = vpop.f32.mrb[91].mxu1 }
 0x209   :  { %9856 = vst [vmem:[#allocation46_spill] sm:$0xff] %v8466_v56  ;;  %v2580_v47 = vadd.f32 %v8029_v44, %v2393_v55  ;;  %v2398_v51 = vmul.f32 %v8018_v38, %v1504_v42  ;;  %3482 = vmatprep.mubr.bf16.mxu1 %v2825_v50 }
 0x20a   :  { %v2584_v3 = vadd.f32 %v8024_v40, %v2397_v31  ;;  %v2739_v35 = vmax.f32 %v2579_v4, 0.0 }
 0x20b   :  { %3483 = vmatmul.mubr.bf16.gmra.mrb[148].mxu1 %v2824_v48  ;;  %v2585_v29 = vadd.f32 %v8029_v44, %v2398_v51  ;;  %v2740_v28 = vmax.f32 %v2580_v47, 0.0 }
 0x20c   :  { %v2744_v43 = vmax.f32 %v2584_v3, 0.0 }
 0x20d   :  { %v2745_v63 = vmax.f32 %v2585_v29, 0.0  ;;  %v1508_v8 = vpop.f32.mrb[60].mxu0  ;;  %v8472_v52 = vpop.f32.mrb[92].mxu1 }
 0x20e   :  { %9857 = vst [vmem:[#allocation47_spill] sm:$0xff] %v8472_v52  ;;  %v2402_v53 = vmul.f32 %v8013_v36, %v1508_v8  ;;  %v1510_v56 = vpop.f32.mrb[61].mxu0  ;;  %v2829_v46 = vpack.c.bf16 %v2744_v43, %v2739_v35  ;;  %v8475_v55 = vpop.f32.mrb[93].mxu1 }
 0x20f   :  { %9858 = vst [vmem:[#allocation48_spill] sm:$0xff] %v8475_v55  ;;  %v2403_v50 = vmul.f32 %v8018_v38, %v1510_v56  ;;  %v1512_v42 = vpop.f32.mrb[62].mxu0  ;;  %v2830_v31 = vpack.c.bf16 %v2745_v63, %v2740_v28  ;;  %v8478_v48 = vpop.f32.mrb[94].mxu1 }
 0x210   :  { %9859 = vst [vmem:[#allocation49_spill] sm:$0xff] %v8478_v48  ;;  %v2589_v4 = vadd.f32 %v8024_v40, %v2402_v53  ;;  %v2407_v47 = vmul.f32 %v8013_v36, %v1512_v42  ;;  %v1514_v51 = vpop.f32.mrb[63].mxu0  ;;  %v8482_v3 = vpop.f32.mrb[95].mxu1 }
 0x211   :  { %9860 = vst [vmem:[#allocation50_spill] sm:$0xff] %v8482_v3  ;;  %v2590_v29 = vadd.f32 %v8029_v44, %v2403_v50  ;;  %v2408_v8 = vmul.f32 %v8018_v38, %v1514_v51  ;;  %3492 = vmatprep.mubr.bf16.mxu1 %v2830_v31 }
 0x212   :  { %v2594_v35 = vadd.f32 %v8024_v40, %v2407_v47  ;;  %v2749_v63 = vmax.f32 %v2589_v4, 0.0 }
 0x213   :  { %3493 = vmatmul.mubr.bf16.gmra.mrb[152].mxu1 %v2829_v46  ;;  %v2595_v56 = vadd.f32 %v8029_v44, %v2408_v8  ;;  %v2750_v28 = vmax.f32 %v2590_v29, 0.0 }
 0x214   :  { %v2754_v43 = vmax.f32 %v2594_v35, 0.0 }
 0x215   :  { %v2755_v48 = vmax.f32 %v2595_v56, 0.0  ;;  %v1551_v53 = vpop.f32.mrb[64].mxu0 }
 0x216   :  { %v1745_v36 = vadd.f32 %v7897_v58, %v1551_v53  ;;  %v1553_v42 = vpop.f32.mrb[65].mxu0  ;;  %v2834_v52 = vpack.c.bf16 %v2754_v43, %v2749_v63 }
 0x217   :  { %v1747_v3 = vadd.f32 %v7899_v60, %v1553_v42  ;;  %v1555_v50 = vpop.f32.mrb[66].mxu0  ;;  %v2835_v55 = vpack.c.bf16 %v2755_v48, %v2750_v28 }
 0x218   :  { %v2254_v38 = vmul.f32 %v8015_v37, %v1745_v36  ;;  %v1749_v40 = vadd.f32 %v7901_v61, %v1555_v50  ;;  %v1557_v46 = vpop.f32.mrb[67].mxu0 }
 0x219   :  { %v2255_v44 = vmul.f32 %v8020_v39, %v1747_v3  ;;  %v1751_v31 = vadd.f32 %v7906_v2, %v1557_v46  ;;  %3502 = vmatprep.mubr.bf16.mxu1 %v2835_v55 }
 0x21a   :  { %v2441_v4 = vadd.f32 %v8026_v41, %v2254_v38  ;;  %v2259_v58 = vmul.f32 %v8015_v37, %v1749_v40  ;;  %v6602_v40 = vld [vmem:[%s9754_s4 + $0x214] ss:$8 sps:$4 sm:$0xff]  }
 0x21b   :  { %3503 = vmatmul.mubr.bf16.gmra.mrb[156].mxu1 %v2834_v52  ;;  %v2442_v47 = vadd.f32 %v8031_v45, %v2255_v44  ;;  %v2260_v60 = vmul.f32 %v8020_v39, %v1751_v31 }
 0x21c   :  { %v2446_v48 = vadd.f32 %v8026_v41, %v2259_v58  ;;  %v2601_v29 = vmax.f32 %v2441_v4, 0.0  ;;  %v6600_v4 = vld [vmem:[%s9754_s4 + $0x210] ss:$8 sps:$4 sm:$0xff]  }
 0x21d   :  { %v2447_v51 = vadd.f32 %v8031_v45, %v2260_v60  ;;  %v1561_v61 = vpop.f32.mrb[68].mxu0  ;;  %v2602_v55 = vmax.f32 %v2442_v47, 0.0 }
 0x21e   :  { %v2606_v8 = vmax.f32 %v2446_v48, 0.0  ;;  %v1755_v3 = vadd.f32 %v7926_v11, %v1561_v61  ;;  %v1563_v2 = vpop.f32.mrb[69].mxu0  ;;  %v6597_v11 = vld [vmem:[%s9754_s4 + $0x200] ss:$8 sps:$4 sm:$0xff]  }
 0x21f   :  { %v2607_v35 = vmax.f32 %v2447_v51, 0.0  ;;  %v1757_v56 = vadd.f32 %v7928_v6, %v1563_v2  ;;  %v1565_v63 = vpop.f32.mrb[70].mxu0  ;;  %v6605_v51 = vld [vmem:[%s9754_s4 + $0x224] ss:$8 sps:$4 sm:$0xff]  }
 0x220   :  { %v2761_v52 = vpack.c.bf16 %v2606_v8, %v2601_v29  ;;  %v2264_v43 = vmul.f32 %v8015_v37, %v1755_v3  ;;  %v1759_v28 = vadd.f32 %v7930_v7, %v1565_v63  ;;  %v1567_v53 = vpop.f32.mrb[71].mxu0 }
 0x221   :  { %v2265_v36 = vmul.f32 %v8020_v39, %v1757_v56  ;;  %v1761_v42 = vadd.f32 %v7932_v14, %v1567_v53  ;;  %v2762_v50 = vpack.c.bf16 %v2607_v35, %v2602_v55 }
 0x222   :  { %v2451_v38 = vadd.f32 %v8026_v41, %v2264_v43  ;;  %v2269_v6 = vmul.f32 %v8015_v37, %v1759_v28  ;;  %v6603_v43 = vld [vmem:[%s9754_s4 + $0x220] ss:$8 sps:$4 sm:$0xff]  }
 0x223   :  { %v2452_v7 = vadd.f32 %v8031_v45, %v2265_v36  ;;  %v2270_v46 = vmul.f32 %v8020_v39, %v1761_v42  ;;  %3545 = vmatprep.mubr.bf16.mxu1 %v2762_v50 }
 0x224   :  { %v2456_v14 = vadd.f32 %v8026_v41, %v2269_v6  ;;  %3546 = vmatmul.mubr.bf16.vlgmr.msra.gmra.mrb[96].mxu1 %v2761_v52  ;;  %v2611_v58 = vmax.f32 %v2451_v38, 0.0 }
 0x225   :  { %v2457_v44 = vadd.f32 %v8031_v45, %v2270_v46  ;;  %v1571_v31 = vpop.f32.mrb[72].mxu0  ;;  %3707 = vmatpush1.bf16.msra.mxu1 %v6597_v11  ;;  %v2612_v61 = vmax.f32 %v2452_v7, 0.0  ;;  %v6606_v11 = vld [vmem:[%s9754_s4 + $0x230] ss:$8 sps:$4 sm:$0xff]  }
 0x226   :  { %v2616_v47 = vmax.f32 %v2456_v14, 0.0  ;;  %v1765_v60 = vadd.f32 %v7936_v17, %v1571_v31  ;;  %v1573_v48 = vpop.f32.mrb[73].mxu0  ;;  %3708 = vmatprep.subr.bf16.mxu1 %v6602_v40 }
 0x227   :  { %v2617_v29 = vmax.f32 %v2457_v44, 0.0  ;;  %v1767_v8 = vadd.f32 %v7938_v9, %v1573_v48  ;;  %v1575_v3 = vpop.f32.mrb[74].mxu0 }
 0x228   :  { %v2274_v2 = vmul.f32 %v8015_v37, %v1765_v60  ;;  %v1769_v55 = vadd.f32 %v7940_v10, %v1575_v3  ;;  %v1577_v35 = vpop.f32.mrb[75].mxu0  ;;  %v2766_v56 = vpack.c.bf16 %v2616_v47, %v2611_v58  ;;  %v6608_v10 = vld [vmem:[%s9754_s4 + $0x234] ss:$8 sps:$4 sm:$0xff]  }
 0x229   :  { %v2275_v63 = vmul.f32 %v8020_v39, %v1767_v8  ;;  %v1771_v17 = vadd.f32 %v7942_v18, %v1577_v35  ;;  %v2767_v52 = vpack.c.bf16 %v2617_v29, %v2612_v61  ;;  %3709 = vmatpush1.bf16.msra.mxu1 %v6600_v4 }
 0x22a   :  { %v2461_v28 = vadd.f32 %v8026_v41, %v2274_v2  ;;  %v2279_v9 = vmul.f32 %v8015_v37, %v1769_v55  ;;  %3710 = vmatprep.subr.bf16.mxu1 %v6605_v51 }
 0x22b   :  { %v2462_v53 = vadd.f32 %v8031_v45, %v2275_v63  ;;  %v2280_v36 = vmul.f32 %v8020_v39, %v1771_v17  ;;  %3555 = vmatprep.mubr.bf16.mxu1 %v2767_v52 }
 0x22c   :  { %v2466_v18 = vadd.f32 %v8026_v41, %v2279_v9  ;;  %3556 = vmatmul.mubr.bf16.gmra.mrb[100].mxu1 %v2766_v56  ;;  %v2621_v38 = vmax.f32 %v2461_v28, 0.0 }
 0x22d   :  { %v2467_v42 = vadd.f32 %v8031_v45, %v2280_v36  ;;  %v1581_v50 = vpop.f32.mrb[76].mxu0  ;;  %3711 = vmatpush1.bf16.msra.mxu1 %v6603_v43  ;;  %v2622_v46 = vmax.f32 %v2462_v53, 0.0 }
 0x22e   :  { %v2626_v6 = vmax.f32 %v2466_v18, 0.0  ;;  %v1775_v40 = vadd.f32 %v7946_v19, %v1581_v50  ;;  %v1583_v7 = vpop.f32.mrb[77].mxu0  ;;  %3712 = vmatprep.subr.bf16.mxu1 %v6608_v10 }
 0x22f   :  { %v2627_v14 = vmax.f32 %v2467_v42, 0.0  ;;  %v1777_v44 = vadd.f32 %v7948_v12, %v1583_v7  ;;  %v1585_v31 = vpop.f32.mrb[78].mxu0 }
 0x230   :  { %v2284_v4 = vmul.f32 %v8015_v37, %v1775_v40  ;;  %v1779_v58 = vadd.f32 %v7950_v13, %v1585_v31  ;;  %v1587_v47 = vpop.f32.mrb[79].mxu0  ;;  %v2771_v60 = vpack.c.bf16 %v2626_v6, %v2621_v38 }
 0x231   :  { %v2285_v48 = vmul.f32 %v8020_v39, %v1777_v44  ;;  %v1781_v51 = vadd.f32 %v7952_v49, %v1587_v47  ;;  %v2772_v61 = vpack.c.bf16 %v2627_v14, %v2622_v46  ;;  %3713 = vmatpush1.bf16.msra.mxu1 %v6606_v11 }
 0x232   :  { %v2471_v19 = vadd.f32 %v8026_v41, %v2284_v4  ;;  %v2289_v29 = vmul.f32 %v8015_v37, %v1779_v58 }
 0x233   :  { %v2472_v8 = vadd.f32 %v8031_v45, %v2285_v48  ;;  %v2290_v12 = vmul.f32 %v8020_v39, %v1781_v51  ;;  %3565 = vmatprep.mubr.bf16.mxu1 %v2772_v61 }
 0x234   :  { %v2476_v3 = vadd.f32 %v8026_v41, %v2289_v29  ;;  %3566 = vmatmul.mubr.bf16.gmra.mrb[104].mxu1 %v2771_v60  ;;  %v2631_v55 = vmax.f32 %v2471_v19, 0.0 }
 0x235   :  { %v2477_v13 = vadd.f32 %v8031_v45, %v2290_v12  ;;  %v1591_v2 = vpop.f32.mrb[80].mxu0  ;;  %v2632_v63 = vmax.f32 %v2472_v8, 0.0 }
 0x236   :  { %v2636_v35 = vmax.f32 %v2476_v3, 0.0  ;;  %v1785_v49 = vadd.f32 %v7956_v54, %v1591_v2  ;;  %v1593_v56 = vpop.f32.mrb[81].mxu0 }
 0x237   :  { %v2637_v17 = vmax.f32 %v2477_v13, 0.0  ;;  %v1787_v52 = vadd.f32 %v7958_v21, %v1593_v56  ;;  %v1595_v43 = vpop.f32.mrb[82].mxu0 }
 0x238   :  { %v2294_v28 = vmul.f32 %v8015_v37, %v1785_v49  ;;  %v1789_v9 = vadd.f32 %v7960_v22, %v1595_v43  ;;  %v1597_v10 = vpop.f32.mrb[83].mxu0  ;;  %v2776_v53 = vpack.c.bf16 %v2636_v35, %v2631_v55 }
 0x239   :  { %v2295_v36 = vmul.f32 %v8020_v39, %v1787_v52  ;;  %v1791_v18 = vadd.f32 %v7962_v57, %v1597_v10  ;;  %v2777_v42 = vpack.c.bf16 %v2637_v17, %v2632_v63 }
 0x23a   :  { %v2481_v50 = vadd.f32 %v8026_v41, %v2294_v28  ;;  %v2299_v54 = vmul.f32 %v8015_v37, %v1789_v9 }
 0x23b   :  { %v2482_v11 = vadd.f32 %v8031_v45, %v2295_v36  ;;  %v2300_v21 = vmul.f32 %v8020_v39, %v1791_v18  ;;  %3575 = vmatprep.mubr.bf16.mxu1 %v2777_v42 }
 0x23c   :  { %v2486_v38 = vadd.f32 %v8026_v41, %v2299_v54  ;;  %3576 = vmatmul.mubr.bf16.gmra.mrb[108].mxu1 %v2776_v53  ;;  %v2641_v40 = vmax.f32 %v2481_v50, 0.0 }
 0x23d   :  { %v2487_v22 = vadd.f32 %v8031_v45, %v2300_v21  ;;  %v1601_v6 = vpop.f32.mrb[84].mxu0  ;;  %v2642_v14 = vmax.f32 %v2482_v11, 0.0 }
 0x23e   :  { %v2646_v7 = vmax.f32 %v2486_v38, 0.0  ;;  %v1795_v57 = vadd.f32 %v7966_v59, %v1601_v6  ;;  %v1603_v46 = vpop.f32.mrb[85].mxu0 }
 0x23f   :  { %v2647_v44 = vmax.f32 %v2487_v22, 0.0  ;;  %v1797_v31 = vadd.f32 %v7968_v15, %v1603_v46  ;;  %v1605_v4 = vpop.f32.mrb[86].mxu0 }
 0x240   :  { %v2304_v58 = vmul.f32 %v8015_v37, %v1795_v57  ;;  %v1799_v47 = vadd.f32 %v7970_v16, %v1605_v4  ;;  %v1607_v60 = vpop.f32.mrb[87].mxu0  ;;  %v2781_v48 = vpack.c.bf16 %v2646_v7, %v2641_v40 }
 0x241   :  { %v2305_v51 = vmul.f32 %v8020_v39, %v1797_v31  ;;  %v1801_v61 = vadd.f32 %v7972_v1, %v1607_v60  ;;  %v2782_v19 = vpack.c.bf16 %v2647_v44, %v2642_v14  ;;  %v9861_v31 = vld [vmem:[#allocation8_spill] sm:$0xff] }
 0x242   :  { %v2491_v29 = vadd.f32 %v8026_v41, %v2304_v58  ;;  %v2309_v59 = vmul.f32 %v8015_v37, %v1799_v47 }
 0x243   :  { %v2492_v8 = vadd.f32 %v8031_v45, %v2305_v51  ;;  %v2310_v15 = vmul.f32 %v8020_v39, %v1801_v61  ;;  %3585 = vmatprep.mubr.bf16.mxu1 %v2782_v19 }
 0x244   :  { %v2496_v12 = vadd.f32 %v8026_v41, %v2309_v59  ;;  %3586 = vmatmul.mubr.bf16.gmra.mrb[112].mxu1 %v2781_v48  ;;  %v2651_v13 = vmax.f32 %v2491_v29, 0.0  ;;  %v9862_v48 = vld [vmem:[#allocation5_spill] sm:$0xff] }
 0x245   :  { %v2497_v16 = vadd.f32 %v8031_v45, %v2310_v15  ;;  %v1611_v3 = vpop.f32.mrb[88].mxu0  ;;  %v2652_v35 = vmax.f32 %v2492_v8, 0.0  ;;  %v2245_v51 = vsub.s32 4, %v9862_v48 }
 0x246   :  { %v2656_v2 = vmax.f32 %v2496_v12, 0.0  ;;  %v1805_v1 = vadd.f32 %v7976_v62, %v1611_v3  ;;  %v1613_v55 = vpop.f32.mrb[89].mxu0 }
 0x247   :  { %v2657_v49 = vmax.f32 %v2497_v16, 0.0  ;;  %v1807_v56 = vadd.f32 %v7978_v23, %v1613_v55  ;;  %v1615_v63 = vpop.f32.mrb[90].mxu0 }
 0x248   :  { %v2314_v17 = vmul.f32 %v8015_v37, %v1805_v1  ;;  %v1809_v52 = vadd.f32 %v7980_v0, %v1615_v63  ;;  %v1617_v43 = vpop.f32.mrb[91].mxu0  ;;  %v2786_v28 = vpack.c.bf16 %v2656_v2, %v2651_v13 }
 0x249   :  { %v2315_v9 = vmul.f32 %v8020_v39, %v1807_v56  ;;  %v1811_v10 = vadd.f32 %v7982_v20, %v1617_v43  ;;  %v2787_v53 = vpack.c.bf16 %v2657_v49, %v2652_v35 }
 0x24a   :  { %v2501_v36 = vadd.f32 %v8026_v41, %v2314_v17  ;;  %v2319_v62 = vmul.f32 %v8015_v37, %v1809_v52 }
 0x24b   :  { %v2502_v18 = vadd.f32 %v8031_v45, %v2315_v9  ;;  %v2320_v23 = vmul.f32 %v8020_v39, %v1811_v10  ;;  %3595 = vmatprep.mubr.bf16.mxu1 %v2787_v53 }
 0x24c   :  { %v2506_v42 = vadd.f32 %v8026_v41, %v2319_v62  ;;  %3596 = vmatmul.mubr.bf16.gmra.mrb[116].mxu1 %v2786_v28  ;;  %v2661_v54 = vmax.f32 %v2501_v36, 0.0 }
 0x24d   :  { %v2507_v0 = vadd.f32 %v8031_v45, %v2320_v23  ;;  %v1621_v50 = vpop.f32.mrb[92].mxu0  ;;  %v2662_v38 = vmax.f32 %v2502_v18, 0.0 }
 0x24e   :  { %v2666_v11 = vmax.f32 %v2506_v42, 0.0  ;;  %v1815_v20 = vadd.f32 %v7989_v26, %v1621_v50  ;;  %v1623_v21 = vpop.f32.mrb[93].mxu0  ;;  %v9864_v50 = vld [vmem:[#allocation9_spill] sm:$0xff] }
 0x24f   :  { %v2667_v22 = vmax.f32 %v2507_v0, 0.0  ;;  %v1817_v6 = vadd.f32 %v7991_v27, %v1623_v21  ;;  %v1625_v40 = vpop.f32.mrb[94].mxu0  ;;  %v9865_v21 = vld [vmem:[#allocation12_spill] sm:$0xff] }
 0x250   :  { %v2324_v7 = vmul.f32 %v8015_v37, %v1815_v20  ;;  %v1819_v57 = vadd.f32 %v7997_v30, %v1625_v40  ;;  %v1627_v46 = vpop.f32.mrb[95].mxu0  ;;  %v2791_v14 = vpack.c.bf16 %v2666_v11, %v2661_v54 }
 0x251   :  { %v2325_v44 = vmul.f32 %v8020_v39, %v1817_v6  ;;  %v1821_v4 = vadd.f32 %v9861_v31, %v1627_v46  ;;  %v2792_v58 = vpack.c.bf16 %v2667_v22, %v2662_v38 }
 0x252   :  { %v2511_v47 = vadd.f32 %v8026_v41, %v2324_v7  ;;  %v2329_v26 = vmul.f32 %v8015_v37, %v1819_v57  ;;  %v6888_v37 = vld [vmem:[%s9752_s2] sm:$0x1f] }
 0x253   :  { %v2512_v60 = vadd.f32 %v8031_v45, %v2325_v44  ;;  %v2330_v27 = vmul.f32 %v8020_v39, %v1821_v4  ;;  %3605 = vmatprep.mubr.bf16.mxu1 %v2792_v58  ;;  %v8609_v39 = vrot.slane %v6888_v37, %v2245_v51  ;;  %v9866_v4 = vld [vmem:[#allocation11_spill] sm:$0xff]  ;;  %v9870_v37 = vld [vmem:[#allocation13_spill] sm:$0xff] }
 0x254   :  { %v2516_v30 = vadd.f32 %v8026_v41, %v2329_v26  ;;  %3606 = vmatmul.mubr.bf16.gmra.mrb[120].mxu1 %v2791_v14  ;;  %v2671_v29 = vmax.f32 %v2511_v47, 0.0 }
 0x255   :  { %v2517_v61 = vadd.f32 %v8031_v45, %v2330_v27  ;;  %v5625_v19 = vpop.f32.mrb[96].mxu0  ;;  %v2672_v15 = vmax.f32 %v2512_v60, 0.0  ;;  %v6889_v45 = vld [vmem:[%s9753_s3] sm:$0x1f]  ;;  %v9867_v60 = vld [vmem:[#allocation14_spill] sm:$0xff] }
 0x256   :  { %v2676_v59 = vmax.f32 %v2516_v30, 0.0  ;;  %v5626_v8 = vpop.f32.mrb[97].mxu0  ;;  %v8615_v1 = vrot.slane %v6889_v45, %v2245_v51 }
 0x257   :  { %v2677_v12 = vmax.f32 %v2517_v61, 0.0  ;;  %v5627_v16 = vadd.f32 %v5626_v8, %v5625_v19  ;;  %v5628_v3 = vpop.f32.mrb[98].mxu0 }
 0x258   :  { %v5629_v13 = vpop.f32.mrb[99].mxu0  ;;  %v2796_v2 = vpack.c.bf16 %v2676_v59, %v2671_v29 }
 0x259   :  { %v2099_v41 = vadd.f32 %v5627_v16, %v8320_v32  ;;  %v5630_v55 = vadd.f32 %v5629_v13, %v5628_v3  ;;  %v2797_v35 = vpack.c.bf16 %v2677_v12, %v2672_v15  ;;  %v9863_v32 = vld [vmem:[#allocation10_spill] sm:$0xff] }
 0x25a   :  { %v9869_v15 = vld [vmem:[#allocation26_spill] sm:$0xff] }
 0x25b   :  { %v2256_v49 = vmul.f32 %v8609_v39, %v2099_v41  ;;  %v2102_v56 = vadd.f32 %v5630_v55, %v8337_v24  ;;  %3615 = vmatprep.mubr.bf16.mxu1 %v2797_v35  ;;  %v9871_v41 = vld [vmem:[#allocation16_spill] sm:$0xff] }
 0x25c   :  { %3616 = vmatmul.mubr.bf16.gmra.mrb[124].mxu1 %v2796_v2 }
 0x25d   :  { %v2443_v63 = vadd.f32 %v8615_v1, %v2256_v49  ;;  %v2261_v17 = vmul.f32 %v8609_v39, %v2102_v56  ;;  %v5631_v52 = vpop.f32.mrb[100].mxu0  ;;  %3625 = vmatprep.mubr.bf16.mxu1 %v9863_v32 }
 0x25e   :  { %v5632_v43 = vpop.f32.mrb[101].mxu0 }
 0x25f   :  { %v2448_v28 = vadd.f32 %v8615_v1, %v2261_v17  ;;  %v5633_v9 = vadd.f32 %v5632_v43, %v5631_v52  ;;  %v5634_v10 = vpop.f32.mrb[102].mxu0  ;;  %v2603_v36 = vmax.f32 %v2443_v63, 0.0  ;;  %v9872_v52 = vld [vmem:[#allocation28_spill] sm:$0xff] }
 0x260   :  { %v5635_v53 = vpop.f32.mrb[103].mxu0 }
 0x261   :  { %v2608_v62 = vmax.f32 %v2448_v28, 0.0  ;;  %v2107_v18 = vadd.f32 %v8317_v25, %v5633_v9  ;;  %v5636_v24 = vadd.f32 %v5635_v53, %v5634_v10  ;;  %v9873_v9 = vld [vmem:[#allocation30_spill] sm:$0xff] }
 0x263   :  { %v8624_v23 = vpack.c.bf16 %v2608_v62, %v2603_v36  ;;  %v2266_v42 = vmul.f32 %v8609_v39, %v2107_v18  ;;  %v2110_v0 = vadd.f32 %v8328_v34, %v5636_v24  ;;  %v9874_v36 = vld [vmem:[#allocation15_spill] sm:$0xff] }
 0x264   :  { %3626 = vmatmul.mubr.bf16.gmra.mrb[128].mxu1 %v9864_v50 }
 0x265   :  { %v2453_v54 = vadd.f32 %v8615_v1, %v2266_v42  ;;  %v2271_v11 = vmul.f32 %v8609_v39, %v2110_v0  ;;  %v5637_v20 = vpop.f32.mrb[104].mxu0  ;;  %3635 = vmatprep.mubr.bf16.mxu1 %v9865_v21  ;;  %v9875_v42 = vld [vmem:[#allocation18_spill] sm:$0xff] }
 0x266   :  { %v5638_v38 = vpop.f32.mrb[105].mxu0 }
 0x267   :  { %v2458_v22 = vadd.f32 %v8615_v1, %v2271_v11  ;;  %v5639_v25 = vadd.f32 %v5638_v38, %v5637_v20  ;;  %v5640_v6 = vpop.f32.mrb[106].mxu0  ;;  %v2613_v7 = vmax.f32 %v2453_v54, 0.0 }
 0x268   :  { %v5641_v40 = vpop.f32.mrb[107].mxu0 }
 0x269   :  { %v2618_v57 = vmax.f32 %v2458_v22, 0.0  ;;  %v2115_v46 = vadd.f32 %v5639_v25, %v8358_v33  ;;  %v5642_v34 = vadd.f32 %v5641_v40, %v5640_v6  ;;  %v9876_v22 = vld [vmem:[#allocation27_spill] sm:$0xff] }
 0x26b   :  { %v2276_v14 = vmul.f32 %v8609_v39, %v2115_v46  ;;  %v2118_v44 = vadd.f32 %v5642_v34, %v8365_v5  ;;  %v8636_v31 = vpack.c.bf16 %v2618_v57, %v2613_v7  ;;  %v9868_v5 = vld [vmem:[#allocation25_spill] sm:$0xff] }
 0x26c   :  { %3636 = vmatmul.mubr.bf16.gmra.mrb[132].mxu1 %v9866_v4  ;;  %v9877_v7 = vld [vmem:[#allocation29_spill] sm:$0xff] }
 0x26d   :  { %v2463_v58 = vadd.f32 %v8615_v1, %v2276_v14  ;;  %v2281_v47 = vmul.f32 %v8609_v39, %v2118_v44  ;;  %v5643_v26 = vpop.f32.mrb[108].mxu0  ;;  %3645 = vmatprep.mubr.bf16.mxu1 %v9867_v60  ;;  %v9878_v34 = vld [vmem:[#allocation17_spill] sm:$0xff] }
 0x26e   :  { %v5644_v27 = vpop.f32.mrb[109].mxu0  ;;  %v6609_v14 = vld [vmem:[%s9757_s7 + $0x40] sm:$0xff]  }
 0x26f   :  { %v2468_v48 = vadd.f32 %v8615_v1, %v2281_v47  ;;  %v5645_v33 = vadd.f32 %v5644_v27, %v5643_v26  ;;  %v5646_v51 = vpop.f32.mrb[110].mxu0  ;;  %v2623_v61 = vmax.f32 %v2463_v58, 0.0  ;;  %v6610_v44 = vld [vmem:[%s9757_s7] sm:$0xff]   ;;  %v9879_v26 = vld [vmem:[#allocation20_spill] sm:$0xff]  ;;  %5745 = vmatprep.subr.bf16.mxu0 %v6609_v14  ;;  %v9889_v14 = vld [vmem:[#allocation38_spill] sm:$0xff] }
 0x270   :  { %v5647_v30 = vpop.f32.mrb[111].mxu0  ;;  %5746 = vmatpush3.bf16.msra.mxu0 %v6610_v44 }
 0x271   :  { %v2628_v19 = vmax.f32 %v2468_v48, 0.0  ;;  %v2123_v29 = vadd.f32 %v9868_v5, %v5645_v33  ;;  %v5648_v59 = vadd.f32 %v5647_v30, %v5646_v51 }
 0x273   :  { %v2286_v8 = vmul.f32 %v8609_v39, %v2123_v29  ;;  %v2126_v12 = vadd.f32 %v9869_v15, %v5648_v59  ;;  %v8646_v16 = vpack.c.bf16 %v2628_v19, %v2623_v61  ;;  %v9880_v19 = vld [vmem:[#allocation32_spill] sm:$0xff] }
 0x274   :  { %3646 = vmatmul.mubr.bf16.gmra.mrb[136].mxu1 %v9870_v37  ;;  %v9882_v37 = vld [vmem:[#allocation19_spill] sm:$0xff] }
 0x275   :  { %v2473_v3 = vadd.f32 %v8615_v1, %v2286_v8  ;;  %v2291_v13 = vmul.f32 %v8609_v39, %v2126_v12  ;;  %v5649_v2 = vpop.f32.mrb[112].mxu0  ;;  %3655 = vmatprep.mubr.bf16.mxu1 %v9871_v41  ;;  %v9881_v8 = vld [vmem:[#allocation34_spill] sm:$0xff] }
 0x276   :  { %v5650_v45 = vpop.f32.mrb[113].mxu0  ;;  %v9883_v41 = vld [vmem:[#allocation22_spill] sm:$0xff] }
 0x277   :  { %v2478_v55 = vadd.f32 %v8615_v1, %v2291_v13  ;;  %v5651_v35 = vadd.f32 %v5650_v45, %v5649_v2  ;;  %v5652_v49 = vpop.f32.mrb[114].mxu0  ;;  %v2633_v63 = vmax.f32 %v2473_v3, 0.0 }
 0x278   :  { %v5653_v56 = vpop.f32.mrb[115].mxu0 }
 0x279   :  { %v2638_v17 = vmax.f32 %v2478_v55, 0.0  ;;  %v2131_v32 = vadd.f32 %v5651_v35, %v9872_v52  ;;  %v5654_v43 = vadd.f32 %v5653_v56, %v5652_v49  ;;  %v9884_v52 = vld [vmem:[#allocation31_spill] sm:$0xff] }
 0x27b   :  { %v2296_v28 = vmul.f32 %v8609_v39, %v2131_v32  ;;  %v2134_v10 = vadd.f32 %v5654_v43, %v9873_v9  ;;  %v8656_v53 = vpack.c.bf16 %v2638_v17, %v2633_v63  ;;  %v9885_v9 = vld [vmem:[#allocation33_spill] sm:$0xff] }
 0x27c   :  { %3656 = vmatmul.mubr.bf16.gmra.mrb[140].mxu1 %v9874_v36 }
 0x27d   :  { %v2483_v62 = vadd.f32 %v8615_v1, %v2296_v28  ;;  %v2301_v18 = vmul.f32 %v8609_v39, %v2134_v10  ;;  %v5655_v24 = vpop.f32.mrb[116].mxu0  ;;  %3665 = vmatprep.mubr.bf16.mxu1 %v9875_v42 }
 0x27e   :  { %v5656_v0 = vpop.f32.mrb[117].mxu0 }
 0x27f   :  { %v2488_v50 = vadd.f32 %v8615_v1, %v2301_v18  ;;  %v5657_v54 = vadd.f32 %v5656_v0, %v5655_v24  ;;  %v5658_v11 = vpop.f32.mrb[118].mxu0  ;;  %v2643_v21 = vmax.f32 %v2483_v62, 0.0  ;;  %v9886_v62 = vld [vmem:[#allocation21_spill] sm:$0xff]  ;;  %v6611_v18 = vld [vmem:[%s9757_s7 + $0x48] sm:$0xff]  }
 0x280   :  { %v5659_v20 = vpop.f32.mrb[119].mxu0  ;;  %v6612_v24 = vld [vmem:[%s9757_s7 + $0x8] sm:$0xff]   ;;  %5747 = vmatprep.subr.bf16.mxu0 %v6611_v18 }
 0x281   :  { %v2648_v38 = vmax.f32 %v2488_v50, 0.0  ;;  %v2139_v25 = vadd.f32 %v9876_v22, %v5657_v54  ;;  %v5660_v6 = vadd.f32 %v5659_v20, %v5658_v11  ;;  %v9887_v54 = vld [vmem:[#allocation24_spill] sm:$0xff]  ;;  %5748 = vmatpush3.bf16.msra.mxu0 %v6612_v24 }
 0x283   :  { %v2306_v40 = vmul.f32 %v8609_v39, %v2139_v25  ;;  %v2142_v57 = vadd.f32 %v9877_v7, %v5660_v6  ;;  %v8666_v46 = vpack.c.bf16 %v2648_v38, %v2643_v21 }
 0x284   :  { %3666 = vmatmul.mubr.bf16.gmra.mrb[144].mxu1 %v9878_v34 }
 0x285   :  { %v2493_v4 = vadd.f32 %v8615_v1, %v2306_v40  ;;  %v2311_v58 = vmul.f32 %v8609_v39, %v2142_v57  ;;  %3675 = vmatprep.mubr.bf16.mxu1 %v9879_v26  ;;  %v9888_v40 = vld [vmem:[#allocation36_spill] sm:$0xff]  ;;  %v6614_v26 = vld [vmem:[%s9757_s7 + $0x10] sm:$0xff]  }
 0x286   :  { %v5661_v47 = vpop.f32.mrb[120].mxu0 }
 0x287   :  { %v5662_v60 = vpop.f32.mrb[121].mxu0  ;;  %v2498_v27 = vadd.f32 %v8615_v1, %v2311_v58  ;;  %v2653_v30 = vmax.f32 %v2493_v4, 0.0  ;;  %v9890_v58 = vld [vmem:[#allocation23_spill] sm:$0xff] }
 0x288   :  { %v5663_v48 = vadd.f32 %v5662_v60, %v5661_v47  ;;  %v5664_v33 = vpop.f32.mrb[122].mxu0  ;;  %v6613_v47 = vld [vmem:[%s9757_s7 + $0x50] sm:$0xff]   ;;  %v6615_v60 = vld [vmem:[%s9757_s7 + $0x58] sm:$0xff]  }
 0x289   :  { %v5665_v51 = vpop.f32.mrb[123].mxu0  ;;  %v2658_v61 = vmax.f32 %v2498_v27, 0.0  ;;  %5749 = vmatprep.subr.bf16.mxu0 %v6613_v47 }
 0x28a   :  { %v2147_v5 = vadd.f32 %v5663_v48, %v9880_v19  ;;  %v5666_v29 = vadd.f32 %v5665_v51, %v5664_v33  ;;  %v9891_v51 = vmov 0   ;;  %5750 = vmatpush3.bf16.msra.mxu0 %v6614_v26  ;;  %v9896_v26 = vld [vmem:[#allocation39_spill] sm:$0xff] }
 0x28b   :  { %v8682_v12 = vpack.c.bf16 %v2658_v61, %v2653_v30  ;;  %5751 = vmatprep.subr.bf16.mxu0 %v6615_v60 }
 0x28c   :  { %v2316_v59 = vmul.f32 %v8609_v39, %v2147_v5  ;;  %v2150_v15 = vadd.f32 %v5666_v29, %v9881_v8  ;;  %3676 = vmatmul.mubr.bf16.gmra.mrb[148].mxu1 %v9882_v37  ;;  %v6616_v29 = vld [vmem:[%s9757_s7 + $0x18] sm:$0xff]   ;;  %v6617_v8 = vld [vmem:[%s9757_s7 + $0x60] sm:$0xff]  }
 0x28d   :  { %3685 = vmatprep.mubr.bf16.mxu1 %v9883_v41 }
 0x28e   :  { %v2503_v3 = vadd.f32 %v8615_v1, %v2316_v59  ;;  %v2321_v13 = vmul.f32 %v8609_v39, %v2150_v15  ;;  %v5667_v2 = vpop.f32.mrb[124].mxu0  ;;  %5752 = vmatpush3.bf16.msra.mxu0 %v6616_v29 }
 0x28f   :  { %v5668_v45 = vpop.f32.mrb[125].mxu0  ;;  %5753 = vmatprep.subr.bf16.mxu0 %v6617_v8 }
 0x290   :  { %v2508_v55 = vadd.f32 %v8615_v1, %v2321_v13  ;;  %v5669_v35 = vadd.f32 %v5668_v45, %v5667_v2  ;;  %v5670_v49 = vpop.f32.mrb[126].mxu0  ;;  %v2663_v63 = vmax.f32 %v2503_v3, 0.0  ;;  %v9892_v3 = vld [vmem:[#allocation35_spill] sm:$0xff]  ;;  %v9893_v45 = vld [vmem:[#allocation37_spill] sm:$0xff] }
 0x291   :  { %v5671_v56 = vpop.f32.mrb[127].mxu0 }
 0x292   :  { %v2668_v17 = vmax.f32 %v2508_v55, 0.0  ;;  %v2155_v32 = vadd.f32 %v9884_v52, %v5669_v35  ;;  %v5672_v43 = vadd.f32 %v5671_v56, %v5670_v49  ;;  %v6618_v49 = vld [vmem:[%s9757_s7 + $0x20] sm:$0xff]   ;;  %v6619_v56 = vld [vmem:[%s9757_s7 + $0x68] sm:$0xff]  }
 0x293   :  { %5754 = vmatpush3.bf16.msra.mxu0 %v6618_v49  ;;  %v9899_v49 = vld [vmem:[#allocation46_spill] sm:$0xff] }
 0x294   :  { %v2326_v28 = vmul.f32 %v8609_v39, %v2155_v32  ;;  %v2158_v10 = vadd.f32 %v9885_v9, %v5672_v43  ;;  %v8692_v36 = vpack.c.bf16 %v2668_v17, %v2663_v63  ;;  %3686 = vmatmul.mubr.bf16.gmra.mrb[152].mxu1 %v9886_v62  ;;  %5755 = vmatprep.subr.bf16.mxu0 %v6619_v56  ;;  %v6621_v62 = vld [vmem:[%s9757_s7 + $0x70] sm:$0xff]  }
 0x295   :  { %3695 = vmatprep.mubr.bf16.mxu1 %v9887_v54 }
 0x296   :  { %v2513_v42 = vadd.f32 %v8615_v1, %v2326_v28  ;;  %v2331_v0 = vmul.f32 %v8609_v39, %v2158_v10  ;;  %v5673_v50 = vpop.f32.mrb[128].mxu0 }
 0x297   :  { %v5674_v11 = vpop.f32.mrb[129].mxu0 }
 0x298   :  { %v2518_v20 = vadd.f32 %v8615_v1, %v2331_v0  ;;  %v5675_v21 = vadd.f32 %v5674_v11, %v5673_v50  ;;  %v5676_v38 = vpop.f32.mrb[130].mxu0  ;;  %v2673_v25 = vmax.f32 %v2513_v42, 0.0  ;;  %v9894_v42 = vld [vmem:[#allocation40_spill] sm:$0xff]  ;;  %v9895_v11 = vld [vmem:[#allocation42_spill] sm:$0xff] }
 0x299   :  { %v5677_v22 = vpop.f32.mrb[131].mxu0 }
 0x29a   :  { %v2678_v6 = vmax.f32 %v2518_v20, 0.0  ;;  %v2163_v7 = vadd.f32 %v5675_v21, %v9888_v40  ;;  %v5678_v57 = vadd.f32 %v5677_v22, %v5676_v38  ;;  %v6622_v38 = vld [vmem:[%s9757_s7 + $0x30] sm:$0xff]   ;;  %v6623_v22 = vld [vmem:[%s9757_s7 + $0x78] sm:$0xff]  }
 0x29c   :  { %v2336_v34 = vmul.f32 %v8609_v39, %v2163_v7  ;;  %v2166_v44 = vadd.f32 %v5678_v57, %v9889_v14  ;;  %v8708_v4 = vpack.c.bf16 %v2678_v6, %v2673_v25  ;;  %3696 = vmatmul.mubr.bf16.gmra.mrb[156].mxu1 %v9890_v58 }
 0x29d   :  { %3738 = vmatprep.mubr.bf16.mxu1 %v9891_v51 }
 0x29e   :  { %v2523_v27 = vadd.f32 %v8615_v1, %v2336_v34  ;;  %v2341_v48 = vmul.f32 %v8609_v39, %v2166_v44  ;;  %v5679_v33 = vpop.f32.mrb[132].mxu0 }
 0x29f   :  { %v5680_v30 = vpop.f32.mrb[133].mxu0 }
 0x2a0   :  { %v2528_v61 = vadd.f32 %v8615_v1, %v2341_v48  ;;  %v5681_v19 = vadd.f32 %v5680_v30, %v5679_v33  ;;  %v5682_v5 = vpop.f32.mrb[134].mxu0  ;;  %v2683_v15 = vmax.f32 %v2523_v27, 0.0  ;;  %v9897_v33 = vld [vmem:[#allocation41_spill] sm:$0xff] }
 0x2a1   :  { %v5683_v59 = vpop.f32.mrb[135].mxu0 }
 0x2a2   :  { %v2688_v37 = vmax.f32 %v2528_v61, 0.0  ;;  %v2171_v13 = vadd.f32 %v9892_v3, %v5681_v19  ;;  %v5684_v2 = vadd.f32 %v5683_v59, %v5682_v5 }
 0x2a4   :  { %v2346_v41 = vmul.f32 %v8609_v39, %v2171_v13  ;;  %v2174_v55 = vadd.f32 %v9893_v45, %v5684_v2  ;;  %v8733_v35 = vpack.c.bf16 %v2688_v37, %v2683_v15  ;;  %5566 = vmatmul.mubr.msk.bf16.vlgmr.msra.gmra.mrb[96].mxu1 %vm3271_vm0, %v8624_v23  ;;  %v6620_v23 = vld [vmem:[%s9757_s7 + $0x28] sm:$0xff]  }
 0x2a5   :  { %3748 = vmatprep.mubr.bf16.mxu1 %v9891_v51  ;;  %5756 = vmatpush3.bf16.msra.mxu0 %v6620_v23 }
 0x2a6   :  { %v2533_v63 = vadd.f32 %v8615_v1, %v2346_v41  ;;  %v2351_v17 = vmul.f32 %v8609_v39, %v2174_v55  ;;  %v5685_v52 = vpop.f32.mrb[136].mxu0  ;;  %5757 = vmatprep.subr.bf16.mxu0 %v6621_v62  ;;  %v9898_v41 = vld [vmem:[#allocation44_spill] sm:$0xff] }
 0x2a7   :  { %v5686_v32 = vpop.f32.mrb[137].mxu0 }
 0x2a8   :  { %v2538_v43 = vadd.f32 %v8615_v1, %v2351_v17  ;;  %v5687_v28 = vadd.f32 %v5686_v32, %v5685_v52  ;;  %v5688_v9 = vpop.f32.mrb[138].mxu0  ;;  %v2693_v18 = vmax.f32 %v2533_v63, 0.0 }
 0x2a9   :  { %v5689_v10 = vpop.f32.mrb[139].mxu0  ;;  %5758 = vmatpush3.bf16.msra.mxu0 %v6622_v38 }
 0x2aa   :  { %v2698_v24 = vmax.f32 %v2538_v43, 0.0  ;;  %v2179_v0 = vadd.f32 %v5687_v28, %v9894_v42  ;;  %v5690_v50 = vadd.f32 %v5689_v10, %v5688_v9  ;;  %5759 = vmatprep.subr.bf16.mxu0 %v6623_v22 }
 0x2ac   :  { %v2356_v54 = vmul.f32 %v8609_v39, %v2179_v0  ;;  %v2182_v20 = vadd.f32 %v5690_v50, %v9895_v11  ;;  %v8756_v21 = vpack.c.bf16 %v2698_v24, %v2693_v18  ;;  %5567 = vmatmul.mubr.msk.bf16.gmra.mrb[100].mxu1 %vm3271_vm0, %v8636_v31  ;;  %v6624_v31 = vld [vmem:[%s9757_s7 + $0x38] sm:$0xff]   ;;  %v9900_v24 = vld [vmem:[#allocation43_spill] sm:$0xff]  ;;  %v9901_v50 = vld [vmem:[#allocation45_spill] sm:$0xff] }
 0x2ad   :  { %3758 = vmatprep.mubr.bf16.mxu1 %v9891_v51  ;;  %5760 = vmatpush3.bf16.msra.mxu0 %v6624_v31  ;;  %v9902_v31 = vld [vmem:[#allocation48_spill] sm:$0xff] }
 0x2ae   :  { %v2543_v25 = vadd.f32 %v8615_v1, %v2356_v54  ;;  %v2361_v6 = vmul.f32 %v8609_v39, %v2182_v20  ;;  %v5691_v40 = vpop.f32.mrb[140].mxu0 }
 0x2af   :  { %v5692_v7 = vpop.f32.mrb[141].mxu0 }
 0x2b0   :  { %v2548_v57 = vadd.f32 %v8615_v1, %v2361_v6  ;;  %v5693_v34 = vadd.f32 %v5692_v7, %v5691_v40  ;;  %v5694_v14 = vpop.f32.mrb[142].mxu0  ;;  %v2703_v58 = vmax.f32 %v2543_v25, 0.0 }
 0x2b1   :  { %v5695_v44 = vpop.f32.mrb[143].mxu0 }
 0x2b2   :  { %v2708_v47 = vmax.f32 %v2548_v57, 0.0  ;;  %v2187_v60 = vadd.f32 %v9896_v26, %v5693_v34  ;;  %v5696_v27 = vadd.f32 %v5695_v44, %v5694_v14 }
 0x2b4   :  { %v2366_v48 = vmul.f32 %v8609_v39, %v2187_v60  ;;  %v2190_v30 = vadd.f32 %v9897_v33, %v5696_v27  ;;  %v8776_v61 = vpack.c.bf16 %v2708_v47, %v2703_v58  ;;  %5568 = vmatmul.mubr.msk.bf16.gmra.mrb[104].mxu1 %vm3271_vm0, %v8646_v16  ;;  %v9903_v47 = vld [vmem:[#allocation50_spill] sm:$0xff] }
 0x2b5   :  { %3768 = vmatprep.mubr.bf16.mxu1 %v9891_v51 }
 0x2b6   :  { %v2553_v19 = vadd.f32 %v8615_v1, %v2366_v48  ;;  %v2371_v5 = vmul.f32 %v8609_v39, %v2190_v30  ;;  %v5697_v29 = vpop.f32.mrb[144].mxu0 }
 0x2b7   :  { %v5698_v59 = vpop.f32.mrb[145].mxu0 }
 0x2b8   :  { %v2558_v8 = vadd.f32 %v8615_v1, %v2371_v5  ;;  %v5699_v15 = vadd.f32 %v5698_v59, %v5697_v29  ;;  %v5700_v37 = vpop.f32.mrb[146].mxu0  ;;  %v2713_v13 = vmax.f32 %v2553_v19, 0.0 }
 0x2b9   :  { %v5701_v3 = vpop.f32.mrb[147].mxu0 }
 0x2ba   :  { %v2718_v2 = vmax.f32 %v2558_v8, 0.0  ;;  %v2195_v45 = vadd.f32 %v5699_v15, %v9898_v41  ;;  %v5702_v55 = vadd.f32 %v5701_v3, %v5700_v37  ;;  %v9904_v37 = vld [vmem:[#allocation47_spill] sm:$0xff] }
 0x2bc   :  { %v2376_v16 = vmul.f32 %v8609_v39, %v2195_v45  ;;  %v2198_v56 = vadd.f32 %v5702_v55, %v9899_v49  ;;  %v8787_v63 = vpack.c.bf16 %v2718_v2, %v2713_v13  ;;  %5569 = vmatmul.mubr.msk.bf16.gmra.mrb[108].mxu1 %vm3271_vm0, %v8656_v53  ;;  %v9905_v2 = vld [vmem:[#allocation49_spill] sm:$0xff] }
 0x2bd   :  { %3778 = vmatprep.mubr.bf16.mxu1 %v9891_v51 }
 0x2be   :  { %v2563_v17 = vadd.f32 %v8615_v1, %v2376_v16  ;;  %v2381_v52 = vmul.f32 %v8609_v39, %v2198_v56  ;;  %v5703_v32 = vpop.f32.mrb[148].mxu0 }
 0x2bf   :  { %v5704_v43 = vpop.f32.mrb[149].mxu0 }
 0x2c0   :  { %v2568_v28 = vadd.f32 %v8615_v1, %v2381_v52  ;;  %v5705_v9 = vadd.f32 %v5704_v43, %v5703_v32  ;;  %v5706_v23 = vpop.f32.mrb[150].mxu0  ;;  %v2723_v62 = vmax.f32 %v2563_v17, 0.0 }
 0x2c1   :  { %v5707_v10 = vpop.f32.mrb[151].mxu0 }
 0x2c2   :  { %v2728_v18 = vmax.f32 %v2568_v28, 0.0  ;;  %v2203_v42 = vadd.f32 %v9900_v24, %v5705_v9  ;;  %v5708_v0 = vadd.f32 %v5707_v10, %v5706_v23 }
 0x2c4   :  { %v2386_v53 = vmul.f32 %v8609_v39, %v2203_v42  ;;  %v2206_v54 = vadd.f32 %v9901_v50, %v5708_v0  ;;  %v2823_v11 = vpack.c.bf16 %v2728_v18, %v2723_v62  ;;  %5570 = vmatmul.mubr.msk.bf16.gmra.mrb[112].mxu1 %vm3271_vm0, %v8666_v46  ;;  %v6625_v0 = vld [vmem:[%s9760_s10] sm:$0xff]  }
 0x2c5   :  { %3788 = vmatprep.mubr.bf16.mxu1 %v9891_v51  ;;  %5929 = vmatprep.subr.bf16.mxu0 %v6625_v0 }
 0x2c6   :  { %v2573_v20 = vadd.f32 %v8615_v1, %v2386_v53  ;;  %v2391_v38 = vmul.f32 %v8609_v39, %v2206_v54  ;;  %v5709_v22 = vpop.f32.mrb[152].mxu0 }
 0x2c7   :  { %v5710_v25 = vpop.f32.mrb[153].mxu0 }
 0x2c8   :  { %v2578_v6 = vadd.f32 %v8615_v1, %v2391_v38  ;;  %v5711_v40 = vadd.f32 %v5710_v25, %v5709_v22  ;;  %v5712_v7 = vpop.f32.mrb[154].mxu0  ;;  %v2733_v34 = vmax.f32 %v2573_v20, 0.0 }
 0x2c9   :  { %v5713_v57 = vpop.f32.mrb[155].mxu0 }
 0x2ca   :  { %v2738_v14 = vmax.f32 %v2578_v6, 0.0  ;;  %v2211_v44 = vadd.f32 %v5711_v40, %v9902_v31  ;;  %v5714_v58 = vadd.f32 %v5713_v57, %v5712_v7 }
 0x2cc   :  { %v2396_v46 = vmul.f32 %v8609_v39, %v2211_v44  ;;  %v2214_v26 = vadd.f32 %v5714_v58, %v9903_v47  ;;  %v2828_v60 = vpack.c.bf16 %v2738_v14, %v2733_v34  ;;  %5571 = vmatmul.mubr.msk.bf16.gmra.mrb[116].mxu1 %vm3271_vm0, %v8682_v12  ;;  %v6626_v44 = vld [vmem:[%s9760_s10 + $0x8] sm:$0xff]  }
 0x2cd   :  { %3798 = vmatprep.mubr.bf16.mxu1 %v9891_v51 }
 0x2ce   :  { %v2583_v27 = vadd.f32 %v8615_v1, %v2396_v46  ;;  %v2401_v48 = vmul.f32 %v8609_v39, %v2214_v26  ;;  %v5715_v33 = vpop.f32.mrb[156].mxu0 }
 0x2cf   :  { %v5716_v30 = vpop.f32.mrb[157].mxu0 }
 0x2d0   :  { %v2588_v19 = vadd.f32 %v8615_v1, %v2401_v48  ;;  %v5717_v5 = vadd.f32 %v5716_v30, %v5715_v33  ;;  %v5718_v29 = vpop.f32.mrb[158].mxu0  ;;  %v2743_v8 = vmax.f32 %v2583_v27, 0.0  ;;  %v6627_v48 = vld [vmem:[%s9760_s10 + $0x10] sm:$0xff]  }
 0x2d1   :  { %v5719_v59 = vpop.f32.mrb[159].mxu0 }
 0x2d2   :  { %v2748_v15 = vmax.f32 %v2588_v19, 0.0  ;;  %v2219_v3 = vadd.f32 %v9904_v37, %v5717_v5  ;;  %v5720_v13 = vadd.f32 %v5719_v59, %v5718_v29 }
 0x2d4   :  { %v2406_v12 = vmul.f32 %v8609_v39, %v2219_v3  ;;  %v2222_v41 = vadd.f32 %v9905_v2, %v5720_v13  ;;  %v2833_v45 = vpack.c.bf16 %v2748_v15, %v2743_v8  ;;  %5572 = vmatmul.mubr.msk.bf16.gmra.mrb[120].mxu1 %vm3271_vm0, %v8692_v36  ;;  %v9906_v36 = vld [vmem:[#allocation6_spill] sm:$0xff]  ;;  %v6628_v2 = vld [vmem:[%s9760_s10 + $0x18] sm:$0xff]  }
 0x2d5   :  { %3808 = vmatprep.mubr.bf16.mxu1 %v9891_v51 }
 0x2d6   :  { %v2593_v55 = vadd.f32 %v8615_v1, %v2406_v12  ;;  %v2411_v16 = vmul.f32 %v8609_v39, %v2222_v41  ;;  %v3899_v39 = vld [vmem:[%s9755_s5] sm:$0x3] }
 0x2d8   :  { %v2598_v49 = vadd.f32 %v8615_v1, %v2411_v16  ;;  %v2753_v56 = vmax.f32 %v2593_v55, 0.0  ;;  %v3975_v1 = vld [vmem:[%s9756_s6] sm:$0x3] }
 0x2da   :  { %v2758_v17 = vmax.f32 %v2598_v49, 0.0 }
 0x2dc   :  { %v2838_v52 = vpack.c.bf16 %v2758_v17, %v2753_v56  ;;  %5573 = vmatmul.mubr.msk.bf16.gmra.mrb[124].mxu1 %vm3271_vm0, %v8708_v4  ;;  %v8851_v4 = vrot.slane %v3899_v39, %v9906_v36 }
 0x2dd   :  { %3818 = vmatprep.mubr.bf16.mxu1 %v9891_v51 }
 0x2e4   :  { %5574 = vmatmul.mubr.msk.bf16.gmra.mrb[128].mxu1 %vm3271_vm0, %v8733_v35  ;;  %v9907_v35 = vld [vmem:[#allocation7_spill] sm:$0xff] }
 0x2e5   :  { %3828 = vmatprep.mubr.bf16.mxu1 %v9891_v51 }
 0x2ec   :  { %5575 = vmatmul.mubr.msk.bf16.gmra.mrb[132].mxu1 %vm3271_vm0, %v8756_v21  ;;  %v8854_v21 = vrot.slane %v3899_v39, %v9907_v35 }
 0x2ed   :  { %3838 = vmatprep.mubr.bf16.mxu1 %v9891_v51 }
 0x2f4   :  { %5576 = vmatmul.mubr.msk.bf16.gmra.mrb[136].mxu1 %vm3271_vm0, %v8776_v61  ;;  %v8857_v61 = vrot.slane %v3975_v1, %v9906_v36 }
 0x2f5   :  { %3848 = vmatprep.mubr.bf16.mxu1 %v9891_v51 }
 0x2fc   :  { %5577 = vmatmul.mubr.msk.bf16.gmra.mrb[140].mxu1 %vm3271_vm0, %v8787_v63  ;;  %v8860_v63 = vrot.slane %v3975_v1, %v9907_v35 }
 0x2fd   :  { %3858 = vmatprep.mubr.bf16.mxu1 %v9891_v51 }
 0x304   :  { %5578 = vmatmul.mubr.msk.bf16.gmra.mrb[144].mxu1 %vm3271_vm0, %v2823_v11 }
 0x305   :  { %3868 = vmatprep.mubr.bf16.mxu1 %v9891_v51 }
 0x30c   :  { %5579 = vmatmul.mubr.msk.bf16.gmra.mrb[148].mxu1 %vm3271_vm0, %v2828_v60 }
 0x30d   :  { %3878 = vmatprep.mubr.bf16.mxu1 %v9891_v51 }
 0x314   :  { %5580 = vmatmul.mubr.msk.bf16.gmra.mrb[152].mxu1 %vm3271_vm0, %v2833_v45 }
 0x315   :  { %3888 = vmatprep.mubr.bf16.mxu1 %v9891_v51 }
 0x31c   :  { %5581 = vmatmul.mubr.msk.bf16.gmra.mrb[156].mxu1 %vm3271_vm0, %v2838_v52 }
 0x377   :  { %v3740_v51 = vpop.f32.mrb[96].mxu1 }
 0x378   :  { %v3911_v32 = vmul.f32 %v8851_v4, %v3740_v51  ;;  %v3742_v43 = vpop.f32.mrb[97].mxu1 }
 0x379   :  { %v3912_v28 = vmul.f32 %v8854_v21, %v3742_v43  ;;  %v3744_v9 = vpop.f32.mrb[98].mxu1 }
 0x37a   :  { %v3987_v23 = vadd.f32 %v8857_v61, %v3911_v32  ;;  %v3913_v10 = vmul.f32 %v8851_v4, %v3744_v9  ;;  %v3746_v62 = vpop.f32.mrb[99].mxu1 }
 0x37b   :  { %v3988_v18 = vadd.f32 %v8860_v63, %v3912_v28  ;;  %v3914_v24 = vmul.f32 %v8854_v21, %v3746_v62 }
 0x37c   :  { %v3989_v42 = vadd.f32 %v8857_v61, %v3913_v10  ;;  %v4051_v50 = vmax.f32 %v3987_v23, 0.0 }
 0x37d   :  { %v3990_v53 = vadd.f32 %v8860_v63, %v3914_v24  ;;  %v4052_v11 = vmax.f32 %v3988_v18, 0.0 }
 0x37e   :  { %v4053_v54 = vmax.f32 %v3989_v42, 0.0 }
 0x37f   :  { %v4054_v20 = vmax.f32 %v3990_v53, 0.0  ;;  %v3750_v38 = vpop.f32.mrb[100].mxu1 }
 0x380   :  { %v4115_v22 = vpack.c.bf16 %v4053_v54, %v4051_v50  ;;  %v3915_v25 = vmul.f32 %v8851_v4, %v3750_v38  ;;  %v3752_v6 = vpop.f32.mrb[101].mxu1 }
 0x381   :  { %v3916_v40 = vmul.f32 %v8854_v21, %v3752_v6  ;;  %v3754_v7 = vpop.f32.mrb[102].mxu1  ;;  %v4116_v57 = vpack.c.bf16 %v4054_v20, %v4052_v11 }
 0x382   :  { %v3991_v34 = vadd.f32 %v8857_v61, %v3915_v25  ;;  %v3917_v14 = vmul.f32 %v8851_v4, %v3754_v7  ;;  %v3756_v31 = vpop.f32.mrb[103].mxu1 }
 0x383   :  { %v3992_v58 = vadd.f32 %v8860_v63, %v3916_v40  ;;  %v3918_v46 = vmul.f32 %v8854_v21, %v3756_v31  ;;  %4307 = vmatprep.mubr.bf16.mxu0 %v4116_v57 }
 0x384   :  { %v3993_v47 = vadd.f32 %v8857_v61, %v3917_v14  ;;  %4308 = vmatmul.mubr.bf16.vlgmr.msra.gmra.mrb[160].mxu0 %v4115_v22  ;;  %v4055_v60 = vmax.f32 %v3991_v34, 0.0 }
 0x385   :  { %v3994_v26 = vadd.f32 %v8860_v63, %v3918_v46  ;;  %5930 = vmatpush3.bf16.msra.mxu0 %v6625_v0  ;;  %v4056_v33 = vmax.f32 %v3992_v58, 0.0 }
 0x386   :  { %v4057_v27 = vmax.f32 %v3993_v47, 0.0  ;;  %5931 = vmatprep.subr.bf16.mxu0 %v6626_v44 }
 0x387   :  { %v4058_v30 = vmax.f32 %v3994_v26, 0.0  ;;  %v3760_v19 = vpop.f32.mrb[104].mxu1 }
 0x388   :  { %v3919_v5 = vmul.f32 %v8851_v4, %v3760_v19  ;;  %v3762_v29 = vpop.f32.mrb[105].mxu1  ;;  %v4117_v59 = vpack.c.bf16 %v4057_v27, %v4055_v60 }
 0x389   :  { %v3920_v8 = vmul.f32 %v8854_v21, %v3762_v29  ;;  %v3764_v15 = vpop.f32.mrb[106].mxu1  ;;  %v4118_v37 = vpack.c.bf16 %v4058_v30, %v4056_v33  ;;  %5932 = vmatpush3.bf16.msra.mxu0 %v6626_v44 }
 0x38a   :  { %v3995_v3 = vadd.f32 %v8857_v61, %v3919_v5  ;;  %v3921_v13 = vmul.f32 %v8851_v4, %v3764_v15  ;;  %v3766_v12 = vpop.f32.mrb[107].mxu1  ;;  %5933 = vmatprep.subr.bf16.mxu0 %v6627_v48 }
 0x38b   :  { %v3996_v41 = vadd.f32 %v8860_v63, %v3920_v8  ;;  %v3922_v45 = vmul.f32 %v8854_v21, %v3766_v12  ;;  %4315 = vmatprep.mubr.bf16.mxu0 %v4118_v37 }
 0x38c   :  { %v3997_v55 = vadd.f32 %v8857_v61, %v3921_v13  ;;  %4316 = vmatmul.mubr.bf16.gmra.mrb[164].mxu0 %v4117_v59  ;;  %v4059_v49 = vmax.f32 %v3995_v3, 0.0 }
 0x38d   :  { %v3998_v16 = vadd.f32 %v8860_v63, %v3922_v45  ;;  %5934 = vmatpush3.bf16.msra.mxu0 %v6627_v48  ;;  %v4060_v17 = vmax.f32 %v3996_v41, 0.0 }
 0x38e   :  { %v4061_v56 = vmax.f32 %v3997_v55, 0.0  ;;  %5935 = vmatprep.subr.bf16.mxu0 %v6628_v2 }
 0x38f   :  { %v4062_v52 = vmax.f32 %v3998_v16, 0.0  ;;  %v3770_v39 = vpop.f32.mrb[108].mxu1 }
 0x390   :  { %v3923_v1 = vmul.f32 %v8851_v4, %v3770_v39  ;;  %v3772_v36 = vpop.f32.mrb[109].mxu1  ;;  %v4119_v35 = vpack.c.bf16 %v4061_v56, %v4059_v49 }
 0x391   :  { %v3924_v51 = vmul.f32 %v8854_v21, %v3772_v36  ;;  %v3774_v32 = vpop.f32.mrb[110].mxu1  ;;  %v4120_v43 = vpack.c.bf16 %v4062_v52, %v4060_v17  ;;  %5936 = vmatpush3.bf16.msra.mxu0 %v6628_v2 }
 0x392   :  { %v3999_v28 = vadd.f32 %v8857_v61, %v3923_v1  ;;  %v3925_v9 = vmul.f32 %v8851_v4, %v3774_v32  ;;  %v3776_v23 = vpop.f32.mrb[111].mxu1 }
 0x393   :  { %v4000_v10 = vadd.f32 %v8860_v63, %v3924_v51  ;;  %v3926_v62 = vmul.f32 %v8854_v21, %v3776_v23  ;;  %4323 = vmatprep.mubr.bf16.mxu0 %v4120_v43 }
 0x394   :  { %v4001_v18 = vadd.f32 %v8857_v61, %v3925_v9  ;;  %4324 = vmatmul.mubr.bf16.gmra.mrb[168].mxu0 %v4119_v35  ;;  %v4063_v42 = vmax.f32 %v3999_v28, 0.0 }
 0x395   :  { %v4002_v24 = vadd.f32 %v8860_v63, %v3926_v62  ;;  %v4064_v53 = vmax.f32 %v4000_v10, 0.0 }
 0x396   :  { %v4065_v0 = vmax.f32 %v4001_v18, 0.0 }
 0x397   :  { %v4066_v50 = vmax.f32 %v4002_v24, 0.0  ;;  %v3780_v54 = vpop.f32.mrb[112].mxu1 }
 0x398   :  { %v3927_v11 = vmul.f32 %v8851_v4, %v3780_v54  ;;  %v3782_v20 = vpop.f32.mrb[113].mxu1  ;;  %v4121_v38 = vpack.c.bf16 %v4065_v0, %v4063_v42 }
 0x399   :  { %v3928_v22 = vmul.f32 %v8854_v21, %v3782_v20  ;;  %v3784_v25 = vpop.f32.mrb[114].mxu1  ;;  %v4122_v6 = vpack.c.bf16 %v4066_v50, %v4064_v53 }
 0x39a   :  { %v4003_v40 = vadd.f32 %v8857_v61, %v3927_v11  ;;  %v3929_v7 = vmul.f32 %v8851_v4, %v3784_v25  ;;  %v3786_v57 = vpop.f32.mrb[115].mxu1 }
 0x39b   :  { %v4004_v34 = vadd.f32 %v8860_v63, %v3928_v22  ;;  %v3930_v14 = vmul.f32 %v8854_v21, %v3786_v57  ;;  %4331 = vmatprep.mubr.bf16.mxu0 %v4122_v6 }
 0x39c   :  { %v4005_v31 = vadd.f32 %v8857_v61, %v3929_v7  ;;  %4332 = vmatmul.mubr.bf16.gmra.mrb[172].mxu0 %v4121_v38  ;;  %v4067_v58 = vmax.f32 %v4003_v40, 0.0 }
 0x39d   :  { %v4006_v44 = vadd.f32 %v8860_v63, %v3930_v14  ;;  %v4068_v47 = vmax.f32 %v4004_v34, 0.0 }
 0x39e   :  { %v4069_v46 = vmax.f32 %v4005_v31, 0.0 }
 0x39f   :  { %v4070_v26 = vmax.f32 %v4006_v44, 0.0  ;;  %v3790_v60 = vpop.f32.mrb[116].mxu1 }
 0x3a0   :  { %v3931_v27 = vmul.f32 %v8851_v4, %v3790_v60  ;;  %v3792_v48 = vpop.f32.mrb[117].mxu1  ;;  %v4123_v33 = vpack.c.bf16 %v4069_v46, %v4067_v58 }
 0x3a1   :  { %v3932_v30 = vmul.f32 %v8854_v21, %v3792_v48  ;;  %v3794_v19 = vpop.f32.mrb[118].mxu1  ;;  %v4124_v5 = vpack.c.bf16 %v4070_v26, %v4068_v47 }
 0x3a2   :  { %v4007_v29 = vadd.f32 %v8857_v61, %v3931_v27  ;;  %v3933_v59 = vmul.f32 %v8851_v4, %v3794_v19  ;;  %v3796_v8 = vpop.f32.mrb[119].mxu1 }
 0x3a3   :  { %v4008_v15 = vadd.f32 %v8860_v63, %v3932_v30  ;;  %v3934_v37 = vmul.f32 %v8854_v21, %v3796_v8  ;;  %4339 = vmatprep.mubr.bf16.mxu0 %v4124_v5 }
 0x3a4   :  { %v4009_v3 = vadd.f32 %v8857_v61, %v3933_v59  ;;  %4340 = vmatmul.mubr.bf16.gmra.mrb[176].mxu0 %v4123_v33  ;;  %v4071_v12 = vmax.f32 %v4007_v29, 0.0 }
 0x3a5   :  { %v4010_v13 = vadd.f32 %v8860_v63, %v3934_v37  ;;  %v4072_v41 = vmax.f32 %v4008_v15, 0.0 }
 0x3a6   :  { %v4073_v2 = vmax.f32 %v4009_v3, 0.0 }
 0x3a7   :  { %v4074_v45 = vmax.f32 %v4010_v13, 0.0  ;;  %v3800_v55 = vpop.f32.mrb[120].mxu1 }
 0x3a8   :  { %v3935_v16 = vmul.f32 %v8851_v4, %v3800_v55  ;;  %v3802_v49 = vpop.f32.mrb[121].mxu1  ;;  %v4125_v56 = vpack.c.bf16 %v4073_v2, %v4071_v12 }
 0x3a9   :  { %v3936_v17 = vmul.f32 %v8854_v21, %v3802_v49  ;;  %v3804_v52 = vpop.f32.mrb[122].mxu1  ;;  %v4126_v39 = vpack.c.bf16 %v4074_v45, %v4072_v41 }
 0x3aa   :  { %v4011_v1 = vadd.f32 %v8857_v61, %v3935_v16  ;;  %v3937_v36 = vmul.f32 %v8851_v4, %v3804_v52  ;;  %v3806_v35 = vpop.f32.mrb[123].mxu1 }
 0x3ab   :  { %v4012_v51 = vadd.f32 %v8860_v63, %v3936_v17  ;;  %v3938_v32 = vmul.f32 %v8854_v21, %v3806_v35  ;;  %4347 = vmatprep.mubr.bf16.mxu0 %v4126_v39 }
 0x3ac   :  { %v4013_v43 = vadd.f32 %v8857_v61, %v3937_v36  ;;  %4348 = vmatmul.mubr.bf16.gmra.mrb[180].mxu0 %v4125_v56  ;;  %v4075_v9 = vmax.f32 %v4011_v1, 0.0 }
 0x3ad   :  { %v4014_v28 = vadd.f32 %v8860_v63, %v3938_v32  ;;  %v4076_v10 = vmax.f32 %v4012_v51, 0.0 }
 0x3ae   :  { %v4077_v23 = vmax.f32 %v4013_v43, 0.0 }
 0x3af   :  { %v4078_v62 = vmax.f32 %v4014_v28, 0.0  ;;  %v3810_v18 = vpop.f32.mrb[124].mxu1 }
 0x3b0   :  { %v3939_v24 = vmul.f32 %v8851_v4, %v3810_v18  ;;  %v3812_v42 = vpop.f32.mrb[125].mxu1  ;;  %v4127_v0 = vpack.c.bf16 %v4077_v23, %v4075_v9 }
 0x3b1   :  { %v3940_v53 = vmul.f32 %v8854_v21, %v3812_v42  ;;  %v3814_v50 = vpop.f32.mrb[126].mxu1  ;;  %v4128_v54 = vpack.c.bf16 %v4078_v62, %v4076_v10 }
 0x3b2   :  { %v4015_v11 = vadd.f32 %v8857_v61, %v3939_v24  ;;  %v3941_v20 = vmul.f32 %v8851_v4, %v3814_v50  ;;  %v3816_v38 = vpop.f32.mrb[127].mxu1 }
 0x3b3   :  { %v4016_v22 = vadd.f32 %v8860_v63, %v3940_v53  ;;  %v3942_v25 = vmul.f32 %v8854_v21, %v3816_v38  ;;  %4355 = vmatprep.mubr.bf16.mxu0 %v4128_v54 }
 0x3b4   :  { %v4017_v6 = vadd.f32 %v8857_v61, %v3941_v20  ;;  %4356 = vmatmul.mubr.bf16.gmra.mrb[184].mxu0 %v4127_v0  ;;  %v4079_v7 = vmax.f32 %v4015_v11, 0.0 }
 0x3b5   :  { %v4018_v40 = vadd.f32 %v8860_v63, %v3942_v25  ;;  %v4080_v34 = vmax.f32 %v4016_v22, 0.0 }
 0x3b6   :  { %v4081_v57 = vmax.f32 %v4017_v6, 0.0 }
 0x3b7   :  { %v4082_v14 = vmax.f32 %v4018_v40, 0.0  ;;  %v3820_v31 = vpop.f32.mrb[128].mxu1 }
 0x3b8   :  { %v3943_v44 = vmul.f32 %v8851_v4, %v3820_v31  ;;  %v3822_v58 = vpop.f32.mrb[129].mxu1  ;;  %v4129_v46 = vpack.c.bf16 %v4081_v57, %v4079_v7 }
 0x3b9   :  { %v3944_v47 = vmul.f32 %v8854_v21, %v3822_v58  ;;  %v3824_v26 = vpop.f32.mrb[130].mxu1  ;;  %v4130_v60 = vpack.c.bf16 %v4082_v14, %v4080_v34 }
 0x3ba   :  { %v4019_v27 = vadd.f32 %v8857_v61, %v3943_v44  ;;  %v3945_v48 = vmul.f32 %v8851_v4, %v3824_v26  ;;  %v3826_v33 = vpop.f32.mrb[131].mxu1 }
 0x3bb   :  { %v4020_v30 = vadd.f32 %v8860_v63, %v3944_v47  ;;  %v3946_v19 = vmul.f32 %v8854_v21, %v3826_v33  ;;  %4363 = vmatprep.mubr.bf16.mxu0 %v4130_v60 }
 0x3bc   :  { %v4021_v5 = vadd.f32 %v8857_v61, %v3945_v48  ;;  %4364 = vmatmul.mubr.bf16.gmra.mrb[188].mxu0 %v4129_v46  ;;  %v4083_v59 = vmax.f32 %v4019_v27, 0.0 }
 0x3bd   :  { %v4022_v29 = vadd.f32 %v8860_v63, %v3946_v19  ;;  %v4084_v15 = vmax.f32 %v4020_v30, 0.0 }
 0x3be   :  { %v4085_v8 = vmax.f32 %v4021_v5, 0.0 }
 0x3bf   :  { %v4086_v37 = vmax.f32 %v4022_v29, 0.0  ;;  %v3830_v3 = vpop.f32.mrb[132].mxu1 }
 0x3c0   :  { %v3947_v13 = vmul.f32 %v8851_v4, %v3830_v3  ;;  %v3832_v12 = vpop.f32.mrb[133].mxu1  ;;  %v4131_v2 = vpack.c.bf16 %v4085_v8, %v4083_v59 }
 0x3c1   :  { %v3948_v41 = vmul.f32 %v8854_v21, %v3832_v12  ;;  %v3834_v45 = vpop.f32.mrb[134].mxu1  ;;  %v4132_v55 = vpack.c.bf16 %v4086_v37, %v4084_v15 }
 0x3c2   :  { %v4023_v16 = vadd.f32 %v8857_v61, %v3947_v13  ;;  %v3949_v49 = vmul.f32 %v8851_v4, %v3834_v45  ;;  %v3836_v56 = vpop.f32.mrb[135].mxu1 }
 0x3c3   :  { %v4024_v17 = vadd.f32 %v8860_v63, %v3948_v41  ;;  %v3950_v52 = vmul.f32 %v8854_v21, %v3836_v56  ;;  %4371 = vmatprep.mubr.bf16.mxu0 %v4132_v55  ;;  %v6629_v55 = vld [vmem:[%s9760_s10 + $0x20] sm:$0xff]  }
 0x3c4   :  { %v4025_v39 = vadd.f32 %v8857_v61, %v3949_v49  ;;  %4372 = vmatmul.mubr.bf16.gmra.mrb[192].mxu0 %v4131_v2  ;;  %v4087_v36 = vmax.f32 %v4023_v16, 0.0  ;;  %5937 = vmatprep.subr.bf16.mxu0 %v6629_v55 }
 0x3c5   :  { %v4026_v1 = vadd.f32 %v8860_v63, %v3950_v52  ;;  %v4088_v51 = vmax.f32 %v4024_v17, 0.0  ;;  %5938 = vmatpush3.bf16.msra.mxu0 %v6629_v55 }
 0x3c6   :  { %v4089_v35 = vmax.f32 %v4025_v39, 0.0 }
 0x3c7   :  { %v4090_v32 = vmax.f32 %v4026_v1, 0.0  ;;  %v3840_v43 = vpop.f32.mrb[136].mxu1 }
 0x3c8   :  { %v3951_v28 = vmul.f32 %v8851_v4, %v3840_v43  ;;  %v3842_v9 = vpop.f32.mrb[137].mxu1  ;;  %v4133_v23 = vpack.c.bf16 %v4089_v35, %v4087_v36  ;;  %v6630_v36 = vld [vmem:[%s9760_s10 + $0x28] sm:$0xff]  }
 0x3c9   :  { %v3952_v10 = vmul.f32 %v8854_v21, %v3842_v9  ;;  %v3844_v62 = vpop.f32.mrb[138].mxu1  ;;  %v4134_v18 = vpack.c.bf16 %v4090_v32, %v4088_v51  ;;  %5939 = vmatprep.subr.bf16.mxu0 %v6630_v36 }
 0x3ca   :  { %v4027_v24 = vadd.f32 %v8857_v61, %v3951_v28  ;;  %v3953_v42 = vmul.f32 %v8851_v4, %v3844_v62  ;;  %v3846_v0 = vpop.f32.mrb[139].mxu1  ;;  %5940 = vmatpush3.bf16.msra.mxu0 %v6630_v36 }
 0x3cb   :  { %v4028_v53 = vadd.f32 %v8860_v63, %v3952_v10  ;;  %v3954_v50 = vmul.f32 %v8854_v21, %v3846_v0  ;;  %4379 = vmatprep.mubr.bf16.mxu0 %v4134_v18 }
 0x3cc   :  { %v4029_v54 = vadd.f32 %v8857_v61, %v3953_v42  ;;  %4380 = vmatmul.mubr.bf16.gmra.mrb[196].mxu0 %v4133_v23  ;;  %v4091_v20 = vmax.f32 %v4027_v24, 0.0  ;;  %v6631_v42 = vld [vmem:[%s9760_s10 + $0x30] sm:$0xff]  }
 0x3cd   :  { %v4030_v11 = vadd.f32 %v8860_v63, %v3954_v50  ;;  %v4092_v22 = vmax.f32 %v4028_v53, 0.0  ;;  %5941 = vmatprep.subr.bf16.mxu0 %v6631_v42 }
 0x3ce   :  { %v4093_v38 = vmax.f32 %v4029_v54, 0.0  ;;  %5942 = vmatpush3.bf16.msra.mxu0 %v6631_v42 }
 0x3cf   :  { %v4094_v25 = vmax.f32 %v4030_v11, 0.0  ;;  %v3850_v6 = vpop.f32.mrb[140].mxu1 }
 0x3d0   :  { %v3955_v40 = vmul.f32 %v8851_v4, %v3850_v6  ;;  %v3852_v7 = vpop.f32.mrb[141].mxu1  ;;  %v4135_v57 = vpack.c.bf16 %v4093_v38, %v4091_v20 }
 0x3d1   :  { %v3956_v34 = vmul.f32 %v8854_v21, %v3852_v7  ;;  %v3854_v14 = vpop.f32.mrb[142].mxu1  ;;  %v4136_v31 = vpack.c.bf16 %v4094_v25, %v4092_v22  ;;  %v6632_v22 = vld [vmem:[%s9760_s10 + $0x38] sm:$0xff]  }
 0x3d2   :  { %v4031_v44 = vadd.f32 %v8857_v61, %v3955_v40  ;;  %v3957_v58 = vmul.f32 %v8851_v4, %v3854_v14  ;;  %v3856_v46 = vpop.f32.mrb[143].mxu1  ;;  %5943 = vmatprep.subr.bf16.mxu0 %v6632_v22 }
 0x3d3   :  { %v4032_v47 = vadd.f32 %v8860_v63, %v3956_v34  ;;  %v3958_v26 = vmul.f32 %v8854_v21, %v3856_v46  ;;  %4387 = vmatprep.mubr.bf16.mxu0 %v4136_v31  ;;  %5944 = vmatpush3.bf16.msra.mxu0 %v6632_v22 }
 0x3d4   :  { %v4033_v60 = vadd.f32 %v8857_v61, %v3957_v58  ;;  %4388 = vmatmul.mubr.bf16.gmra.mrb[200].mxu0 %v4135_v57  ;;  %v4095_v48 = vmax.f32 %v4031_v44, 0.0 }
 0x3d5   :  { %v4034_v27 = vadd.f32 %v8860_v63, %v3958_v26  ;;  %v4096_v30 = vmax.f32 %v4032_v47, 0.0 }
 0x3d6   :  { %v4097_v33 = vmax.f32 %v4033_v60, 0.0 }
 0x3d7   :  { %v4098_v19 = vmax.f32 %v4034_v27, 0.0  ;;  %v3860_v5 = vpop.f32.mrb[144].mxu1 }
 0x3d8   :  { %v3959_v29 = vmul.f32 %v8851_v4, %v3860_v5  ;;  %v3862_v59 = vpop.f32.mrb[145].mxu1  ;;  %v4137_v8 = vpack.c.bf16 %v4097_v33, %v4095_v48 }
 0x3d9   :  { %v3960_v15 = vmul.f32 %v8854_v21, %v3862_v59  ;;  %v3864_v37 = vpop.f32.mrb[146].mxu1  ;;  %v4138_v3 = vpack.c.bf16 %v4098_v19, %v4096_v30 }
 0x3da   :  { %v4035_v13 = vadd.f32 %v8857_v61, %v3959_v29  ;;  %v3961_v12 = vmul.f32 %v8851_v4, %v3864_v37  ;;  %v3866_v2 = vpop.f32.mrb[147].mxu1 }
 0x3db   :  { %v4036_v41 = vadd.f32 %v8860_v63, %v3960_v15  ;;  %v3962_v45 = vmul.f32 %v8854_v21, %v3866_v2  ;;  %4395 = vmatprep.mubr.bf16.mxu0 %v4138_v3 }
 0x3dc   :  { %v4037_v16 = vadd.f32 %v8857_v61, %v3961_v12  ;;  %4396 = vmatmul.mubr.bf16.gmra.mrb[204].mxu0 %v4137_v8  ;;  %v4099_v56 = vmax.f32 %v4035_v13, 0.0 }
 0x3dd   :  { %v4038_v49 = vadd.f32 %v8860_v63, %v3962_v45  ;;  %v4100_v52 = vmax.f32 %v4036_v41, 0.0 }
 0x3de   :  { %v4101_v17 = vmax.f32 %v4037_v16, 0.0 }
 0x3df   :  { %v4102_v39 = vmax.f32 %v4038_v49, 0.0  ;;  %v3870_v1 = vpop.f32.mrb[148].mxu1 }
 0x3e0   :  { %v3963_v35 = vmul.f32 %v8851_v4, %v3870_v1  ;;  %v3872_v51 = vpop.f32.mrb[149].mxu1  ;;  %v4139_v32 = vpack.c.bf16 %v4101_v17, %v4099_v56 }
 0x3e1   :  { %v3964_v43 = vmul.f32 %v8854_v21, %v3872_v51  ;;  %v3874_v28 = vpop.f32.mrb[150].mxu1  ;;  %v4140_v9 = vpack.c.bf16 %v4102_v39, %v4100_v52 }
 0x3e2   :  { %v4039_v23 = vadd.f32 %v8857_v61, %v3963_v35  ;;  %v3965_v10 = vmul.f32 %v8851_v4, %v3874_v28  ;;  %v3876_v62 = vpop.f32.mrb[151].mxu1 }
 0x3e3   :  { %v4040_v18 = vadd.f32 %v8860_v63, %v3964_v43  ;;  %v3966_v24 = vmul.f32 %v8854_v21, %v3876_v62  ;;  %4403 = vmatprep.mubr.bf16.mxu0 %v4140_v9 }
 0x3e4   :  { %v4041_v0 = vadd.f32 %v8857_v61, %v3965_v10  ;;  %4404 = vmatmul.mubr.bf16.gmra.mrb[208].mxu0 %v4139_v32  ;;  %v4103_v50 = vmax.f32 %v4039_v23, 0.0 }
 0x3e5   :  { %v4042_v53 = vadd.f32 %v8860_v63, %v3966_v24  ;;  %v4104_v11 = vmax.f32 %v4040_v18, 0.0 }
 0x3e6   :  { %v4105_v54 = vmax.f32 %v4041_v0, 0.0 }
 0x3e7   :  { %v4106_v20 = vmax.f32 %v4042_v53, 0.0  ;;  %v3880_v38 = vpop.f32.mrb[152].mxu1 }
 0x3e8   :  { %v3967_v25 = vmul.f32 %v8851_v4, %v3880_v38  ;;  %v3882_v6 = vpop.f32.mrb[153].mxu1  ;;  %v4141_v40 = vpack.c.bf16 %v4105_v54, %v4103_v50 }
 0x3e9   :  { %v3968_v7 = vmul.f32 %v8854_v21, %v3882_v6  ;;  %v3884_v57 = vpop.f32.mrb[154].mxu1  ;;  %v4142_v34 = vpack.c.bf16 %v4106_v20, %v4104_v11 }
 0x3ea   :  { %v4043_v14 = vadd.f32 %v8857_v61, %v3967_v25  ;;  %v3969_v31 = vmul.f32 %v8851_v4, %v3884_v57  ;;  %v3886_v44 = vpop.f32.mrb[155].mxu1 }
 0x3eb   :  { %v4044_v58 = vadd.f32 %v8860_v63, %v3968_v7  ;;  %v3970_v46 = vmul.f32 %v8854_v21, %v3886_v44  ;;  %4411 = vmatprep.mubr.bf16.mxu0 %v4142_v34 }
 0x3ec   :  { %v4045_v47 = vadd.f32 %v8857_v61, %v3969_v31  ;;  %4412 = vmatmul.mubr.bf16.gmra.mrb[212].mxu0 %v4141_v40  ;;  %v4107_v60 = vmax.f32 %v4043_v14, 0.0 }
 0x3ed   :  { %v4046_v26 = vadd.f32 %v8860_v63, %v3970_v46  ;;  %v4108_v48 = vmax.f32 %v4044_v58, 0.0 }
 0x3ee   :  { %v4109_v27 = vmax.f32 %v4045_v47, 0.0 }
 0x3ef   :  { %v4110_v33 = vmax.f32 %v4046_v26, 0.0  ;;  %v3890_v30 = vpop.f32.mrb[156].mxu1 }
 0x3f0   :  { %v3971_v19 = vmul.f32 %v8851_v4, %v3890_v30  ;;  %v3892_v5 = vpop.f32.mrb[157].mxu1  ;;  %v4143_v29 = vpack.c.bf16 %v4109_v27, %v4107_v60 }
 0x3f1   :  { %v3972_v59 = vmul.f32 %v8854_v21, %v3892_v5  ;;  %v3894_v8 = vpop.f32.mrb[158].mxu1  ;;  %v4144_v15 = vpack.c.bf16 %v4110_v33, %v4108_v48 }
 0x3f2   :  { %v4047_v37 = vadd.f32 %v8857_v61, %v3971_v19  ;;  %v3973_v3 = vmul.f32 %v8851_v4, %v3894_v8  ;;  %v3896_v13 = vpop.f32.mrb[159].mxu1 }
 0x3f3   :  { %v4048_v12 = vadd.f32 %v8860_v63, %v3972_v59  ;;  %v3974_v2 = vmul.f32 %v8854_v21, %v3896_v13  ;;  %4419 = vmatprep.mubr.bf16.mxu0 %v4144_v15  ;;  %v9017_v21 = vld [vmem:[%s9758_s8] ss:$0 sm:$0xff] }
 0x3f4   :  { %v4049_v41 = vadd.f32 %v8857_v61, %v3973_v3  ;;  %4420 = vmatmul.mubr.bf16.gmra.mrb[216].mxu0 %v4143_v29  ;;  %v4111_v55 = vmax.f32 %v4047_v37, 0.0 }
 0x3f5   :  { %v4050_v45 = vadd.f32 %v8860_v63, %v3974_v2  ;;  %v4112_v49 = vmax.f32 %v4048_v12, 0.0  ;;  %v9022_v63 = vld [vmem:[%s9759_s9] ss:$0 sm:$0xff] }
 0x3f6   :  { %v4113_v16 = vmax.f32 %v4049_v41, 0.0 }
 0x3f7   :  { %v4114_v56 = vmax.f32 %v4050_v45, 0.0 }
 0x3f8   :  { %v4145_v17 = vpack.c.bf16 %v4113_v16, %v4111_v55 }
 0x3f9   :  { %v4146_v52 = vpack.c.bf16 %v4114_v56, %v4112_v49 }
 0x3fb   :  { %4427 = vmatprep.mubr.bf16.mxu0 %v4146_v52 }
 0x3fc   :  { %4428 = vmatmul.mubr.bf16.gmra.mrb[220].mxu0 %v4145_v17 }
 0x457   :  { %v5761_v4 = vpop.f32.mrb[160].mxu0 }
 0x458   :  { %v5762_v39 = vpop.f32.mrb[161].mxu0 }
 0x459   :  { %v5763_v1 = vadd.f32 %v5762_v39, %v5761_v4  ;;  %v5764_v61 = vpop.f32.mrb[162].mxu0 }
 0x45a   :  { %v5765_v36 = vpop.f32.mrb[163].mxu0 }
 0x45b   :  { %v4443_v35 = vmul.f32 %v5763_v1, %v9017_v21  ;;  %v5766_v51 = vadd.f32 %v5765_v36, %v5764_v61 }
 0x45d   :  { %v4482_v32 = vadd.f32 %v9022_v63, %v4443_v35  ;;  %v4444_v43 = vmul.f32 %v5766_v51, %v9017_v21 }
 0x45f   :  { %v4483_v28 = vadd.f32 %v9022_v63, %v4444_v43  ;;  %v5767_v9 = vpop.f32.mrb[164].mxu0  ;;  %v4514_v10 = vmax.f32 %v4482_v32, 0.0 }
 0x460   :  { %v5768_v23 = vpop.f32.mrb[165].mxu0 }
 0x461   :  { %v4515_v62 = vmax.f32 %v4483_v28, 0.0  ;;  %v5769_v18 = vadd.f32 %v5768_v23, %v5767_v9  ;;  %v5770_v24 = vpop.f32.mrb[166].mxu0 }
 0x462   :  { %v5771_v42 = vpop.f32.mrb[167].mxu0 }
 0x463   :  { %v4445_v0 = vmul.f32 %v5769_v18, %v9017_v21  ;;  %v5772_v53 = vadd.f32 %v5771_v42, %v5770_v24  ;;  %v4546_v50 = vpack.c.bf16 %v4515_v62, %v4514_v10 }
 0x465   :  { %v4484_v54 = vadd.f32 %v9022_v63, %v4445_v0  ;;  %v4446_v11 = vmul.f32 %v5772_v53, %v9017_v21  ;;  %5945 = vmatprep.mubr.bf16.mxu0 %v4546_v50 }
 0x467   :  { %v4485_v20 = vadd.f32 %v9022_v63, %v4446_v11  ;;  %v5773_v38 = vpop.f32.mrb[168].mxu0  ;;  %v4516_v25 = vmax.f32 %v4484_v54, 0.0 }
 0x468   :  { %v5774_v22 = vpop.f32.mrb[169].mxu0 }
 0x469   :  { %v4517_v6 = vmax.f32 %v4485_v20, 0.0  ;;  %v5775_v40 = vadd.f32 %v5774_v22, %v5773_v38  ;;  %v5776_v7 = vpop.f32.mrb[170].mxu0 }
 0x46a   :  { %v5777_v57 = vpop.f32.mrb[171].mxu0 }
 0x46b   :  { %v4547_v34 = vpack.c.bf16 %v4517_v6, %v4516_v25  ;;  %v4447_v14 = vmul.f32 %v5775_v40, %v9017_v21  ;;  %v5778_v31 = vadd.f32 %v5777_v57, %v5776_v7 }
 0x46d   :  { %v4486_v44 = vadd.f32 %v9022_v63, %v4447_v14  ;;  %v4448_v58 = vmul.f32 %v5778_v31, %v9017_v21  ;;  %5946 = vmatmul.mubr.bf16.vlgmr.msra.gmra.mrb[224].mxu0 %v4547_v34 }
 0x46f   :  { %v4487_v46 = vadd.f32 %v9022_v63, %v4448_v58  ;;  %v5779_v47 = vpop.f32.mrb[172].mxu0  ;;  %v4518_v60 = vmax.f32 %v4486_v44, 0.0 }
 0x470   :  { %v5780_v26 = vpop.f32.mrb[173].mxu0 }
 0x471   :  { %v4519_v27 = vmax.f32 %v4487_v46, 0.0  ;;  %v5781_v48 = vadd.f32 %v5780_v26, %v5779_v47  ;;  %v5782_v33 = vpop.f32.mrb[174].mxu0 }
 0x472   :  { %v5783_v30 = vpop.f32.mrb[175].mxu0 }
 0x473   :  { %v4449_v19 = vmul.f32 %v5781_v48, %v9017_v21  ;;  %v5784_v5 = vadd.f32 %v5783_v30, %v5782_v33  ;;  %v4548_v29 = vpack.c.bf16 %v4519_v27, %v4518_v60 }
 0x475   :  { %v4488_v59 = vadd.f32 %v9022_v63, %v4449_v19  ;;  %v4450_v8 = vmul.f32 %v5784_v5, %v9017_v21  ;;  %5949 = vmatprep.mubr.bf16.mxu0 %v4548_v29 }
 0x477   :  { %v4489_v15 = vadd.f32 %v9022_v63, %v4450_v8  ;;  %v5785_v37 = vpop.f32.mrb[176].mxu0  ;;  %v4520_v13 = vmax.f32 %v4488_v59, 0.0 }
 0x478   :  { %v5786_v3 = vpop.f32.mrb[177].mxu0 }
 0x479   :  { %v4521_v12 = vmax.f32 %v4489_v15, 0.0  ;;  %v5787_v2 = vadd.f32 %v5786_v3, %v5785_v37  ;;  %v5788_v41 = vpop.f32.mrb[178].mxu0 }
 0x47a   :  { %v5789_v45 = vpop.f32.mrb[179].mxu0 }
 0x47b   :  { %v4451_v55 = vmul.f32 %v5787_v2, %v9017_v21  ;;  %v5790_v16 = vadd.f32 %v5789_v45, %v5788_v41  ;;  %v4549_v49 = vpack.c.bf16 %v4521_v12, %v4520_v13 }
 0x47d   :  { %v4490_v56 = vadd.f32 %v9022_v63, %v4451_v55  ;;  %v4452_v17 = vmul.f32 %v5790_v16, %v9017_v21  ;;  %5950 = vmatmul.mubr.bf16.gmra.mrb[228].mxu0 %v4549_v49 }
 0x47f   :  { %v4491_v52 = vadd.f32 %v9022_v63, %v4452_v17  ;;  %v5791_v4 = vpop.f32.mrb[180].mxu0  ;;  %v4522_v1 = vmax.f32 %v4490_v56, 0.0 }
 0x480   :  { %v5792_v39 = vpop.f32.mrb[181].mxu0 }
 0x481   :  { %v4523_v61 = vmax.f32 %v4491_v52, 0.0  ;;  %v5793_v36 = vadd.f32 %v5792_v39, %v5791_v4  ;;  %v5794_v35 = vpop.f32.mrb[182].mxu0 }
 0x482   :  { %v5795_v51 = vpop.f32.mrb[183].mxu0 }
 0x483   :  { %v4453_v32 = vmul.f32 %v5793_v36, %v9017_v21  ;;  %v5796_v43 = vadd.f32 %v5795_v51, %v5794_v35  ;;  %v4550_v28 = vpack.c.bf16 %v4523_v61, %v4522_v1 }
 0x485   :  { %v4492_v9 = vadd.f32 %v9022_v63, %v4453_v32  ;;  %v4454_v23 = vmul.f32 %v5796_v43, %v9017_v21  ;;  %5953 = vmatprep.mubr.bf16.mxu0 %v4550_v28 }
 0x487   :  { %v4493_v10 = vadd.f32 %v9022_v63, %v4454_v23  ;;  %v5797_v62 = vpop.f32.mrb[184].mxu0  ;;  %v4524_v24 = vmax.f32 %v4492_v9, 0.0 }
 0x488   :  { %v5798_v18 = vpop.f32.mrb[185].mxu0 }
 0x489   :  { %v4525_v42 = vmax.f32 %v4493_v10, 0.0  ;;  %v5799_v0 = vadd.f32 %v5798_v18, %v5797_v62  ;;  %v5800_v53 = vpop.f32.mrb[186].mxu0 }
 0x48a   :  { %v5801_v50 = vpop.f32.mrb[187].mxu0 }
 0x48b   :  { %v4455_v54 = vmul.f32 %v5799_v0, %v9017_v21  ;;  %v5802_v11 = vadd.f32 %v5801_v50, %v5800_v53  ;;  %v4551_v20 = vpack.c.bf16 %v4525_v42, %v4524_v24 }
 0x48d   :  { %v4494_v38 = vadd.f32 %v9022_v63, %v4455_v54  ;;  %v4456_v22 = vmul.f32 %v5802_v11, %v9017_v21  ;;  %5954 = vmatmul.mubr.bf16.gmra.mrb[232].mxu0 %v4551_v20 }
 0x48f   :  { %v4495_v25 = vadd.f32 %v9022_v63, %v4456_v22  ;;  %v5803_v6 = vpop.f32.mrb[188].mxu0  ;;  %v4526_v7 = vmax.f32 %v4494_v38, 0.0 }
 0x490   :  { %v5804_v40 = vpop.f32.mrb[189].mxu0 }
 0x491   :  { %v4527_v57 = vmax.f32 %v4495_v25, 0.0  ;;  %v5805_v34 = vadd.f32 %v5804_v40, %v5803_v6  ;;  %v5806_v14 = vpop.f32.mrb[190].mxu0 }
 0x492   :  { %v5807_v31 = vpop.f32.mrb[191].mxu0 }
 0x493   :  { %v4457_v44 = vmul.f32 %v5805_v34, %v9017_v21  ;;  %v5808_v58 = vadd.f32 %v5807_v31, %v5806_v14  ;;  %v4552_v46 = vpack.c.bf16 %v4527_v57, %v4526_v7 }
 0x495   :  { %v4496_v47 = vadd.f32 %v9022_v63, %v4457_v44  ;;  %v4458_v26 = vmul.f32 %v5808_v58, %v9017_v21  ;;  %5957 = vmatprep.mubr.bf16.mxu0 %v4552_v46 }
 0x497   :  { %v4497_v60 = vadd.f32 %v9022_v63, %v4458_v26  ;;  %v5809_v27 = vpop.f32.mrb[192].mxu0  ;;  %v4528_v33 = vmax.f32 %v4496_v47, 0.0 }
 0x498   :  { %v5810_v48 = vpop.f32.mrb[193].mxu0 }
 0x499   :  { %v4529_v30 = vmax.f32 %v4497_v60, 0.0  ;;  %v5811_v19 = vadd.f32 %v5810_v48, %v5809_v27  ;;  %v5812_v5 = vpop.f32.mrb[194].mxu0 }
 0x49a   :  { %v5813_v29 = vpop.f32.mrb[195].mxu0 }
 0x49b   :  { %v4459_v59 = vmul.f32 %v5811_v19, %v9017_v21  ;;  %v5814_v8 = vadd.f32 %v5813_v29, %v5812_v5  ;;  %v4553_v15 = vpack.c.bf16 %v4529_v30, %v4528_v33 }
 0x49d   :  { %v4498_v37 = vadd.f32 %v9022_v63, %v4459_v59  ;;  %v4460_v3 = vmul.f32 %v5814_v8, %v9017_v21  ;;  %5958 = vmatmul.mubr.bf16.gmra.mrb[236].mxu0 %v4553_v15 }
 0x49f   :  { %v4499_v13 = vadd.f32 %v9022_v63, %v4460_v3  ;;  %v5815_v12 = vpop.f32.mrb[196].mxu0  ;;  %v4530_v41 = vmax.f32 %v4498_v37, 0.0 }
 0x4a0   :  { %v5816_v2 = vpop.f32.mrb[197].mxu0 }
 0x4a1   :  { %v4531_v45 = vmax.f32 %v4499_v13, 0.0  ;;  %v5817_v55 = vadd.f32 %v5816_v2, %v5815_v12  ;;  %v5818_v16 = vpop.f32.mrb[198].mxu0 }
 0x4a2   :  { %v5819_v49 = vpop.f32.mrb[199].mxu0 }
 0x4a3   :  { %v4461_v56 = vmul.f32 %v5817_v55, %v9017_v21  ;;  %v5820_v17 = vadd.f32 %v5819_v49, %v5818_v16  ;;  %v4554_v52 = vpack.c.bf16 %v4531_v45, %v4530_v41 }
 0x4a5   :  { %v4500_v4 = vadd.f32 %v9022_v63, %v4461_v56  ;;  %v4462_v39 = vmul.f32 %v5820_v17, %v9017_v21  ;;  %5961 = vmatprep.mubr.bf16.mxu0 %v4554_v52 }
 0x4a7   :  { %v4501_v1 = vadd.f32 %v9022_v63, %v4462_v39  ;;  %v5821_v61 = vpop.f32.mrb[200].mxu0  ;;  %v4532_v35 = vmax.f32 %v4500_v4, 0.0 }
 0x4a8   :  { %v5822_v36 = vpop.f32.mrb[201].mxu0 }
 0x4a9   :  { %v4533_v51 = vmax.f32 %v4501_v1, 0.0  ;;  %v5823_v32 = vadd.f32 %v5822_v36, %v5821_v61  ;;  %v5824_v43 = vpop.f32.mrb[202].mxu0 }
 0x4aa   :  { %v5825_v28 = vpop.f32.mrb[203].mxu0 }
 0x4ab   :  { %v4463_v9 = vmul.f32 %v5823_v32, %v9017_v21  ;;  %v5826_v23 = vadd.f32 %v5825_v28, %v5824_v43  ;;  %v4555_v10 = vpack.c.bf16 %v4533_v51, %v4532_v35 }
 0x4ad   :  { %v4502_v62 = vadd.f32 %v9022_v63, %v4463_v9  ;;  %v4464_v18 = vmul.f32 %v5826_v23, %v9017_v21  ;;  %5962 = vmatmul.mubr.bf16.gmra.mrb[240].mxu0 %v4555_v10 }
 0x4af   :  { %v4503_v24 = vadd.f32 %v9022_v63, %v4464_v18  ;;  %v5827_v42 = vpop.f32.mrb[204].mxu0  ;;  %v4534_v53 = vmax.f32 %v4502_v62, 0.0 }
 0x4b0   :  { %v5828_v0 = vpop.f32.mrb[205].mxu0 }
 0x4b1   :  { %v4535_v50 = vmax.f32 %v4503_v24, 0.0  ;;  %v5829_v54 = vadd.f32 %v5828_v0, %v5827_v42  ;;  %v5830_v11 = vpop.f32.mrb[206].mxu0 }
 0x4b2   :  { %v5831_v20 = vpop.f32.mrb[207].mxu0 }
 0x4b3   :  { %v4465_v38 = vmul.f32 %v5829_v54, %v9017_v21  ;;  %v5832_v22 = vadd.f32 %v5831_v20, %v5830_v11  ;;  %v4556_v25 = vpack.c.bf16 %v4535_v50, %v4534_v53  ;;  %v9908_v20 = vlaneseq }
 0x4b5   :  { %v4504_v6 = vadd.f32 %v9022_v63, %v4465_v38  ;;  %v4466_v40 = vmul.f32 %v5832_v22, %v9017_v21  ;;  %5965 = vmatprep.mubr.bf16.mxu0 %v4556_v25  ;;  %v9089_v38 = vand.u32 127, %v9908_v20  ;;  %v9094_v22 = vld [vmem:[%s9761_s11] ss:$0 sm:$0xff]  ;;  %s6915_s11 = smov [#allocation2]  }
 0x4b6   :  { %s5315_s1 = sshll.u32 %s6915_s11, 4  ;;  %s5316_s1 = int_to_ptr.vmem [resolvable:$true] %s5315_s1 }
 0x4b7   :  { %v4505_v7 = vadd.f32 %v9022_v63, %v4466_v40  ;;  %v5833_v57 = vpop.f32.mrb[208].mxu0  ;;  %v4536_v14 = vmax.f32 %v4504_v6, 0.0  ;;  %vm4796_vm1 = vcmp.lt.s32.totalorder %v9089_v38, 8  ;;  %vm5181_vm2 = vcmp.eq.s32.totalorder %v9089_v38, 8  ;;  %s6890_s17 = scalar_lea.vmem %s5316_s1, 4096  ;;  %p6895_p1 = scmp.lt.s32.totalorder %s5316_s1, %s5316_s1 }
 0x4b8   :  { %v5834_v34 = vpop.f32.mrb[209].mxu0  ;;  %p6891_p0 = scmp.ne.s32.totalorder %s5316_s1, %s6890_s17  ;;  %p6896_p2 = scmp.lt.s32.totalorder %s6890_s17, %s6890_s17 }
 0x4b9   :  { %v4537_v31 = vmax.f32 %v4505_v7, 0.0  ;;  %v5835_v44 = vadd.f32 %v5834_v34, %v5833_v57  ;;  %v5836_v58 = vpop.f32.mrb[210].mxu0 }
 0x4ba   :  { %v5837_v46 = vpop.f32.mrb[211].mxu0  ;;  %p6897_p3 = por %p6896_p2, %p6895_p1 }
 0x4bb   :  { %v4467_v47 = vmul.f32 %v5835_v44, %v9017_v21  ;;  %v5838_v26 = vadd.f32 %v5837_v46, %v5836_v58  ;;  %v4557_v60 = vpack.c.bf16 %v4537_v31, %v4536_v14 }
 0x4bc   :  { %p6898_p4 = pnand %p6897_p3, %p6891_p0 }
 0x4bd   :  { %v4506_v27 = vadd.f32 %v9022_v63, %v4467_v47  ;;  %v4468_v48 = vmul.f32 %v5838_v26, %v9017_v21  ;;  %5966 = vmatmul.mubr.bf16.gmra.mrb[244].mxu0 %v4557_v60 }
 0x4bf   :  { %v4507_v33 = vadd.f32 %v9022_v63, %v4468_v48  ;;  %v5839_v30 = vpop.f32.mrb[212].mxu0  ;;  %v4538_v5 = vmax.f32 %v4506_v27, 0.0 }
 0x4c0   :  { %v5840_v19 = vpop.f32.mrb[213].mxu0 }
 0x4c1   :  { %v4539_v29 = vmax.f32 %v4507_v33, 0.0  ;;  %v5841_v59 = vadd.f32 %v5840_v19, %v5839_v30  ;;  %v5842_v8 = vpop.f32.mrb[214].mxu0 }
 0x4c2   :  { %v5843_v15 = vpop.f32.mrb[215].mxu0 }
 0x4c3   :  { %v4469_v37 = vmul.f32 %v5841_v59, %v9017_v21  ;;  %v5844_v3 = vadd.f32 %v5843_v15, %v5842_v8  ;;  %v4558_v13 = vpack.c.bf16 %v4539_v29, %v4538_v5 }
 0x4c5   :  { %v4508_v12 = vadd.f32 %v9022_v63, %v4469_v37  ;;  %v4470_v2 = vmul.f32 %v5844_v3, %v9017_v21  ;;  %5969 = vmatprep.mubr.bf16.mxu0 %v4558_v13 }
 0x4c7   :  { %v4509_v41 = vadd.f32 %v9022_v63, %v4470_v2  ;;  %v5845_v45 = vpop.f32.mrb[216].mxu0  ;;  %v4540_v16 = vmax.f32 %v4508_v12, 0.0 }
 0x4c8   :  { %v5846_v55 = vpop.f32.mrb[217].mxu0 }
 0x4c9   :  { %v4541_v49 = vmax.f32 %v4509_v41, 0.0  ;;  %v5847_v56 = vadd.f32 %v5846_v55, %v5845_v45  ;;  %v5848_v17 = vpop.f32.mrb[218].mxu0 }
 0x4ca   :  { %v5849_v52 = vpop.f32.mrb[219].mxu0 }
 0x4cb   :  { %v4471_v4 = vmul.f32 %v5847_v56, %v9017_v21  ;;  %v5850_v39 = vadd.f32 %v5849_v52, %v5848_v17  ;;  %v4559_v1 = vpack.c.bf16 %v4541_v49, %v4540_v16 }
 0x4cd   :  { %v4510_v61 = vadd.f32 %v9022_v63, %v4471_v4  ;;  %v4472_v36 = vmul.f32 %v5850_v39, %v9017_v21  ;;  %5970 = vmatmul.mubr.bf16.gmra.mrb[248].mxu0 %v4559_v1 }
 0x4cf   :  { %v4511_v35 = vadd.f32 %v9022_v63, %v4472_v36  ;;  %v5851_v51 = vpop.f32.mrb[220].mxu0  ;;  %v4542_v43 = vmax.f32 %v4510_v61, 0.0 }
 0x4d0   :  { %v5852_v32 = vpop.f32.mrb[221].mxu0 }
 0x4d1   :  { %v4543_v28 = vmax.f32 %v4511_v35, 0.0  ;;  %v5853_v9 = vadd.f32 %v5852_v32, %v5851_v51  ;;  %v5854_v23 = vpop.f32.mrb[222].mxu0 }
 0x4d2   :  { %v5855_v10 = vpop.f32.mrb[223].mxu0 }
 0x4d3   :  { %v4473_v62 = vmul.f32 %v5853_v9, %v9017_v21  ;;  %v5856_v18 = vadd.f32 %v5855_v10, %v5854_v23  ;;  %v4560_v24 = vpack.c.bf16 %v4543_v28, %v4542_v43 }
 0x4d5   :  { %v4512_v42 = vadd.f32 %v9022_v63, %v4473_v62  ;;  %v4474_v0 = vmul.f32 %v5856_v18, %v9017_v21  ;;  %5973 = vmatprep.mubr.bf16.mxu0 %v4560_v24 }
 0x4d7   :  { %v4513_v53 = vadd.f32 %v9022_v63, %v4474_v0  ;;  %v4544_v50 = vmax.f32 %v4512_v42, 0.0 }
 0x4d9   :  { %v4545_v54 = vmax.f32 %v4513_v53, 0.0 }
 0x4db   :  { %v4561_v11 = vpack.c.bf16 %v4545_v54, %v4544_v50 }
 0x4dd   :  { %5974 = vmatmul.mubr.bf16.gmra.mrb[252].mxu0 %v4561_v11 }
 0x540   :  { %v5947_v25 = vpop.f32.mrb[224].mxu0 }
 0x541   :  { %v9098_v21 = vadd.f32 %v5947_v25, %v9094_v22  ;;  %v4667_v6 = vpop.f32.mrb[225].mxu0 }
 0x542   :  { %v9101_v63 = vadd.f32 %v9094_v22, %v4667_v6  ;;  %v5948_v40 = vpop.f32.mrb[226].mxu0 }
 0x543   :  { %v9104_v7 = vadd.f32 %v5948_v40, %v9094_v22  ;;  %v4670_v57 = vpop.f32.mrb[227].mxu0  ;;  %v9109_v34 = vsel %vm4796_vm1, %v9098_v21, -1e+30 }
 0x544   :  { %v9112_v14 = vadd.f32 %v9094_v22, %v4670_v57  ;;  %4833 = vmax.xlane.f32.xlu1 %v9109_v34  ;;  %v9118_v31 = vsel %vm4796_vm1, %v9101_v63, -1e+30 }
 0x545   :  { %4829 = vmax.xlane.f32.xlu0 %v9118_v31  ;;  %v9124_v44 = vsel %vm4796_vm1, %v9104_v7, -1e+30 }
 0x546   :  { %v9130_v58 = vsel %vm4796_vm1, %v9112_v14, -1e+30 }
 0x548   :  { %4835 = vmax.xlane.f32.xlu1 %v9124_v44 }
 0x549   :  { %4831 = vmax.xlane.f32.xlu0 %v9130_v58 }
 0x550   :  { %v5951_v46 = vpop.f32.mrb[228].mxu0 }
 0x551   :  { %v9134_v47 = vadd.f32 %v5951_v46, %v9094_v22  ;;  %v4683_v26 = vpop.f32.mrb[229].mxu0 }
 0x552   :  { %v5952_v60 = vpop.f32.mrb[230].mxu0  ;;  %v9137_v27 = vadd.f32 %v9094_v22, %v4683_v26 }
 0x553   :  { %v9140_v48 = vadd.f32 %v5952_v60, %v9094_v22  ;;  %v4686_v33 = vpop.f32.mrb[231].mxu0  ;;  %v9145_v30 = vsel %vm4796_vm1, %v9134_v47, -1e+30 }
 0x554   :  { %4841 = vmax.xlane.f32.xlu0 %v9145_v30  ;;  %v9149_v19 = vadd.f32 %v9094_v22, %v4686_v33  ;;  %v9160_v29 = vsel %vm4796_vm1, %v9137_v27, -1e+30 }
 0x555   :  { %v9154_v5 = vsel %vm4796_vm1, %v9140_v48, -1e+30 }
 0x556   :  { %4843 = vmax.xlane.f32.xlu1 %v9154_v5  ;;  %v9166_v59 = vsel %vm4796_vm1, %v9149_v19, -1e+30 }
 0x558   :  { %4837 = vmax.xlane.f32.xlu0 %v9160_v29 }
 0x55a   :  { %4839 = vmax.xlane.f32.xlu1 %v9166_v59 }
 0x560   :  { %v5955_v8 = vpop.f32.mrb[232].mxu0 }
 0x561   :  { %v9170_v15 = vadd.f32 %v5955_v8, %v9094_v22  ;;  %v4699_v37 = vpop.f32.mrb[233].mxu0 }
 0x562   :  { %v5956_v3 = vpop.f32.mrb[234].mxu0  ;;  %v9173_v13 = vadd.f32 %v9094_v22, %v4699_v37 }
 0x563   :  { %v9176_v12 = vadd.f32 %v5956_v3, %v9094_v22  ;;  %v4702_v2 = vpop.f32.mrb[235].mxu0  ;;  %v9181_v41 = vsel %vm4796_vm1, %v9170_v15, -1e+30 }
 0x564   :  { %9909 = vst [vmem:[#allocation8_spill] sm:$0xff] %v9181_v41  ;;  %4849 = vmax.xlane.f32.xlu0 %v9181_v41  ;;  %v9185_v45 = vadd.f32 %v9094_v22, %v4702_v2  ;;  %v9196_v16 = vsel %vm4796_vm1, %v9173_v13, -1e+30 }
 0x565   :  { %v9190_v55 = vsel %vm4796_vm1, %v9176_v12, -1e+30 }
 0x566   :  { %9910 = vst [vmem:[#allocation5_spill] sm:$0xff] %v9185_v45  ;;  %9911 = vst [vmem:[#allocation10_spill] sm:$0xff] %v9190_v55  ;;  %4851 = vmax.xlane.f32.xlu1 %v9190_v55  ;;  %v9202_v49 = vsel %vm4796_vm1, %v9185_v45, -1e+30 }
 0x567   :  { %9912 = vst [vmem:[#allocation9_spill] sm:$0xff] %v9202_v49 }
 0x568   :  { %4845 = vmax.xlane.f32.xlu0 %v9196_v16 }
 0x56a   :  { %4847 = vmax.xlane.f32.xlu1 %v9202_v49 }
 0x570   :  { %v5959_v56 = vpop.f32.mrb[236].mxu0 }
 0x571   :  { %v9206_v17 = vadd.f32 %v5959_v56, %v9094_v22  ;;  %v4715_v52 = vpop.f32.mrb[237].mxu0 }
 0x572   :  { %v5960_v4 = vpop.f32.mrb[238].mxu0  ;;  %v9209_v39 = vadd.f32 %v9094_v22, %v4715_v52 }
 0x573   :  { %9913 = vst [vmem:[#allocation12_spill] sm:$0xff] %v9206_v17  ;;  %v9212_v1 = vadd.f32 %v5960_v4, %v9094_v22  ;;  %v4718_v61 = vpop.f32.mrb[239].mxu0  ;;  %v9217_v36 = vsel %vm4796_vm1, %v9206_v17, -1e+30 }
 0x574   :  { %9914 = vst [vmem:[#allocation11_spill] sm:$0xff] %v9209_v39  ;;  %9916 = vst [vmem:[#allocation25_spill] sm:$0xff] %v9217_v36  ;;  %4857 = vmax.xlane.f32.xlu0 %v9217_v36  ;;  %v9221_v35 = vadd.f32 %v9094_v22, %v4718_v61  ;;  %v9232_v32 = vsel %vm4796_vm1, %v9209_v39, -1e+30 }
 0x575   :  { %9915 = vst [vmem:[#allocation14_spill] sm:$0xff] %v9212_v1  ;;  %v9226_v51 = vsel %vm4796_vm1, %v9212_v1, -1e+30 }
 0x576   :  { %9917 = vst [vmem:[#allocation26_spill] sm:$0xff] %v9221_v35  ;;  %9918 = vst [vmem:[#allocation13_spill] sm:$0xff] %v9226_v51  ;;  %4859 = vmax.xlane.f32.xlu1 %v9226_v51  ;;  %v9238_v43 = vsel %vm4796_vm1, %v9221_v35, -1e+30 }
 0x577   :  { %9919 = vst [vmem:[#allocation16_spill] sm:$0xff] %v9238_v43 }
 0x578   :  { %4853 = vmax.xlane.f32.xlu0 %v9232_v32 }
 0x57a   :  { %4855 = vmax.xlane.f32.xlu1 %v9238_v43 }
 0x580   :  { %v5963_v28 = vpop.f32.mrb[240].mxu0 }
 0x581   :  { %v9242_v9 = vadd.f32 %v5963_v28, %v9094_v22  ;;  %v4731_v23 = vpop.f32.mrb[241].mxu0 }
 0x582   :  { %v5964_v10 = vpop.f32.mrb[242].mxu0  ;;  %v9245_v62 = vadd.f32 %v9094_v22, %v4731_v23 }
 0x583   :  { %9920 = vst [vmem:[#allocation28_spill] sm:$0xff] %v9242_v9  ;;  %v9248_v18 = vadd.f32 %v5964_v10, %v9094_v22  ;;  %v4734_v24 = vpop.f32.mrb[243].mxu0  ;;  %v9253_v42 = vsel %vm4796_vm1, %v9242_v9, -1e+30 }
 0x584   :  { %9921 = vst [vmem:[#allocation30_spill] sm:$0xff] %v9245_v62  ;;  %9923 = vst [vmem:[#allocation18_spill] sm:$0xff] %v9253_v42  ;;  %4865 = vmax.xlane.f32.xlu0 %v9253_v42  ;;  %v9257_v0 = vadd.f32 %v9094_v22, %v4734_v24  ;;  %v9268_v50 = vsel %vm4796_vm1, %v9245_v62, -1e+30 }
 0x585   :  { %9922 = vst [vmem:[#allocation15_spill] sm:$0xff] %v9248_v18  ;;  %v9262_v53 = vsel %vm4796_vm1, %v9248_v18, -1e+30 }
 0x586   :  { %9924 = vst [vmem:[#allocation27_spill] sm:$0xff] %v9257_v0  ;;  %9925 = vst [vmem:[#allocation29_spill] sm:$0xff] %v9262_v53  ;;  %4867 = vmax.xlane.f32.xlu1 %v9262_v53  ;;  %v9274_v54 = vsel %vm4796_vm1, %v9257_v0, -1e+30 }
 0x587   :  { %9926 = vst [vmem:[#allocation17_spill] sm:$0xff] %v9274_v54 }
 0x588   :  { %4861 = vmax.xlane.f32.xlu0 %v9268_v50 }
 0x58a   :  { %4863 = vmax.xlane.f32.xlu1 %v9274_v54 }
 0x590   :  { %v5967_v11 = vpop.f32.mrb[244].mxu0 }
 0x591   :  { %v9278_v20 = vadd.f32 %v5967_v11, %v9094_v22  ;;  %v4747_v25 = vpop.f32.mrb[245].mxu0 }
 0x592   :  { %v5968_v6 = vpop.f32.mrb[246].mxu0  ;;  %v9281_v40 = vadd.f32 %v9094_v22, %v4747_v25 }
 0x593   :  { %9927 = vst [vmem:[#allocation20_spill] sm:$0xff] %v9278_v20  ;;  %v9284_v57 = vadd.f32 %v5968_v6, %v9094_v22  ;;  %v4750_v46 = vpop.f32.mrb[247].mxu0  ;;  %v9289_v26 = vsel %vm4796_vm1, %v9278_v20, -1e+30 }
 0x594   :  { %9928 = vst [vmem:[#allocation32_spill] sm:$0xff] %v9281_v40  ;;  %9930 = vst [vmem:[#allocation19_spill] sm:$0xff] %v9289_v26  ;;  %4873 = vmax.xlane.f32.xlu0 %v9289_v26  ;;  %v9293_v60 = vadd.f32 %v9094_v22, %v4750_v46  ;;  %v9304_v8 = vsel %vm4796_vm1, %v9281_v40, -1e+30 }
 0x595   :  { %9929 = vst [vmem:[#allocation34_spill] sm:$0xff] %v9284_v57  ;;  %v9298_v33 = vsel %vm4796_vm1, %v9284_v57, -1e+30 }
 0x596   :  { %9931 = vst [vmem:[#allocation22_spill] sm:$0xff] %v9293_v60  ;;  %9932 = vst [vmem:[#allocation31_spill] sm:$0xff] %v9298_v33  ;;  %4875 = vmax.xlane.f32.xlu1 %v9298_v33  ;;  %v9310_v37 = vsel %vm4796_vm1, %v9293_v60, -1e+30 }
 0x597   :  { %9933 = vst [vmem:[#allocation33_spill] sm:$0xff] %v9310_v37 }
 0x598   :  { %4869 = vmax.xlane.f32.xlu0 %v9304_v8 }
 0x59a   :  { %4871 = vmax.xlane.f32.xlu1 %v9310_v37 }
 0x5a0   :  { %v5971_v3 = vpop.f32.mrb[248].mxu0 }
 0x5a1   :  { %v9314_v2 = vadd.f32 %v5971_v3, %v9094_v22  ;;  %v4763_v56 = vpop.f32.mrb[249].mxu0 }
 0x5a2   :  { %v5972_v52 = vpop.f32.mrb[250].mxu0  ;;  %v9317_v4 = vadd.f32 %v9094_v22, %v4763_v56 }
 0x5a3   :  { %9934 = vst [vmem:[#allocation21_spill] sm:$0xff] %v9314_v2  ;;  %v9320_v61 = vadd.f32 %v5972_v52, %v9094_v22  ;;  %v4766_v28 = vpop.f32.mrb[251].mxu0  ;;  %v9325_v23 = vsel %vm4796_vm1, %v9314_v2, -1e+30 }
 0x5a4   :  { %9935 = vst [vmem:[#allocation24_spill] sm:$0xff] %v9317_v4  ;;  %9937 = vst [vmem:[#allocation38_spill] sm:$0xff] %v9325_v23  ;;  %4881 = vmax.xlane.f32.xlu0 %v9325_v23  ;;  %v9329_v10 = vadd.f32 %v9094_v22, %v4766_v28  ;;  %v9340_v11 = vsel %vm4796_vm1, %v9317_v4, -1e+30 }
 0x5a5   :  { %9936 = vst [vmem:[#allocation36_spill] sm:$0xff] %v9320_v61  ;;  %v9334_v24 = vsel %vm4796_vm1, %v9320_v61, -1e+30  ;;  %9940 = vst [vmem:[#allocation37_spill] sm:$0xff] %v9340_v11 }
 0x5a6   :  { %9938 = vst [vmem:[#allocation23_spill] sm:$0xff] %v9329_v10  ;;  %9939 = vst [vmem:[#allocation35_spill] sm:$0xff] %v9334_v24  ;;  %4883 = vmax.xlane.f32.xlu1 %v9334_v24  ;;  %v9346_v25 = vsel %vm4796_vm1, %v9329_v10, -1e+30 }
 0x5a8   :  { %4877 = vmax.xlane.f32.xlu0 %v9340_v11 }
 0x5aa   :  { %4879 = vmax.xlane.f32.xlu1 %v9346_v25 }
 0x5b0   :  { %v5975_v6 = vpop.f32.mrb[252].mxu0 }
 0x5b1   :  { %v4779_v46 = vpop.f32.mrb[253].mxu0  ;;  %v9353_v28 = vadd.f32 %v5975_v6, %v9094_v22 }
 0x5b2   :  { %v9350_v3 = vadd.f32 %v9094_v22, %v4779_v46  ;;  %v5976_v56 = vpop.f32.mrb[254].mxu0 }
 0x5b3   :  { %v4782_v52 = vpop.f32.mrb[255].mxu0  ;;  %9942 = vst [vmem:[#allocation42_spill] sm:$0xff] %v9353_v28  ;;  %v9365_v61 = vadd.f32 %v5976_v56, %v9094_v22  ;;  %v9376_v6 = vsel %vm4796_vm1, %v9353_v28, -1e+30 }
 0x5b4   :  { %9941 = vst [vmem:[#allocation40_spill] sm:$0xff] %v9350_v3  ;;  %v9356_v4 = vadd.f32 %v9094_v22, %v4782_v52  ;;  %v9361_v10 = vsel %vm4796_vm1, %v9350_v3, -1e+30  ;;  %9947 = vst [vmem:[#allocation43_spill] sm:$0xff] %v9376_v6 }
 0x5b5   :  { %9944 = vst [vmem:[#allocation41_spill] sm:$0xff] %v9361_v10  ;;  %4885 = vmax.xlane.f32.xlu0 %v9361_v10  ;;  %9945 = vst [vmem:[#allocation44_spill] sm:$0xff] %v9365_v61  ;;  %v9382_v52 = vsel %vm4796_vm1, %v9365_v61, -1e+30 }
 0x5b6   :  { %9943 = vst [vmem:[#allocation39_spill] sm:$0xff] %v9356_v4  ;;  %v9370_v46 = vsel %vm4796_vm1, %v9356_v4, -1e+30 }
 0x5b7   :  { %9946 = vst [vmem:[#allocation46_spill] sm:$0xff] %v9370_v46  ;;  %4887 = vmax.xlane.f32.xlu1 %v9370_v46 }
 0x5b9   :  { %4889 = vmax.xlane.f32.xlu0 %v9376_v6 }
 0x5bb   :  { %4891 = vmax.xlane.f32.xlu1 %v9382_v52 }
 0x5d1   :  { %v9385_v22 = vpop.xlane.xlu1 %4833 }
 0x5d2   :  { %v4895_v56 = vsub.f32 %v9109_v34, %v9385_v22  ;;  %v9389_v4 = vpop.xlane.xlu0 %4829 }
 0x5d3   :  { %v4893_v28 = vsub.f32 %v9118_v31, %v9389_v4 }
 0x5d4   :  { %v4929_v3 = vmul.f32 1.442695, %v4895_v56 }
 0x5d5   :  { %v4925_v2 = vmul.f32 1.442695, %v4893_v28  ;;  %v9393_v60 = vpop.xlane.xlu1 %4835 }
 0x5d6   :  { %6633 = vpow2.f32 %v4929_v3  ;;  %v4896_v61 = vsub.f32 %v9124_v44, %v9393_v60  ;;  %v9397_v40 = vpop.xlane.xlu0 %4831 }
 0x5d7   :  { %v4894_v57 = vsub.f32 %v9130_v58, %v9397_v40  ;;  %6635 = vpow2.f32 %v4925_v2 }
 0x5d8   :  { %v4931_v20 = vmul.f32 1.442695, %v4896_v61 }
 0x5d9   :  { %v4927_v0 = vmul.f32 1.442695, %v4894_v57 }
 0x5da   :  { %6637 = vpow2.f32 %v4931_v20 }
 0x5db   :  { %6639 = vpow2.f32 %v4927_v0 }
 0x5e0   :  { %v6634_v62 = vpop.eup %6633 }
 0x5e1   :  { %v9401_v18 = vpop.xlane.xlu0 %4841  ;;  %4993 = vadd.xlane.f32.xlu0 %v6634_v62  ;;  %v6636_v28 = vpop.eup %6635 }
 0x5e2   :  { %v4899_v3 = vsub.f32 %v9145_v30, %v9401_v18 }
 0x5e3   :  { %v9405_v56 = vpop.xlane.xlu1 %4843 }
 0x5e4   :  { %v6638_v9 = vpop.eup %6637  ;;  %v4937_v35 = vmul.f32 1.442695, %v4899_v3  ;;  %v4900_v39 = vsub.f32 %v9154_v5, %v9405_v56 }
 0x5e5   :  { %v9409_v61 = vpop.xlane.xlu0 %4837  ;;  %4995 = vadd.xlane.f32.xlu1 %v6638_v9  ;;  %4989 = vadd.xlane.f32.xlu0 %v6636_v28  ;;  %v6640_v57 = vpop.eup %6639 }
 0x5e6   :  { %6641 = vpow2.f32 %v4937_v35  ;;  %v4939_v0 = vmul.f32 1.442695, %v4900_v39  ;;  %v4897_v62 = vsub.f32 %v9160_v29, %v9409_v61 }
 0x5e7   :  { %v9413_v20 = vpop.xlane.xlu1 %4839 }
 0x5e8   :  { %6643 = vpow2.f32 %v4939_v0  ;;  %v4933_v2 = vmul.f32 1.442695, %v4897_v62  ;;  %v4898_v3 = vsub.f32 %v9166_v59, %v9413_v20 }
 0x5e9   :  { %4991 = vadd.xlane.f32.xlu1 %v6640_v57 }
 0x5ea   :  { %6645 = vpow2.f32 %v4933_v2  ;;  %v4935_v1 = vmul.f32 1.442695, %v4898_v3 }
 0x5ec   :  { %6647 = vpow2.f32 %v4935_v1 }
 0x5f0   :  { %v6642_v17 = vpop.eup %6641 }
 0x5f1   :  { %v9417_v9 = vpop.xlane.xlu0 %4849  ;;  %5001 = vadd.xlane.f32.xlu0 %v6642_v17 }
 0x5f2   :  { %v6644_v39 = vpop.eup %6643  ;;  %v4903_v35 = vsub.f32 %v9181_v41, %v9417_v9 }
 0x5f3   :  { %v9421_v28 = vpop.xlane.xlu1 %4851  ;;  %5003 = vadd.xlane.f32.xlu1 %v6644_v39 }
 0x5f4   :  { %9948 = vst [vmem:[#allocation45_spill] sm:$0xff] %v9421_v28  ;;  %v6646_v0 = vpop.eup %6645  ;;  %v4945_v62 = vmul.f32 1.442695, %v4903_v35  ;;  %v4904_v45 = vsub.f32 %v9190_v55, %v9421_v28 }
 0x5f5   :  { %v9425_v57 = vpop.xlane.xlu0 %4845  ;;  %4997 = vadd.xlane.f32.xlu0 %v6646_v0 }
 0x5f6   :  { %v6648_v1 = vpop.eup %6647  ;;  %6649 = vpow2.f32 %v4945_v62  ;;  %v4947_v2 = vmul.f32 1.442695, %v4904_v45  ;;  %v4901_v17 = vsub.f32 %v9196_v16, %v9425_v57 }
 0x5f7   :  { %v9429_v3 = vpop.xlane.xlu1 %4847  ;;  %4999 = vadd.xlane.f32.xlu1 %v6648_v1 }
 0x5f8   :  { %6651 = vpow2.f32 %v4947_v2  ;;  %v4941_v41 = vmul.f32 1.442695, %v4901_v17  ;;  %v4902_v39 = vsub.f32 %v9202_v49, %v9429_v3 }
 0x5fa   :  { %6653 = vpow2.f32 %v4941_v41  ;;  %v4943_v35 = vmul.f32 1.442695, %v4902_v39 }
 0x5fc   :  { %6655 = vpow2.f32 %v4943_v35 }
 0x600   :  { %v6650_v55 = vpop.eup %6649 }
 0x601   :  { %v9433_v28 = vpop.xlane.xlu0 %4857  ;;  %5009 = vadd.xlane.f32.xlu0 %v6650_v55 }
 0x602   :  { %v6652_v0 = vpop.eup %6651  ;;  %v4907_v45 = vsub.f32 %v9217_v36, %v9433_v28 }
 0x603   :  { %v9437_v62 = vpop.xlane.xlu1 %4859  ;;  %5011 = vadd.xlane.f32.xlu1 %v6652_v0 }
 0x604   :  { %9949 = vst [vmem:[#allocation48_spill] sm:$0xff] %v9437_v62  ;;  %v6654_v1 = vpop.eup %6653  ;;  %v4953_v2 = vmul.f32 1.442695, %v4907_v45  ;;  %v4908_v17 = vsub.f32 %v9226_v51, %v9437_v62 }
 0x605   :  { %v9441_v49 = vpop.xlane.xlu0 %4853  ;;  %5005 = vadd.xlane.f32.xlu0 %v6654_v1 }
 0x606   :  { %v6656_v41 = vpop.eup %6655  ;;  %6657 = vpow2.f32 %v4953_v2  ;;  %v4955_v39 = vmul.f32 1.442695, %v4908_v17  ;;  %v4905_v55 = vsub.f32 %v9232_v32, %v9441_v49 }
 0x607   :  { %v9445_v35 = vpop.xlane.xlu1 %4855  ;;  %5007 = vadd.xlane.f32.xlu1 %v6656_v41 }
 0x608   :  { %6659 = vpow2.f32 %v4955_v39  ;;  %v4949_v36 = vmul.f32 1.442695, %v4905_v55  ;;  %v4906_v0 = vsub.f32 %v9238_v43, %v9445_v35 }
 0x60a   :  { %6661 = vpow2.f32 %v4949_v36  ;;  %v4951_v45 = vmul.f32 1.442695, %v4906_v0 }
 0x60c   :  { %6663 = vpow2.f32 %v4951_v45 }
 0x610   :  { %v6658_v51 = vpop.eup %6657 }
 0x611   :  { %v9449_v62 = vpop.xlane.xlu0 %4865  ;;  %5017 = vadd.xlane.f32.xlu0 %v6658_v51 }
 0x612   :  { %v6660_v1 = vpop.eup %6659  ;;  %v4911_v2 = vsub.f32 %v9253_v42, %v9449_v62 }
 0x613   :  { %v9453_v17 = vpop.xlane.xlu1 %4867  ;;  %5019 = vadd.xlane.f32.xlu1 %v6660_v1 }
 0x614   :  { %9950 = vst [vmem:[#allocation50_spill] sm:$0xff] %v9453_v17  ;;  %v6662_v41 = vpop.eup %6661  ;;  %v4961_v39 = vmul.f32 1.442695, %v4911_v2  ;;  %v4912_v55 = vsub.f32 %v9262_v53, %v9453_v17 }
 0x615   :  { %v9457_v43 = vpop.xlane.xlu0 %4861  ;;  %5013 = vadd.xlane.f32.xlu0 %v6662_v41 }
 0x616   :  { %v6664_v36 = vpop.eup %6663  ;;  %6665 = vpow2.f32 %v4961_v39  ;;  %v4963_v0 = vmul.f32 1.442695, %v4912_v55  ;;  %v4909_v51 = vsub.f32 %v9268_v50, %v9457_v43 }
 0x617   :  { %v9461_v45 = vpop.xlane.xlu1 %4863  ;;  %5015 = vadd.xlane.f32.xlu1 %v6664_v36 }
 0x618   :  { %6667 = vpow2.f32 %v4963_v0  ;;  %v4957_v42 = vmul.f32 1.442695, %v4909_v51  ;;  %v4910_v1 = vsub.f32 %v9274_v54, %v9461_v45 }
 0x61a   :  { %6669 = vpow2.f32 %v4957_v42  ;;  %v4959_v2 = vmul.f32 1.442695, %v4910_v1 }
 0x61c   :  { %6671 = vpow2.f32 %v4959_v2 }
 0x620   :  { %v6666_v53 = vpop.eup %6665 }
 0x621   :  { %v9465_v17 = vpop.xlane.xlu0 %4873  ;;  %5025 = vadd.xlane.f32.xlu0 %v6666_v53 }
 0x622   :  { %v6668_v41 = vpop.eup %6667  ;;  %v4915_v39 = vsub.f32 %v9289_v26, %v9465_v17 }
 0x623   :  { %v9469_v55 = vpop.xlane.xlu1 %4875  ;;  %5027 = vadd.xlane.f32.xlu1 %v6668_v41 }
 0x624   :  { %9951 = vst [vmem:[#allocation47_spill] sm:$0xff] %v9469_v55  ;;  %v6670_v36 = vpop.eup %6669  ;;  %v4969_v0 = vmul.f32 1.442695, %v4915_v39  ;;  %v4916_v51 = vsub.f32 %v9298_v33, %v9469_v55 }
 0x625   :  { %v9473_v54 = vpop.xlane.xlu0 %4869  ;;  %5021 = vadd.xlane.f32.xlu0 %v6670_v36 }
 0x626   :  { %v6672_v42 = vpop.eup %6671  ;;  %6673 = vpow2.f32 %v4969_v0  ;;  %v4971_v1 = vmul.f32 1.442695, %v4916_v51  ;;  %v4913_v53 = vsub.f32 %v9304_v8, %v9473_v54 }
 0x627   :  { %v9477_v2 = vpop.xlane.xlu1 %4871  ;;  %5023 = vadd.xlane.f32.xlu1 %v6672_v42 }
 0x628   :  { %6675 = vpow2.f32 %v4971_v1  ;;  %v4965_v26 = vmul.f32 1.442695, %v4913_v53  ;;  %v4914_v41 = vsub.f32 %v9310_v37, %v9477_v2 }
 0x62a   :  { %6677 = vpow2.f32 %v4965_v26  ;;  %v4967_v39 = vmul.f32 1.442695, %v4914_v41 }
 0x62c   :  { %6679 = vpow2.f32 %v4967_v39 }
 0x630   :  { %v6674_v33 = vpop.eup %6673 }
 0x631   :  { %v9481_v55 = vpop.xlane.xlu0 %4881  ;;  %5033 = vadd.xlane.f32.xlu0 %v6674_v33 }
 0x632   :  { %v6676_v36 = vpop.eup %6675  ;;  %v4919_v0 = vsub.f32 %v9325_v23, %v9481_v55 }
 0x633   :  { %v9485_v51 = vpop.xlane.xlu1 %4883  ;;  %5035 = vadd.xlane.f32.xlu1 %v6676_v36 }
 0x634   :  { %9952 = vst [vmem:[#allocation49_spill] sm:$0xff] %v9485_v51  ;;  %v6678_v42 = vpop.eup %6677  ;;  %v4977_v1 = vmul.f32 1.442695, %v4919_v0  ;;  %v4920_v53 = vsub.f32 %v9334_v24, %v9485_v51 }
 0x635   :  { %v9489_v37 = vpop.xlane.xlu0 %4877  ;;  %5029 = vadd.xlane.f32.xlu0 %v6678_v42 }
 0x636   :  { %v6680_v26 = vpop.eup %6679  ;;  %6681 = vpow2.f32 %v4977_v1  ;;  %v4979_v41 = vmul.f32 1.442695, %v4920_v53  ;;  %v4917_v33 = vsub.f32 %v9340_v11, %v9489_v37 }
 0x637   :  { %v9493_v39 = vpop.xlane.xlu1 %4879  ;;  %5031 = vadd.xlane.f32.xlu1 %v6680_v26 }
 0x638   :  { %6683 = vpow2.f32 %v4979_v41  ;;  %v4973_v23 = vmul.f32 1.442695, %v4917_v33  ;;  %v4918_v36 = vsub.f32 %v9346_v25, %v9493_v39 }
 0x63a   :  { %6685 = vpow2.f32 %v4973_v23  ;;  %v4975_v0 = vmul.f32 1.442695, %v4918_v36 }
 0x63c   :  { %6687 = vpow2.f32 %v4975_v0 }
 0x640   :  { %v6682_v24 = vpop.eup %6681 }
 0x641   :  { %5041 = vadd.xlane.f32.xlu0 %v6682_v24 }
 0x642   :  { %v6684_v42 = vpop.eup %6683  ;;  %v9497_v51 = vpop.xlane.xlu0 %4885 }
 0x643   :  { %v4921_v1 = vsub.f32 %v9361_v10, %v9497_v51  ;;  %5043 = vadd.xlane.f32.xlu1 %v6684_v42 }
 0x644   :  { %v6686_v53 = vpop.eup %6685  ;;  %v9501_v11 = vpop.xlane.xlu1 %4887 }
 0x645   :  { %v4981_v26 = vmul.f32 1.442695, %v4921_v1  ;;  %v4922_v41 = vsub.f32 %v9370_v46, %v9501_v11  ;;  %5037 = vadd.xlane.f32.xlu0 %v6686_v53 }
 0x646   :  { %v6688_v23 = vpop.eup %6687  ;;  %v9505_v33 = vpop.xlane.xlu0 %4889 }
 0x647   :  { %6689 = vpow2.f32 %v4981_v26  ;;  %v4983_v24 = vmul.f32 1.442695, %v4922_v41  ;;  %v4923_v36 = vsub.f32 %v9376_v6, %v9505_v33  ;;  %5039 = vadd.xlane.f32.xlu1 %v6688_v23 }
 0x648   :  { %v9509_v0 = vpop.xlane.xlu1 %4891 }
 0x649   :  { %6691 = vpow2.f32 %v4983_v24  ;;  %v4985_v42 = vmul.f32 1.442695, %v4923_v36  ;;  %v4924_v1 = vsub.f32 %v9382_v52, %v9509_v0 }
 0x64b   :  { %6693 = vpow2.f32 %v4985_v42  ;;  %v4987_v10 = vmul.f32 1.442695, %v4924_v1 }
 0x64d   :  { %6695 = vpow2.f32 %v4987_v10 }
 0x651   :  { %v6690_v53 = vpop.eup %6689 }
 0x652   :  { %5045 = vadd.xlane.f32.xlu0 %v6690_v53 }
 0x653   :  { %v6692_v46 = vpop.eup %6691 }
 0x654   :  { %5047 = vadd.xlane.f32.xlu1 %v6692_v46 }
 0x655   :  { %v6694_v26 = vpop.eup %6693 }
 0x656   :  { %5049 = vadd.xlane.f32.xlu0 %v6694_v26 }
 0x657   :  { %v6696_v41 = vpop.eup %6695 }
 0x658   :  { %5051 = vadd.xlane.f32.xlu1 %v6696_v41 }
 0x66e   :  { %v4994_v6 = vpop.xlane.xlu0 %4993 }
 0x66f   :  { %6697 = vlog2.f32 %v4994_v6 }
 0x670   :  { %6699 = vtanh.f32 %v9098_v21 }
 0x672   :  { %v4996_v23 = vpop.xlane.xlu1 %4995  ;;  %v4990_v24 = vpop.xlane.xlu0 %4989 }
 0x673   :  { %6701 = vlog2.f32 %v4996_v23 }
 0x674   :  { %6703 = vlog2.f32 %v4990_v24 }
 0x675   :  { %6705 = vtanh.f32 %v9101_v63 }
 0x676   :  { %6707 = vtanh.f32 %v9104_v7  ;;  %v4992_v10 = vpop.xlane.xlu1 %4991 }
 0x677   :  { %6709 = vlog2.f32 %v4992_v10 }
 0x678   :  { %6711 = vtanh.f32 %v9112_v14 }
 0x679   :  { %v6698_v36 = vpop.eup %6697 }
 0x67a   :  { %v5058_v46 = vmul.f32 0.6931472, %v6698_v36  ;;  %v6700_v42 = vpop.eup %6699 }
 0x67b   :  { %v5216_v7 = vsel %vm5181_vm2, %v6700_v42, 0.0 }
 0x67c   :  { %v5119_v6 = vadd.f32 %v5058_v46, %v9385_v22 }
 0x67d   :  { %v6702_v21 = vpop.eup %6701 }
 0x67e   :  { %v6704_v1 = vpop.eup %6703  ;;  %v5151_v53 = vsub.f32 %v9109_v34, %v5119_v6  ;;  %v5060_v26 = vmul.f32 0.6931472, %v6702_v21  ;;  %v5002_v41 = vpop.xlane.xlu0 %5001 }
 0x67f   :  { %v6706_v63 = vpop.eup %6705  ;;  %v5054_v23 = vmul.f32 0.6931472, %v6704_v1  ;;  %6713 = vlog2.f32 %v5002_v41 }
 0x680   :  { %v6708_v24 = vpop.eup %6707  ;;  %v5248_v14 = vsel %vm4796_vm1, %v5151_v53, %v5216_v7  ;;  %v5120_v10 = vadd.f32 %v5060_v26, %v9393_v60  ;;  %v5004_v36 = vpop.xlane.xlu1 %5003  ;;  %v5214_v60 = vsel %vm5181_vm2, %v6706_v63, 0.0 }
 0x681   :  { %v6710_v22 = vpop.eup %6709  ;;  %5280 = vst [vmem:[#allocation2 + $0x10] sm:$0xff] %v5248_v14  ;;  %v5117_v46 = vadd.f32 %v5054_v23, %v9389_v4  ;;  %6715 = vlog2.f32 %v5004_v36  ;;  %v5217_v21 = vsel %vm5181_vm2, %v6708_v24, 0.0 }
 0x682   :  { %6717 = vtanh.f32 %v9134_v47  ;;  %v5152_v34 = vsub.f32 %v9124_v44, %v5120_v10  ;;  %v5056_v6 = vmul.f32 0.6931472, %v6710_v22  ;;  %v4998_v42 = vpop.xlane.xlu0 %4997  ;;  %v6712_v53 = vpop.eup %6711 }
 0x683   :  { %v5149_v1 = vsub.f32 %v9118_v31, %v5117_v46  ;;  %6719 = vlog2.f32 %v4998_v42  ;;  %v5215_v41 = vsel %vm5181_vm2, %v6712_v53, 0.0 }
 0x684   :  { %6721 = vtanh.f32 %v9140_v48  ;;  %v5249_v4 = vsel %vm4796_vm1, %v5152_v34, %v5217_v21  ;;  %v5118_v47 = vadd.f32 %v5056_v6, %v9397_v40  ;;  %v5000_v44 = vpop.xlane.xlu1 %4999 }
 0x685   :  { %5281 = vst [vmem:[#allocation2 + $0x18] sm:$0xff] %v5249_v4  ;;  %v5246_v26 = vsel %vm4796_vm1, %v5149_v1, %v5214_v60  ;;  %6723 = vlog2.f32 %v5000_v44 }
 0x686   :  { %6725 = vtanh.f32 %v9137_v27  ;;  %5278 = vst [vmem:[#allocation2] sm:$0xff] %v5246_v26  ;;  %v5150_v31 = vsub.f32 %v9130_v58, %v5118_v47 }
 0x687   :  { %6727 = vtanh.f32 %v9149_v19 }
 0x688   :  { %v5247_v48 = vsel %vm4796_vm1, %v5150_v31, %v5215_v41 }
 0x689   :  { %v6714_v40 = vpop.eup %6713  ;;  %5279 = vst [vmem:[#allocation2 + $0x8] sm:$0xff] %v5247_v48 }
 0x68a   :  { %v5066_v63 = vmul.f32 0.6931472, %v6714_v40 }
 0x68b   :  { %v6716_v7 = vpop.eup %6715 }
 0x68c   :  { %v6718_v23 = vpop.eup %6717  ;;  %v5123_v24 = vadd.f32 %v5066_v63, %v9401_v18  ;;  %v5068_v14 = vmul.f32 0.6931472, %v6716_v7 }
 0x68d   :  { %v6720_v27 = vpop.eup %6719  ;;  %v5220_v34 = vsel %vm5181_vm2, %v6718_v23, 0.0 }
 0x68e   :  { %v6722_v10 = vpop.eup %6721  ;;  %v5155_v58 = vsub.f32 %v9145_v30, %v5123_v24  ;;  %v5124_v36 = vadd.f32 %v5068_v14, %v9405_v56  ;;  %v5062_v22 = vmul.f32 0.6931472, %v6720_v27  ;;  %v5010_v46 = vpop.xlane.xlu0 %5009  ;;  %v9954_v24 = vld [vmem:[#allocation8_spill] sm:$0xff]  ;;  %v9955_v27 = vld [vmem:[#allocation45_spill] sm:$0xff] }
 0x68f   :  { %v6724_v19 = vpop.eup %6723  ;;  %6729 = vlog2.f32 %v5010_v46  ;;  %v5221_v30 = vsel %vm5181_vm2, %v6722_v10, 0.0 }
 0x690   :  { %v6726_v6 = vpop.eup %6725  ;;  %v5252_v42 = vsel %vm4796_vm1, %v5155_v58, %v5220_v34  ;;  %v5156_v18 = vsub.f32 %v9154_v5, %v5124_v36  ;;  %v5121_v21 = vadd.f32 %v5062_v22, %v9409_v61  ;;  %v5064_v1 = vmul.f32 0.6931472, %v6724_v19  ;;  %v5012_v53 = vpop.xlane.xlu1 %5011  ;;  %v9956_v34 = vld [vmem:[#allocation10_spill] sm:$0xff] }
 0x691   :  { %5284 = vst [vmem:[#allocation2 + $0x30] sm:$0xff] %v5252_v42  ;;  %6731 = vlog2.f32 %v5012_v53  ;;  %v6728_v56 = vpop.eup %6727  ;;  %v5218_v61 = vsel %vm5181_vm2, %v6726_v6, 0.0  ;;  %v9957_v53 = vld [vmem:[#allocation12_spill] sm:$0xff] }
 0x692   :  { %6733 = vtanh.f32 %v9170_v15  ;;  %v5253_v60 = vsel %vm4796_vm1, %v5156_v18, %v5221_v30  ;;  %v5153_v4 = vsub.f32 %v9160_v29, %v5121_v21  ;;  %v5122_v47 = vadd.f32 %v5064_v1, %v9413_v20  ;;  %v5006_v5 = vpop.xlane.xlu0 %5005  ;;  %v9953_v20 = vld [vmem:[#allocation5_spill] sm:$0xff] }
 0x693   :  { %5285 = vst [vmem:[#allocation2 + $0x38] sm:$0xff] %v5253_v60  ;;  %6735 = vlog2.f32 %v5006_v5  ;;  %v5219_v31 = vsel %vm5181_vm2, %v6728_v56, 0.0 }
 0x694   :  { %6737 = vtanh.f32 %v9176_v12  ;;  %v5250_v44 = vsel %vm4796_vm1, %v5153_v4, %v5218_v61  ;;  %v5154_v15 = vsub.f32 %v9166_v59, %v5122_v47  ;;  %v5008_v26 = vpop.xlane.xlu1 %5007  ;;  %v9958_v47 = vld [vmem:[#allocation14_spill] sm:$0xff]  ;;  %v9959_v61 = vld [vmem:[#allocation9_spill] sm:$0xff] }
 0x695   :  { %5282 = vst [vmem:[#allocation2 + $0x20] sm:$0xff] %v5250_v44  ;;  %6739 = vlog2.f32 %v5008_v26 }
 0x696   :  { %6741 = vtanh.f32 %v9173_v13  ;;  %v5251_v29 = vsel %vm4796_vm1, %v5154_v15, %v5219_v31  ;;  %v9961_v31 = vld [vmem:[#allocation26_spill] sm:$0xff] }
 0x697   :  { %5283 = vst [vmem:[#allocation2 + $0x28] sm:$0xff] %v5251_v29  ;;  %6743 = vtanh.f32 %v9953_v20 }
 0x699   :  { %v6730_v12 = vpop.eup %6729 }
 0x69a   :  { %v5074_v41 = vmul.f32 0.6931472, %v6730_v12 }
 0x69b   :  { %v6732_v48 = vpop.eup %6731 }
 0x69c   :  { %v6734_v40 = vpop.eup %6733  ;;  %v5127_v59 = vadd.f32 %v5074_v41, %v9417_v9  ;;  %v5076_v63 = vmul.f32 0.6931472, %v6732_v48 }
 0x69d   :  { %v6736_v7 = vpop.eup %6735  ;;  %v5224_v22 = vsel %vm5181_vm2, %v6734_v40, 0.0 }
 0x69e   :  { %v6738_v23 = vpop.eup %6737  ;;  %v5159_v14 = vsub.f32 %v9954_v24, %v5127_v59  ;;  %v5128_v10 = vadd.f32 %v5076_v63, %v9955_v27  ;;  %v5070_v13 = vmul.f32 0.6931472, %v6736_v7  ;;  %v5018_v58 = vpop.xlane.xlu0 %5017  ;;  %v9962_v7 = vld [vmem:[#allocation25_spill] sm:$0xff]  ;;  %v9963_v24 = vld [vmem:[#allocation48_spill] sm:$0xff] }
 0x69f   :  { %v6740_v36 = vpop.eup %6739  ;;  %6745 = vlog2.f32 %v5018_v58  ;;  %v5225_v21 = vsel %vm5181_vm2, %v6738_v23, 0.0 }
 0x6a0   :  { %v6742_v46 = vpop.eup %6741  ;;  %v5256_v19 = vsel %vm4796_vm1, %v5159_v14, %v5224_v22  ;;  %v5160_v9 = vsub.f32 %v9956_v34, %v5128_v10  ;;  %v5125_v6 = vadd.f32 %v5070_v13, %v9425_v57  ;;  %v5072_v42 = vmul.f32 0.6931472, %v6740_v36  ;;  %v5020_v18 = vpop.xlane.xlu1 %5019 }
 0x6a1   :  { %5288 = vst [vmem:[#allocation2 + $0x50] sm:$0xff] %v5256_v19  ;;  %6747 = vlog2.f32 %v5020_v18  ;;  %v6744_v1 = vpop.eup %6743  ;;  %v5222_v57 = vsel %vm5181_vm2, %v6742_v46, 0.0  ;;  %v9964_v46 = vld [vmem:[#allocation13_spill] sm:$0xff]  ;;  %v9965_v18 = vld [vmem:[#allocation28_spill] sm:$0xff] }
 0x6a2   :  { %6749 = vtanh.f32 %v9957_v53  ;;  %v5257_v30 = vsel %vm4796_vm1, %v5160_v9, %v5225_v21  ;;  %v5157_v56 = vsub.f32 %v9196_v16, %v5125_v6  ;;  %v5126_v60 = vadd.f32 %v5072_v42, %v9429_v3  ;;  %v5014_v4 = vpop.xlane.xlu0 %5013  ;;  %v9960_v16 = vld [vmem:[#allocation11_spill] sm:$0xff] }
 0x6a3   :  { %5289 = vst [vmem:[#allocation2 + $0x58] sm:$0xff] %v5257_v30  ;;  %6751 = vlog2.f32 %v5014_v4  ;;  %v5223_v26 = vsel %vm5181_vm2, %v6744_v1, 0.0  ;;  %v9967_v4 = vld [vmem:[#allocation16_spill] sm:$0xff] }
 0x6a4   :  { %6753 = vtanh.f32 %v9958_v47  ;;  %v5254_v5 = vsel %vm4796_vm1, %v5157_v56, %v5222_v57  ;;  %v5158_v44 = vsub.f32 %v9959_v61, %v5126_v60  ;;  %v5016_v15 = vpop.xlane.xlu1 %5015  ;;  %v9966_v56 = vld [vmem:[#allocation15_spill] sm:$0xff] }
 0x6a5   :  { %5286 = vst [vmem:[#allocation2 + $0x40] sm:$0xff] %v5254_v5  ;;  %6755 = vlog2.f32 %v5016_v15  ;;  %v9969_v61 = vld [vmem:[#allocation27_spill] sm:$0xff] }
 0x6a6   :  { %6757 = vtanh.f32 %v9960_v16  ;;  %v5255_v3 = vsel %vm4796_vm1, %v5158_v44, %v5223_v26 }
 0x6a7   :  { %5287 = vst [vmem:[#allocation2 + $0x48] sm:$0xff] %v5255_v3  ;;  %6759 = vtanh.f32 %v9961_v31 }
 0x6a9   :  { %v6746_v29 = vpop.eup %6745 }
 0x6aa   :  { %v5082_v20 = vmul.f32 0.6931472, %v6746_v29 }
 0x6ab   :  { %v6748_v12 = vpop.eup %6747 }
 0x6ac   :  { %v6750_v41 = vpop.eup %6749  ;;  %v5131_v48 = vadd.f32 %v5082_v20, %v9433_v28  ;;  %v5084_v40 = vmul.f32 0.6931472, %v6748_v12  ;;  %v9970_v12 = vld [vmem:[#allocation18_spill] sm:$0xff] }
 0x6ad   :  { %v6752_v59 = vpop.eup %6751  ;;  %v5228_v58 = vsel %vm5181_vm2, %v6750_v41, 0.0 }
 0x6ae   :  { %v6754_v63 = vpop.eup %6753  ;;  %v5163_v23 = vsub.f32 %v9962_v7, %v5131_v48  ;;  %v5132_v14 = vadd.f32 %v5084_v40, %v9963_v24  ;;  %v5078_v27 = vmul.f32 0.6931472, %v6752_v59  ;;  %v5026_v10 = vpop.xlane.xlu0 %5025  ;;  %v9971_v48 = vld [vmem:[#allocation50_spill] sm:$0xff] }
 0x6af   :  { %v6756_v13 = vpop.eup %6755  ;;  %6761 = vlog2.f32 %v5026_v10  ;;  %v5229_v6 = vsel %vm5181_vm2, %v6754_v63, 0.0 }
 0x6b0   :  { %v6758_v36 = vpop.eup %6757  ;;  %v5260_v22 = vsel %vm4796_vm1, %v5163_v23, %v5228_v58  ;;  %v5164_v28 = vsub.f32 %v9964_v46, %v5132_v14  ;;  %v5129_v19 = vadd.f32 %v5078_v27, %v9441_v49  ;;  %v5080_v34 = vmul.f32 0.6931472, %v6756_v13  ;;  %v5028_v9 = vpop.xlane.xlu1 %5027  ;;  %v9972_v27 = vld [vmem:[#allocation29_spill] sm:$0xff]  ;;  %v9973_v46 = vld [vmem:[#allocation20_spill] sm:$0xff] }
 0x6b1   :  { %5292 = vst [vmem:[#allocation2 + $0x70] sm:$0xff] %v5260_v22  ;;  %6763 = vlog2.f32 %v5028_v9  ;;  %v6760_v42 = vpop.eup %6759  ;;  %v5226_v49 = vsel %vm5181_vm2, %v6758_v36, 0.0 }
 0x6b2   :  { %6765 = vtanh.f32 %v9965_v18  ;;  %v5261_v21 = vsel %vm4796_vm1, %v5164_v28, %v5229_v6  ;;  %v5161_v1 = vsub.f32 %v9232_v32, %v5129_v19  ;;  %v5130_v53 = vadd.f32 %v5080_v34, %v9445_v35  ;;  %v5022_v30 = vpop.xlane.xlu0 %5021  ;;  %v9968_v32 = vld [vmem:[#allocation30_spill] sm:$0xff]  ;;  %v9975_v18 = vld [vmem:[#allocation17_spill] sm:$0xff] }
 0x6b3   :  { %5293 = vst [vmem:[#allocation2 + $0x78] sm:$0xff] %v5261_v21  ;;  %6767 = vlog2.f32 %v5022_v30  ;;  %v5227_v5 = vsel %vm5181_vm2, %v6760_v42, 0.0  ;;  %v9974_v6 = vld [vmem:[#allocation34_spill] sm:$0xff] }
 0x6b4   :  { %6769 = vtanh.f32 %v9966_v56  ;;  %v5258_v60 = vsel %vm4796_vm1, %v5161_v1, %v5226_v49  ;;  %v5162_v57 = vsub.f32 %v9967_v4, %v5130_v53  ;;  %v5024_v47 = vpop.xlane.xlu1 %5023  ;;  %v9977_v30 = vld [vmem:[#allocation22_spill] sm:$0xff] }
 0x6b5   :  { %5290 = vst [vmem:[#allocation2 + $0x60] sm:$0xff] %v5258_v60  ;;  %6771 = vlog2.f32 %v5024_v47 }
 0x6b6   :  { %6773 = vtanh.f32 %v9968_v32  ;;  %v5259_v35 = vsel %vm4796_vm1, %v5162_v57, %v5227_v5 }
 0x6b7   :  { %5291 = vst [vmem:[#allocation2 + $0x68] sm:$0xff] %v5259_v35  ;;  %6775 = vtanh.f32 %v9969_v61  ;;  %v9978_v35 = vld [vmem:[#allocation19_spill] sm:$0xff] }
 0x6b9   :  { %v6762_v44 = vpop.eup %6761 }
 0x6ba   :  { %v5090_v15 = vmul.f32 0.6931472, %v6762_v44  ;;  %v9979_v44 = vld [vmem:[#allocation47_spill] sm:$0xff] }
 0x6bb   :  { %v6764_v26 = vpop.eup %6763 }
 0x6bc   :  { %v6766_v16 = vpop.eup %6765  ;;  %v5135_v3 = vadd.f32 %v5090_v15, %v9449_v62  ;;  %v5092_v31 = vmul.f32 0.6931472, %v6764_v26 }
 0x6bd   :  { %v6768_v29 = vpop.eup %6767  ;;  %v5232_v23 = vsel %vm5181_vm2, %v6766_v16, 0.0 }
 0x6be   :  { %v6770_v20 = vpop.eup %6769  ;;  %v5167_v41 = vsub.f32 %v9970_v12, %v5135_v3  ;;  %v5136_v40 = vadd.f32 %v5092_v31, %v9971_v48  ;;  %v5086_v59 = vmul.f32 0.6931472, %v6768_v29  ;;  %v5034_v63 = vpop.xlane.xlu0 %5033  ;;  %v9980_v12 = vld [vmem:[#allocation31_spill] sm:$0xff] }
 0x6bf   :  { %v6772_v7 = vpop.eup %6771  ;;  %6777 = vlog2.f32 %v5034_v63  ;;  %v5233_v36 = vsel %vm5181_vm2, %v6770_v20, 0.0 }
 0x6c0   :  { %v6774_v24 = vpop.eup %6773  ;;  %v5264_v14 = vsel %vm4796_vm1, %v5167_v41, %v5232_v23  ;;  %v5168_v62 = vsub.f32 %v9972_v27, %v5136_v40  ;;  %v5133_v10 = vadd.f32 %v5086_v59, %v9457_v43  ;;  %v5088_v13 = vmul.f32 0.6931472, %v6772_v7  ;;  %v5036_v58 = vpop.xlane.xlu1 %5035  ;;  %v9981_v7 = vld [vmem:[#allocation21_spill] sm:$0xff] }
 0x6c1   :  { %5296 = vst [vmem:[#allocation2 + $0x90] sm:$0xff] %v5264_v14  ;;  %6779 = vlog2.f32 %v5036_v58  ;;  %v6776_v22 = vpop.eup %6775  ;;  %v5230_v43 = vsel %vm5181_vm2, %v6774_v24, 0.0 }
 0x6c2   :  { %6781 = vtanh.f32 %v9973_v46  ;;  %v5265_v28 = vsel %vm4796_vm1, %v5168_v62, %v5233_v36  ;;  %v5165_v19 = vsub.f32 %v9268_v50, %v5133_v10  ;;  %v5134_v34 = vadd.f32 %v5088_v13, %v9461_v45  ;;  %v5030_v9 = vpop.xlane.xlu0 %5029  ;;  %v9976_v50 = vld [vmem:[#allocation32_spill] sm:$0xff]  ;;  %v9983_v13 = vld [vmem:[#allocation33_spill] sm:$0xff]  ;;  %v9985_v46 = vld [vmem:[#allocation23_spill] sm:$0xff] }
 0x6c3   :  { %5297 = vst [vmem:[#allocation2 + $0x98] sm:$0xff] %v5265_v28  ;;  %6783 = vlog2.f32 %v5030_v9  ;;  %v5231_v53 = vsel %vm5181_vm2, %v6776_v22, 0.0  ;;  %v9982_v62 = vld [vmem:[#allocation36_spill] sm:$0xff] }
 0x6c4   :  { %6785 = vtanh.f32 %v9974_v6  ;;  %v5262_v42 = vsel %vm4796_vm1, %v5165_v19, %v5230_v43  ;;  %v5166_v21 = vsub.f32 %v9975_v18, %v5134_v34  ;;  %v5032_v1 = vpop.xlane.xlu1 %5031 }
 0x6c5   :  { %5294 = vst [vmem:[#allocation2 + $0x80] sm:$0xff] %v5262_v42  ;;  %6787 = vlog2.f32 %v5032_v1 }
 0x6c6   :  { %6789 = vtanh.f32 %v9976_v50  ;;  %v5263_v45 = vsel %vm4796_vm1, %v5166_v21, %v5231_v53  ;;  %v9986_v21 = vld [vmem:[#allocation38_spill] sm:$0xff]  ;;  %v9987_v53 = vld [vmem:[#allocation49_spill] sm:$0xff] }
 0x6c7   :  { %5295 = vst [vmem:[#allocation2 + $0x88] sm:$0xff] %v5263_v45  ;;  %6791 = vtanh.f32 %v9977_v30 }
 0x6c9   :  { %v6778_v49 = vpop.eup %6777 }
 0x6ca   :  { %v5098_v56 = vmul.f32 0.6931472, %v6778_v49 }
 0x6cb   :  { %v6780_v60 = vpop.eup %6779 }
 0x6cc   :  { %v6782_v4 = vpop.eup %6781  ;;  %v5139_v57 = vadd.f32 %v5098_v56, %v9465_v17  ;;  %v5100_v47 = vmul.f32 0.6931472, %v6780_v60 }
 0x6cd   :  { %v6784_v5 = vpop.eup %6783  ;;  %v5236_v31 = vsel %vm5181_vm2, %v6782_v4, 0.0 }
 0x6ce   :  { %v6786_v32 = vpop.eup %6785  ;;  %v5171_v61 = vsub.f32 %v9978_v35, %v5139_v57  ;;  %v5140_v15 = vadd.f32 %v5100_v47, %v9979_v44  ;;  %v5094_v26 = vmul.f32 0.6931472, %v6784_v5  ;;  %v5042_v16 = vpop.xlane.xlu0 %5041  ;;  %v9988_v57 = vld [vmem:[#allocation35_spill] sm:$0xff] }
 0x6cf   :  { %v6788_v3 = vpop.eup %6787  ;;  %6793 = vlog2.f32 %v5042_v16  ;;  %v5237_v59 = vsel %vm5181_vm2, %v6786_v32, 0.0 }
 0x6d0   :  { %v6790_v29 = vpop.eup %6789  ;;  %v5268_v20 = vsel %vm4796_vm1, %v5171_v61, %v5236_v31  ;;  %v5172_v17 = vsub.f32 %v9980_v12, %v5140_v15  ;;  %v5137_v41 = vadd.f32 %v5094_v26, %v9473_v54  ;;  %v5096_v48 = vmul.f32 0.6931472, %v6788_v3  ;;  %v5044_v40 = vpop.xlane.xlu1 %5043  ;;  %v9989_v15 = vld [vmem:[#allocation37_spill] sm:$0xff] }
 0x6d1   :  { %5300 = vst [vmem:[#allocation2 + $0xb0] sm:$0xff] %v5268_v20  ;;  %6795 = vlog2.f32 %v5044_v40  ;;  %v6792_v63 = vpop.eup %6791  ;;  %v5234_v54 = vsel %vm5181_vm2, %v6790_v29, 0.0  ;;  %v9993_v40 = vld [vmem:[#allocation44_spill] sm:$0xff] }
 0x6d2   :  { %6797 = vtanh.f32 %v9981_v7  ;;  %v5269_v23 = vsel %vm4796_vm1, %v5172_v17, %v5237_v59  ;;  %v5169_v24 = vsub.f32 %v9304_v8, %v5137_v41  ;;  %v5138_v14 = vadd.f32 %v5096_v48, %v9477_v2  ;;  %v5038_v27 = vpop.xlane.xlu0 %5037  ;;  %v9984_v8 = vld [vmem:[#allocation24_spill] sm:$0xff]  ;;  %v9991_v17 = vld [vmem:[#allocation39_spill] sm:$0xff]  ;;  %v9992_v48 = vld [vmem:[#allocation42_spill] sm:$0xff] }
 0x6d3   :  { %5301 = vst [vmem:[#allocation2 + $0xb8] sm:$0xff] %v5269_v23  ;;  %6799 = vlog2.f32 %v5038_v27  ;;  %v5235_v22 = vsel %vm5181_vm2, %v6792_v63, 0.0 }
 0x6d4   :  { %6801 = vtanh.f32 %v9982_v62  ;;  %v5266_v10 = vsel %vm4796_vm1, %v5169_v24, %v5234_v54  ;;  %v5170_v58 = vsub.f32 %v9983_v13, %v5138_v14  ;;  %v5040_v36 = vpop.xlane.xlu1 %5039  ;;  %v9994_v13 = vld [vmem:[#allocation41_spill] sm:$0xff] }
 0x6d5   :  { %5298 = vst [vmem:[#allocation2 + $0xa0] sm:$0xff] %v5266_v10  ;;  %6803 = vlog2.f32 %v5040_v36 }
 0x6d6   :  { %6805 = vtanh.f32 %v9984_v8  ;;  %v5267_v2 = vsel %vm4796_vm1, %v5170_v58, %v5235_v22  ;;  %v9995_v8 = vld [vmem:[#allocation46_spill] sm:$0xff] }
 0x6d7   :  { %5299 = vst [vmem:[#allocation2 + $0xa8] sm:$0xff] %v5267_v2  ;;  %6807 = vtanh.f32 %v9985_v46 }
 0x6d9   :  { %v6794_v28 = vpop.eup %6793 }
 0x6da   :  { %v5106_v19 = vmul.f32 0.6931472, %v6794_v28 }
 0x6db   :  { %v6796_v34 = vpop.eup %6795 }
 0x6dc   :  { %v6798_v9 = vpop.eup %6797  ;;  %v5143_v43 = vadd.f32 %v5106_v19, %v9481_v55  ;;  %v5108_v6 = vmul.f32 0.6931472, %v6796_v34 }
 0x6dd   :  { %v6800_v42 = vpop.eup %6799  ;;  %v5240_v49 = vsel %vm5181_vm2, %v6798_v9, 0.0  ;;  %v9996_v9 = vld [vmem:[#allocation43_spill] sm:$0xff] }
 0x6de   :  { %v6802_v18 = vpop.eup %6801  ;;  %v5175_v1 = vsub.f32 %v9986_v21, %v5143_v43  ;;  %v5144_v50 = vadd.f32 %v5108_v6, %v9987_v53  ;;  %v5102_v45 = vmul.f32 0.6931472, %v6800_v42 }
 0x6df   :  { %v6804_v30 = vpop.eup %6803  ;;  %v5046_v56 = vpop.xlane.xlu0 %5045  ;;  %v5241_v32 = vsel %vm5181_vm2, %v6802_v18, 0.0 }
 0x6e0   :  { %v6806_v60 = vpop.eup %6805  ;;  %v5272_v4 = vsel %vm4796_vm1, %v5175_v1, %v5240_v49  ;;  %v5176_v47 = vsub.f32 %v9988_v57, %v5144_v50  ;;  %v5141_v55 = vadd.f32 %v5102_v45, %v9489_v37  ;;  %v5104_v5 = vmul.f32 0.6931472, %v6804_v30  ;;  %v9990_v37 = vld [vmem:[#allocation40_spill] sm:$0xff] }
 0x6e1   :  { %5304 = vst [vmem:[#allocation2 + $0xd0] sm:$0xff] %v5272_v4  ;;  %6809 = vlog2.f32 %v5046_v56  ;;  %v5048_v35 = vpop.xlane.xlu1 %5047  ;;  %v6808_v61 = vpop.eup %6807  ;;  %v5238_v3 = vsel %vm5181_vm2, %v6806_v60, 0.0 }
 0x6e2   :  { %v5273_v44 = vsel %vm4796_vm1, %v5176_v47, %v5241_v32  ;;  %v5173_v26 = vsub.f32 %v9989_v15, %v5141_v55  ;;  %v5142_v16 = vadd.f32 %v5104_v5, %v9493_v39  ;;  %6811 = vlog2.f32 %v5048_v35 }
 0x6e3   :  { %6813 = vtanh.f32 %v9990_v37  ;;  %5305 = vst [vmem:[#allocation2 + $0xd8] sm:$0xff] %v5273_v44  ;;  %v5050_v31 = vpop.xlane.xlu0 %5049  ;;  %v5239_v12 = vsel %vm5181_vm2, %v6808_v61, 0.0 }
 0x6e4   :  { %v5270_v29 = vsel %vm4796_vm1, %v5173_v26, %v5238_v3  ;;  %v5174_v20 = vsub.f32 %v9346_v25, %v5142_v16  ;;  %6815 = vlog2.f32 %v5050_v31 }
 0x6e5   :  { %6817 = vtanh.f32 %v9991_v17  ;;  %5302 = vst [vmem:[#allocation2 + $0xc0] sm:$0xff] %v5270_v29  ;;  %v5052_v39 = vpop.xlane.xlu1 %5051 }
 0x6e6   :  { %v5271_v41 = vsel %vm4796_vm1, %v5174_v20, %v5239_v12  ;;  %6819 = vlog2.f32 %v5052_v39 }
 0x6e7   :  { %6821 = vtanh.f32 %v9992_v48  ;;  %5303 = vst [vmem:[#allocation2 + $0xc8] sm:$0xff] %v5271_v41 }
 0x6e8   :  { %6823 = vtanh.f32 %v9993_v40 }
 0x6eb   :  { %v6810_v59 = vpop.eup %6809 }
 0x6ec   :  { %v6812_v63 = vpop.eup %6811  ;;  %v5110_v25 = vmul.f32 0.6931472, %v6810_v59 }
 0x6ed   :  { %v6814_v7 = vpop.eup %6813  ;;  %v5112_v23 = vmul.f32 0.6931472, %v6812_v63 }
 0x6ee   :  { %v6816_v24 = vpop.eup %6815  ;;  %v5145_v14 = vadd.f32 %v5110_v25, %v9497_v51  ;;  %v5242_v22 = vsel %vm5181_vm2, %v6814_v7, 0.0 }
 0x6ef   :  { %v6818_v27 = vpop.eup %6817  ;;  %v5146_v54 = vadd.f32 %v5112_v23, %v9501_v11  ;;  %v5114_v62 = vmul.f32 0.6931472, %v6816_v24 }
 0x6f0   :  { %v6820_v10 = vpop.eup %6819  ;;  %v5177_v58 = vsub.f32 %v9994_v13, %v5145_v14  ;;  %v5243_v19 = vsel %vm5181_vm2, %v6818_v27, 0.0 }
 0x6f1   :  { %v6822_v36 = vpop.eup %6821  ;;  %v5178_v2 = vsub.f32 %v9995_v8, %v5146_v54  ;;  %v5147_v46 = vadd.f32 %v5114_v62, %v9505_v33  ;;  %v5116_v28 = vmul.f32 0.6931472, %v6820_v10 }
 0x6f2   :  { %v5274_v51 = vsel %vm4796_vm1, %v5177_v58, %v5242_v22  ;;  %v6824_v11 = vpop.eup %6823  ;;  %v5244_v33 = vsel %vm5181_vm2, %v6822_v36, 0.0 }
 0x6f3   :  { %5306 = vst [vmem:[#allocation2 + $0xe0] sm:$0xff] %v5274_v51  ;;  %v5275_v34 = vsel %vm4796_vm1, %v5178_v2, %v5243_v19  ;;  %v5179_v43 = vsub.f32 %v9996_v9, %v5147_v46  ;;  %v5148_v6 = vadd.f32 %v5116_v28, %v9509_v0  ;;  %v5245_v21 = vsel %vm5181_vm2, %v6824_v11, 0.0 }
 0x6f4   :  { %5307 = vst [vmem:[#allocation2 + $0xe8] sm:$0xff] %v5275_v34 }
 0x6f5   :  { %v5276_v42 = vsel %vm4796_vm1, %v5179_v43, %v5244_v33  ;;  %v5180_v18 = vsub.f32 %v9382_v52, %v5148_v6 }
 0x6f6   :  { %5308 = vst [vmem:[#allocation2 + $0xf0] sm:$0xff] %v5276_v42 }
 0x6f7   :  { %v5277_v1 = vsel %vm4796_vm1, %v5180_v18, %v5245_v21 }
 0x6f8   :  { %5309 = vst [vmem:[#allocation2 + $0xf8] sm:$0xff] %v5277_v1 }
 0x6f9   :  { %6901 = shalt.err (!%p6898_p4)
}
 0x6fa   :  { %s6902_s19 = scalar_lea.hbm %s9762_s12, 4096 }
 0x6fb   :  { %p6903_p5 = scmp.ne.s32.totalorder %s9762_s12, %s6902_s19  ;;  %p6906_p6 = scmp.lt.u32.totalorder %s6902_s19, %s9762_s12 }
 0x6fd   :  { %p6908_p7 = pnand %p6906_p6, %p6903_p5 }
 0x6ff   :  { %6911 = shalt.err (!%p6908_p7)
}
 0x700   :  { %s6916_s22 = smov 128   ;;  %s6917_s23 = smov 8  }
 0x701   :  { %5321 = dma.vmem_to_hbm [thread:$0]  %s5316_s1, 4096, %s9762_s12, [#allocation3], %s6916_s22, %s6916_s22, %s6917_s23  }
 0x702   :  { %6912 = dma.done.wait [#allocation3], 4096  }
 0x703   :  { %6913 = vsyncadd [#allocation3], 4294963200 }
 0x704   :  { %5325 = vsyncpa [#allocation3], 1 }

</bundles_post_ra>
